<compile_context>
chip_gen: v7x
topology: tpu7x:2x2x1
jax: 0.10.0
libtpu: 0.0.40
codegen_flags: <defaults>
</compile_context>

<pallas_src>
import jax
import jax.numpy as jnp
from jax import lax
from jax.experimental import pallas as pl
from jax.experimental.pallas import tpu as pltpu


# ----------------------------------------------------------------------------
# Fused Pallas kernel: maxpool2x2 + (conv3x3 + folded BN + ReLU) * 2
# ----------------------------------------------------------------------------
def _down_fused_kernel(x_ref, w1_ref, s1_ref, b1_ref, w2_ref, s2_ref, b2_ref,
                       o_ref, xpad_ref, hpad_ref):
    # x_ref   : (2, 2, Bb, Hp, Wp, Cin) bf16  pool-phase view of Bb images
    # w1_ref  : (9*Cin,  Cpad) bf16           conv1 taps, N zero-padded to Cpad
    # s1_ref  : (1, Cpad) f32                 folded BN1 scale (zero padded)
    # b1_ref  : (1, Cpad) f32                 folded BN1 shift incl. conv bias
    # w2_ref  : (9*Cpad, Cpad) bf16           conv2 taps, K and N zero-padded
    # s2_ref  : (1, Cpad) f32
    # b2_ref  : (1, Cpad) f32
    # o_ref   : (Bb, Hp, Wp, Cpad) f32        lane-dense (128) output block
    # xpad_ref: VMEM (Bb, Hp+2, Wp+2, Cin)  bf16  pooled input + zero halo
    # hpad_ref: VMEM (Bb, Hp+2, Wp+2, Cpad) bf16  conv1 activation + zero halo
    Bb, Hp, Wp, Cpad = o_ref.shape
    M = Bb * Hp * Wp

    # Zero ONLY the 1-pixel halo ring (perimeter) -- the interior is fully
    # overwritten every step.  Idempotent, so the grid axis stays order
    # independent ("parallel"/megacore-safe); no full-buffer store sweeps.
    def zero_halo(ref):
        b, h2, wd, c = ref.shape
        ref[:, 0:1, :, :] = jnp.zeros((b, 1, wd, c), ref.dtype)
        ref[:, h2 - 1:h2, :, :] = jnp.zeros((b, 1, wd, c), ref.dtype)
        ref[:, :, 0:1, :] = jnp.zeros((b, h2, 1, c), ref.dtype)
        ref[:, :, wd - 1:wd, :] = jnp.zeros((b, h2, 1, c), ref.dtype)

    zero_halo(xpad_ref)
    zero_halo(hpad_ref)

    # ---- fused 2x2 max-pool: elementwise max over the four pool phases ----
    # (kept in bf16: max commutes with the monotone bf16 rounding of the input)
    pooled = jnp.maximum(
        jnp.maximum(x_ref[0, 0, :, :, :, :], x_ref[0, 1, :, :, :, :]),
        jnp.maximum(x_ref[1, 0, :, :, :, :], x_ref[1, 1, :, :, :, :]))
    xpad_ref[:, 1:Hp + 1, 1:Wp + 1, :] = pooled          # no cast: already bf16

    def conv3x3_bn_relu(src, w_ref, s_ref, b_ref):
        # src: (Bb, Hp+2, Wp+2, C) bf16 value (loaded once from scratch).
        # im2col: 9 shifted taps concatenated on the lane axis -> ONE deep MXU
        # contraction with M = Bb*Hp*Wp, K = 9*C, N = Cpad.  dy slices the
        # untiled leading axis; dx is a tiny in-register sublane (XLU) shift,
        # so there are no masked per-tap VMEM re-loads.
        C = src.shape[-1]
        taps = [src[:, dy:dy + Hp, dx:dx + Wp, :]
                for dy in range(3) for dx in range(3)]
        patches = jnp.concatenate(taps, axis=-1)          # (Bb, Hp, Wp, 9*C)
        patches = patches.reshape(M, 9 * C)               # layout-preserving
        acc = jnp.dot(patches, w_ref[...],
                      preferred_element_type=jnp.float32)  # (M, Cpad) f32
        # folded BatchNorm (inference) + ReLU: f32, lane-dense (Cpad lanes)
        return jnp.maximum(acc * s_ref[0] + b_ref[0], 0.0)

    # conv1 (+BN+ReLU); result channels zero-padded to Cpad by construction.
    h = conv3x3_bn_relu(xpad_ref[...], w1_ref, s1_ref, b1_ref)   # (M, Cpad) f32
    # Intermediate activation stays in VMEM; single f32 -> bf16 cast here.
    hpad_ref[:, 1:Hp + 1, 1:Wp + 1, :] = (
        h.astype(hpad_ref.dtype).reshape(Bb, Hp, Wp, Cpad))

    # conv2 (+BN+ReLU): zero-padded K rows contribute exactly 0.
    y = conv3x3_bn_relu(hpad_ref[...], w2_ref, s2_ref, b2_ref)
    o_ref[...] = y.reshape(Bb, Hp, Wp, Cpad)   # unmasked, 128-lane-dense stores


# ----------------------------------------------------------------------------
# Wrapper helpers
# ----------------------------------------------------------------------------
def fold_bn(conv_bias, gamma, beta, running_mean, running_var, eps=1e-5):
    inv_std = 1.0 / jnp.sqrt(running_var + eps)
    scale = gamma * inv_std
    shift = (conv_bias - running_mean) * scale + beta
    return scale, shift


def _pad_lanes(v, cpad):
    # zero-pad a per-channel vector to Cpad lanes -> padded channels come out 0
    return jnp.pad(v, (0, cpad - v.shape[0])).reshape(1, cpad).astype(jnp.float32)


def _vmem_limit_bytes(Bb, Hp, Wp, Cin, Cpad):
    """Estimated in-kernel VMEM footprint (double-buffered blocks + temps)."""
    bf16, f32 = 2, 4
    m = Bb * Hp * Wp
    inp = 2 * (4 * m * Cin * bf16)                       # 2x-buffered input block
    wgt = (9 * Cin * Cpad + 9 * Cpad * Cpad) * bf16 + 4 * Cpad * f32
    out = 2 * (m * Cpad * f32)                           # 2x-buffered output block
    scr = Bb * (Hp + 2) * (Wp + 2) * (Cin + Cpad) * bf16
    tmp = 2 * m * 9 * Cpad * bf16 + 3 * m * Cpad * f32   # im2col + f32 epilogue
    est = inp + wgt + out + scr + tmp
    # 2x headroom; floor at the default scoped limit, cap at v7x's 64 MiB phys.
    return min(64 * 1024 * 1024, max(32 * 1024 * 1024, 2 * est))


# ----------------------------------------------------------------------------
# Forward pass
# ----------------------------------------------------------------------------
def down_forward(params, x_nchw):
    """Forward of `Down` (MaxPool2d(2) + DoubleConv).  NCHW in/out, float32."""
    B, Cin, H, W = x_nchw.shape
    # PyTorch MaxPool2d(2) floors odd spatial sizes -> crop to even.
    He, We = (H // 2) * 2, (W // 2) * 2
    if (He, We) != (H, W):
        x_nchw = x_nchw[:, :, :He, :We]
    Hp, Wp = He // 2, We // 2

    Cmid = params["w1"].shape[-1]
    Cout = params["w2"].shape[-1]
    # Pad intermediate/output channels (lane axis) to a multiple of 128 so the
    # dot results, BN/ReLU epilogue and all stores are unmasked & lane-dense.
    Cpad = 128 * pl.cdiv(max(Cmid, Cout), 128)

    # Batch-block several images per grid step so M = Bb*Hp*Wp is MXU-sized and
    # per-grid-step overhead is amortized.
    Bb = max(1, min(B, max(1, 512 // (Hp * Wp))))
    while B % Bb:
        Bb -= 1

    # Layout-only prep (one XLA copy, replaces the unavoidable NCHW->NHWC
    # conversion): NCHW -> (2, 2, B, Hp, Wp, Cin), leading dims = pool phases.
    # bf16 halves input DMA bytes; pooling commutes with bf16 rounding.
    x_ph = jnp.transpose(
        x_nchw.reshape(B, Cin, Hp, 2, Wp, 2),
        (3, 5, 0, 2, 4, 1)).astype(jnp.bfloat16)

    # conv1 weights: (3,3,Cin,Cmid) -> (9*Cin, Cpad), N zero-padded, bf16.
    w1 = params["w1"].reshape(9 * Cin, Cmid)
    w1 = jnp.pad(w1, ((0, 0), (0, Cpad - Cmid))).astype(jnp.bfloat16)
    # conv2 weights: zero-pad K (input channels) and N, then flatten the taps.
    w2 = jnp.pad(params["w2"],
                 ((0, 0), (0, 0), (0, Cpad - Cmid), (0, Cpad - Cout)))
    w2 = w2.reshape(9 * Cpad, Cpad).astype(jnp.bfloat16)

    s1, b1 = fold_bn(params["b1"], params["g1"], params["be1"],
                     params["m1"], params["v1"])
    s2, b2 = fold_bn(params["b2"], params["g2"], params["be2"],
                     params["m2"], params["v2"])
    s1p, b1p = _pad_lanes(s1, Cpad), _pad_lanes(b1, Cpad)
    s2p, b2p = _pad_lanes(s2, Cpad), _pad_lanes(b2, Cpad)

    out_pad = pl.pallas_call(
        _down_fused_kernel,
        out_shape=jax.ShapeDtypeStruct((B, Hp, Wp, Cpad), jnp.float32),
        grid_spec=pltpu.PrefetchScalarGridSpec(
            num_scalar_prefetch=0,
            grid=(B // Bb,),
            in_specs=[
                pl.BlockSpec((2, 2, Bb, Hp, Wp, Cin),
                             lambda b: (0, 0, b, 0, 0, 0)),
                pl.BlockSpec((9 * Cin, Cpad), lambda b: (0, 0)),
                pl.BlockSpec((1, Cpad), lambda b: (0, 0)),
                pl.BlockSpec((1, Cpad), lambda b: (0, 0)),
                pl.BlockSpec((9 * Cpad, Cpad), lambda b: (0, 0)),
                pl.BlockSpec((1, Cpad), lambda b: (0, 0)),
                pl.BlockSpec((1, Cpad), lambda b: (0, 0)),
            ],
            out_specs=pl.BlockSpec((Bb, Hp, Wp, Cpad),
                                   lambda b: (b, 0, 0, 0)),
            scratch_shapes=[
                pltpu.VMEM((Bb, Hp + 2, Wp + 2, Cin), jnp.bfloat16),
                pltpu.VMEM((Bb, Hp + 2, Wp + 2, Cpad), jnp.bfloat16),
            ]),
        compiler_params=pltpu.CompilerParams(
            dimension_semantics=("parallel",),
            vmem_limit_bytes=_vmem_limit_bytes(Bb, Hp, Wp, Cin, Cpad)),
    )(x_ph, w1, s1p, b1p, w2, s2p, b2p)

    # Slice the real channels and return NCHW at the PyTorch boundary.
    return jnp.transpose(out_pad[..., :Cout], (0, 3, 1, 2))


# ----------------------------------------------------------------------------
# Pure-JAX reference (emulates the kernel's bf16 matmul-input rounding)
# ----------------------------------------------------------------------------
def down_forward_ref(params, x_nchw):
    def round_bf16(a):
        return a.astype(jnp.bfloat16).astype(jnp.float32)

    B, C, H, W = x_nchw.shape
    x_nchw = x_nchw[:, :, :(H // 2) * 2, :(W // 2) * 2]
    x = jnp.transpose(x_nchw.astype(jnp.float32), (0, 2, 3, 1))   # NHWC
    B, H, W, C = x.shape
    pooled = jnp.max(x.reshape(B, H // 2, 2, W // 2, 2, C), axis=(2, 4))

    def conv_bn_relu(inp, w, scale, shift):
        y = lax.conv_general_dilated(
            round_bf16(inp), round_bf16(w), window_strides=(1, 1),
            padding="SAME", dimension_numbers=("NHWC", "HWIO", "NHWC"),
            precision=lax.Precision.HIGHEST)
        return jnp.maximum(y * scale + shift, 0.0)

    s1, b1 = fold_bn(params["b1"], params["g1"], params["be1"],
                     params["m1"], params["v1"])
    s2, b2 = fold_bn(params["b2"], params["g2"], params["be2"],
                     params["m2"], params["v2"])
    h = conv_bn_relu(pooled, params["w1"], s1, b1)
    y = conv_bn_relu(h, params["w2"], s2, b2)
    return jnp.transpose(y, (0, 3, 1, 2))


# ----------------------------------------------------------------------------
# Main
# ----------------------------------------------------------------------------
if __name__ == "__main__":
    key = jax.random.PRNGKey(0)

    # Down(in_channels=4, out_channels=8) => MaxPool2d(2) + DoubleConv(4, 8)
    B, Cin, H, W = 2, 4, 16, 16
    Cmid = Cout = 8            # DoubleConv default: mid_channels = out_channels

    ks = jax.random.split(key, 13)
    x = jax.random.normal(ks[0], (B, Cin, H, W), jnp.float32)

    params = {
        # conv weights in HWIO layout (a real PyTorch port would transpose the
        # OIHW weight via w.transpose(2, 3, 1, 0)).
        "w1": 0.1 * jax.random.normal(ks[1], (3, 3, Cin, Cmid), jnp.float32),
        "b1": 0.05 * jax.random.normal(ks[2], (Cmid,), jnp.float32),
        "g1": 1.0 + 0.1 * jax.random.normal(ks[3], (Cmid,), jnp.float32),
        "be1": 0.1 * jax.random.normal(ks[4], (Cmid,), jnp.float32),
        "m1": 0.1 * jax.random.normal(ks[5], (Cmid,), jnp.float32),
        "v1": 0.5 + jnp.abs(jax.random.normal(ks[6], (Cmid,), jnp.float32)),
        "w2": 0.1 * jax.random.normal(ks[7], (3, 3, Cmid, Cout), jnp.float32),
        "b2": 0.05 * jax.random.normal(ks[8], (Cout,), jnp.float32),
        "g2": 1.0 + 0.1 * jax.random.normal(ks[9], (Cout,), jnp.float32),
        "be2": 0.1 * jax.random.normal(ks[10], (Cout,), jnp.float32),
        "m2": 0.1 * jax.random.normal(ks[11], (Cout,), jnp.float32),
        "v2": 0.5 + jnp.abs(jax.random.normal(ks[12], (Cout,), jnp.float32)),
    }

    out = jax.block_until_ready(jax.jit(down_forward)(params, x))
    assert out.shape == (B, Cout, H // 2, W // 2), out.shape

    ref = jax.block_until_ready(down_forward_ref(params, x))
    max_err = float(jnp.max(jnp.abs(out - ref)))
    assert jnp.allclose(out, ref, atol=5e-3, rtol=5e-3), max_err

    print("KERNEL_OK")
</pallas_src>

<mosaic_0001>
module attributes {stable_mosaic.version = 11 : i64} {
  func.func @_down_fused_kernel(%arg0: i32, %arg1: memref<2x2x2x8x8x4xbf16, #tpu.memory_space<vmem>>, %arg2: memref<36x128xbf16, #tpu.memory_space<vmem>>, %arg3: memref<1x128xf32, #tpu.memory_space<vmem>>, %arg4: memref<1x128xf32, #tpu.memory_space<vmem>>, %arg5: memref<1152x128xbf16, #tpu.memory_space<vmem>>, %arg6: memref<1x128xf32, #tpu.memory_space<vmem>>, %arg7: memref<1x128xf32, #tpu.memory_space<vmem>>, %arg8: memref<2x8x8x128xf32, #tpu.memory_space<vmem>>, %arg9: memref<2x10x10x4xbf16, #tpu.memory_space<vmem>>, %arg10: memref<2x10x10x128xbf16, #tpu.memory_space<vmem>>) attributes {dimension_semantics = [#tpu.dimension_semantics<parallel>], iteration_bounds = array<i64: 1>, scalar_prefetch = 0 : i64, scratch_operands = 2 : i64, tpu.core_type = #tpu.core_type<tc>, window_params = [{transform_indices = @transform_0, window_bounds = array<i64: 2, 2, 2, 8, 8, 4>}, {pipeline_mode = #tpu.pipeline_mode<synchronous>, transform_indices = @transform_1, window_bounds = array<i64: 36, 128>}, {pipeline_mode = #tpu.pipeline_mode<synchronous>, transform_indices = @transform_2, window_bounds = array<i64: 1, 128>}, {pipeline_mode = #tpu.pipeline_mode<synchronous>, transform_indices = @transform_3, window_bounds = array<i64: 1, 128>}, {pipeline_mode = #tpu.pipeline_mode<synchronous>, transform_indices = @transform_4, window_bounds = array<i64: 1152, 128>}, {pipeline_mode = #tpu.pipeline_mode<synchronous>, transform_indices = @transform_5, window_bounds = array<i64: 1, 128>}, {pipeline_mode = #tpu.pipeline_mode<synchronous>, transform_indices = @transform_6, window_bounds = array<i64: 1, 128>}, {transform_indices = @transform_7, window_bounds = array<i64: 2, 8, 8, 128>}]} {
    %cst = arith.constant 0.000000e+00 : bf16
    %0 = vector.broadcast %cst : bf16 to vector<2x1x10x4xbf16>
    %c0 = arith.constant 0 : index
    %c0_0 = arith.constant 0 : index
    %c0_1 = arith.constant 0 : index
    %c0_2 = arith.constant 0 : index
    %1 = vector.load %arg9[%c0, %c0_0, %c0_1, %c0_2] : memref<2x10x10x4xbf16, #tpu.memory_space<vmem>>, vector<2x1x10x4xbf16>
    tpu.vector_store %arg9[%c0, %c0_0, %c0_1, %c0_2], %0 {strides = array<i32>} : memref<2x10x10x4xbf16, #tpu.memory_space<vmem>>, vector<2x1x10x4xbf16>,
    %cst_3 = arith.constant 0.000000e+00 : bf16
    %2 = vector.broadcast %cst_3 : bf16 to vector<2x1x10x4xbf16>
    %c0_4 = arith.constant 0 : index
    %c9 = arith.constant 9 : index
    %c0_5 = arith.constant 0 : index
    %c0_6 = arith.constant 0 : index
    %3 = vector.load %arg9[%c0_4, %c9, %c0_5, %c0_6] : memref<2x10x10x4xbf16, #tpu.memory_space<vmem>>, vector<2x1x10x4xbf16>
    tpu.vector_store %arg9[%c0_4, %c9, %c0_5, %c0_6], %2 {strides = array<i32>} : memref<2x10x10x4xbf16, #tpu.memory_space<vmem>>, vector<2x1x10x4xbf16>,
    %cst_7 = arith.constant 0.000000e+00 : bf16
    %4 = vector.broadcast %cst_7 : bf16 to vector<2x10x1x4xbf16>
    %c0_8 = arith.constant 0 : index
    %c0_9 = arith.constant 0 : index
    %c0_10 = arith.constant 0 : index
    %c0_11 = arith.constant 0 : index
    %5 = vector.load %arg9[%c0_8, %c0_9, %c0_10, %c0_11] : memref<2x10x10x4xbf16, #tpu.memory_space<vmem>>, vector<2x10x1x4xbf16>
    tpu.vector_store %arg9[%c0_8, %c0_9, %c0_10, %c0_11], %4 {strides = array<i32>} : memref<2x10x10x4xbf16, #tpu.memory_space<vmem>>, vector<2x10x1x4xbf16>,
    %cst_12 = arith.constant 0.000000e+00 : bf16
    %6 = vector.broadcast %cst_12 : bf16 to vector<2x10x1x4xbf16>
    %c0_13 = arith.constant 0 : index
    %c0_14 = arith.constant 0 : index
    %c9_15 = arith.constant 9 : index
    %c0_16 = arith.constant 0 : index
    %7 = vector.load %arg9[%c0_13, %c0_14, %c9_15, %c0_16] : memref<2x10x10x4xbf16, #tpu.memory_space<vmem>>, vector<2x10x1x4xbf16>
    tpu.vector_store %arg9[%c0_13, %c0_14, %c9_15, %c0_16], %6 {strides = array<i32>} : memref<2x10x10x4xbf16, #tpu.memory_space<vmem>>, vector<2x10x1x4xbf16>,
    %cst_17 = arith.constant 0.000000e+00 : bf16
    %8 = vector.broadcast %cst_17 : bf16 to vector<2x1x10x128xbf16>
    %c0_18 = arith.constant 0 : index
    %c0_19 = arith.constant 0 : index
    %c0_20 = arith.constant 0 : index
    %c0_21 = arith.constant 0 : index
    %9 = vector.load %arg10[%c0_18, %c0_19, %c0_20, %c0_21] : memref<2x10x10x128xbf16, #tpu.memory_space<vmem>>, vector<2x1x10x128xbf16>
    tpu.vector_store %arg10[%c0_18, %c0_19, %c0_20, %c0_21], %8 {strides = array<i32>} : memref<2x10x10x128xbf16, #tpu.memory_space<vmem>>, vector<2x1x10x128xbf16>,
    %cst_22 = arith.constant 0.000000e+00 : bf16
    %10 = vector.broadcast %cst_22 : bf16 to vector<2x1x10x128xbf16>
    %c0_23 = arith.constant 0 : index
    %c9_24 = arith.constant 9 : index
    %c0_25 = arith.constant 0 : index
    %c0_26 = arith.constant 0 : index
    %11 = vector.load %arg10[%c0_23, %c9_24, %c0_25, %c0_26] : memref<2x10x10x128xbf16, #tpu.memory_space<vmem>>, vector<2x1x10x128xbf16>
    tpu.vector_store %arg10[%c0_23, %c9_24, %c0_25, %c0_26], %10 {strides = array<i32>} : memref<2x10x10x128xbf16, #tpu.memory_space<vmem>>, vector<2x1x10x128xbf16>,
    %cst_27 = arith.constant 0.000000e+00 : bf16
    %12 = vector.broadcast %cst_27 : bf16 to vector<2x10x1x128xbf16>
    %c0_28 = arith.constant 0 : index
    %c0_29 = arith.constant 0 : index
    %c0_30 = arith.constant 0 : index
    %c0_31 = arith.constant 0 : index
    %13 = vector.load %arg10[%c0_28, %c0_29, %c0_30, %c0_31] : memref<2x10x10x128xbf16, #tpu.memory_space<vmem>>, vector<2x10x1x128xbf16>
    tpu.vector_store %arg10[%c0_28, %c0_29, %c0_30, %c0_31], %12 {strides = array<i32>} : memref<2x10x10x128xbf16, #tpu.memory_space<vmem>>, vector<2x10x1x128xbf16>,
    %cst_32 = arith.constant 0.000000e+00 : bf16
    %14 = vector.broadcast %cst_32 : bf16 to vector<2x10x1x128xbf16>
    %c0_33 = arith.constant 0 : index
    %c0_34 = arith.constant 0 : index
    %c9_35 = arith.constant 9 : index
    %c0_36 = arith.constant 0 : index
    %15 = vector.load %arg10[%c0_33, %c0_34, %c9_35, %c0_36] : memref<2x10x10x128xbf16, #tpu.memory_space<vmem>>, vector<2x10x1x128xbf16>
    tpu.vector_store %arg10[%c0_33, %c0_34, %c9_35, %c0_36], %14 {strides = array<i32>} : memref<2x10x10x128xbf16, #tpu.memory_space<vmem>>, vector<2x10x1x128xbf16>,
    %c0_37 = arith.constant 0 : index
    %c0_38 = arith.constant 0 : index
    %c0_39 = arith.constant 0 : index
    %c0_40 = arith.constant 0 : index
    %c0_41 = arith.constant 0 : index
    %c0_42 = arith.constant 0 : index
    %16 = vector.load %arg1[%c0_37, %c0_38, %c0_39, %c0_40, %c0_41, %c0_42] : memref<2x2x2x8x8x4xbf16, #tpu.memory_space<vmem>>, vector<1x1x2x8x8x4xbf16>
    %17 = vector.shape_cast %16 : vector<1x1x2x8x8x4xbf16> to vector<2x8x8x4xbf16>
    %c0_43 = arith.constant 0 : index
    %c1 = arith.constant 1 : index
    %c0_44 = arith.constant 0 : index
    %c0_45 = arith.constant 0 : index
    %c0_46 = arith.constant 0 : index
    %c0_47 = arith.constant 0 : index
    %18 = vector.load %arg1[%c0_43, %c1, %c0_44, %c0_45, %c0_46, %c0_47] : memref<2x2x2x8x8x4xbf16, #tpu.memory_space<vmem>>, vector<1x1x2x8x8x4xbf16>
    %19 = vector.shape_cast %18 : vector<1x1x2x8x8x4xbf16> to vector<2x8x8x4xbf16>
    %20 = arith.maximumf %17, %19 : vector<2x8x8x4xbf16>
    %c1_48 = arith.constant 1 : index
    %c0_49 = arith.constant 0 : index
    %c0_50 = arith.constant 0 : index
    %c0_51 = arith.constant 0 : index
    %c0_52 = arith.constant 0 : index
    %c0_53 = arith.constant 0 : index
    %21 = vector.load %arg1[%c1_48, %c0_49, %c0_50, %c0_51, %c0_52, %c0_53] : memref<2x2x2x8x8x4xbf16, #tpu.memory_space<vmem>>, vector<1x1x2x8x8x4xbf16>
    %22 = vector.shape_cast %21 : vector<1x1x2x8x8x4xbf16> to vector<2x8x8x4xbf16>
    %c1_54 = arith.constant 1 : index
    %c1_55 = arith.constant 1 : index
    %c0_56 = arith.constant 0 : index
    %c0_57 = arith.constant 0 : index
    %c0_58 = arith.constant 0 : index
    %c0_59 = arith.constant 0 : index
    %23 = vector.load %arg1[%c1_54, %c1_55, %c0_56, %c0_57, %c0_58, %c0_59] : memref<2x2x2x8x8x4xbf16, #tpu.memory_space<vmem>>, vector<1x1x2x8x8x4xbf16>
    %24 = vector.shape_cast %23 : vector<1x1x2x8x8x4xbf16> to vector<2x8x8x4xbf16>
    %25 = arith.maximumf %22, %24 : vector<2x8x8x4xbf16>
    %26 = arith.maximumf %20, %25 : vector<2x8x8x4xbf16>
    %c0_60 = arith.constant 0 : index
    %c1_61 = arith.constant 1 : index
    %c1_62 = arith.constant 1 : index
    %c0_63 = arith.constant 0 : index
    %27 = vector.load %arg9[%c0_60, %c1_61, %c1_62, %c0_63] : memref<2x10x10x4xbf16, #tpu.memory_space<vmem>>, vector<2x8x8x4xbf16>
    tpu.vector_store %arg9[%c0_60, %c1_61, %c1_62, %c0_63], %26 {strides = array<i32>} : memref<2x10x10x4xbf16, #tpu.memory_space<vmem>>, vector<2x8x8x4xbf16>,
    %c0_64 = arith.constant 0 : index
    %c0_65 = arith.constant 0 : index
    %c0_66 = arith.constant 0 : index
    %c0_67 = arith.constant 0 : index
    %28 = vector.load %arg9[%c0_64, %c0_65, %c0_66, %c0_67] : memref<2x10x10x4xbf16, #tpu.memory_space<vmem>>, vector<2x10x10x4xbf16>
    %29 = vector.extract_strided_slice %28 {offsets = [0, 0, 0, 0], sizes = [2, 8, 8, 4], strides = [1, 1, 1, 1]} : vector<2x10x10x4xbf16> to vector<2x8x8x4xbf16>
    %30 = vector.extract_strided_slice %28 {offsets = [0, 0, 1, 0], sizes = [2, 8, 8, 4], strides = [1, 1, 1, 1]} : vector<2x10x10x4xbf16> to vector<2x8x8x4xbf16>
    %31 = vector.extract_strided_slice %28 {offsets = [0, 0, 2, 0], sizes = [2, 8, 8, 4], strides = [1, 1, 1, 1]} : vector<2x10x10x4xbf16> to vector<2x8x8x4xbf16>
    %32 = vector.extract_strided_slice %28 {offsets = [0, 1, 0, 0], sizes = [2, 8, 8, 4], strides = [1, 1, 1, 1]} : vector<2x10x10x4xbf16> to vector<2x8x8x4xbf16>
    %33 = vector.extract_strided_slice %28 {offsets = [0, 1, 1, 0], sizes = [2, 8, 8, 4], strides = [1, 1, 1, 1]} : vector<2x10x10x4xbf16> to vector<2x8x8x4xbf16>
    %34 = vector.extract_strided_slice %28 {offsets = [0, 1, 2, 0], sizes = [2, 8, 8, 4], strides = [1, 1, 1, 1]} : vector<2x10x10x4xbf16> to vector<2x8x8x4xbf16>
    %35 = vector.extract_strided_slice %28 {offsets = [0, 2, 0, 0], sizes = [2, 8, 8, 4], strides = [1, 1, 1, 1]} : vector<2x10x10x4xbf16> to vector<2x8x8x4xbf16>
    %36 = vector.extract_strided_slice %28 {offsets = [0, 2, 1, 0], sizes = [2, 8, 8, 4], strides = [1, 1, 1, 1]} : vector<2x10x10x4xbf16> to vector<2x8x8x4xbf16>
    %37 = vector.extract_strided_slice %28 {offsets = [0, 2, 2, 0], sizes = [2, 8, 8, 4], strides = [1, 1, 1, 1]} : vector<2x10x10x4xbf16> to vector<2x8x8x4xbf16>
    %38 = tpu.concatenate %29, %30, %31, %32, %33, %34, %35, %36, %37 in 3 : vector<2x8x8x4xbf16>, vector<2x8x8x4xbf16>, vector<2x8x8x4xbf16>, vector<2x8x8x4xbf16>, vector<2x8x8x4xbf16>, vector<2x8x8x4xbf16>, vector<2x8x8x4xbf16>, vector<2x8x8x4xbf16>, vector<2x8x8x4xbf16> -> vector<2x8x8x36xbf16>
    %39 = vector.shape_cast %38 : vector<2x8x8x36xbf16> to vector<128x36xbf16>
    %c0_68 = arith.constant 0 : index
    %c0_69 = arith.constant 0 : index
    %40 = vector.load %arg2[%c0_68, %c0_69] : memref<36x128xbf16, #tpu.memory_space<vmem>>, vector<36x128xbf16>
    %cst_70 = arith.constant dense<0.000000e+00> : vector<128x128xf32>
    %41 = tpu.matmul %39, %40, %cst_70 {dimension_numbers = #tpu.dot_dimension_numbers<[1], [0], [0], [1], [0, 0, 1, 1], [], []>} : vector<128x36xbf16>, vector<36x128xbf16>, vector<128x128xf32> -> vector<128x128xf32>
    %c0_71 = arith.constant 0 : index
    %c0_72 = arith.constant 0 : index
    %42 = vector.load %arg3[%c0_71, %c0_72] : memref<1x128xf32, #tpu.memory_space<vmem>>, vector<1x128xf32>
    %43 = vector.shape_cast %42 : vector<1x128xf32> to vector<128xf32>
    %44 = vector.shape_cast %43 : vector<128xf32> to vector<1x128xf32>
    %45 = vector.broadcast %44 : vector<1x128xf32> to vector<128x128xf32>
    %46 = arith.mulf %41, %45 : vector<128x128xf32>
    %c0_73 = arith.constant 0 : index
    %c0_74 = arith.constant 0 : index
    %47 = vector.load %arg4[%c0_73, %c0_74] : memref<1x128xf32, #tpu.memory_space<vmem>>, vector<1x128xf32>
    %48 = vector.shape_cast %47 : vector<1x128xf32> to vector<128xf32>
    %49 = vector.shape_cast %48 : vector<128xf32> to vector<1x128xf32>
    %50 = vector.broadcast %49 : vector<1x128xf32> to vector<128x128xf32>
    %51 = arith.addf %46, %50 : vector<128x128xf32>
    %cst_75 = arith.constant 0.000000e+00 : f32
    %52 = vector.broadcast %cst_75 : f32 to vector<128x128xf32>
    %53 = arith.maximumf %51, %52 : vector<128x128xf32>
    %54 = arith.truncf %53 : vector<128x128xf32> to vector<128x128xbf16>
    %55 = vector.shape_cast %54 : vector<128x128xbf16> to vector<2x8x8x128xbf16>
    %c0_76 = arith.constant 0 : index
    %c1_77 = arith.constant 1 : index
    %c1_78 = arith.constant 1 : index
    %c0_79 = arith.constant 0 : index
    %56 = vector.load %arg10[%c0_76, %c1_77, %c1_78, %c0_79] : memref<2x10x10x128xbf16, #tpu.memory_space<vmem>>, vector<2x8x8x128xbf16>
    tpu.vector_store %arg10[%c0_76, %c1_77, %c1_78, %c0_79], %55 {strides = array<i32>} : memref<2x10x10x128xbf16, #tpu.memory_space<vmem>>, vector<2x8x8x128xbf16>,
    %c0_80 = arith.constant 0 : index
    %c0_81 = arith.constant 0 : index
    %c0_82 = arith.constant 0 : index
    %c0_83 = arith.constant 0 : index
    %57 = vector.load %arg10[%c0_80, %c0_81, %c0_82, %c0_83] : memref<2x10x10x128xbf16, #tpu.memory_space<vmem>>, vector<2x10x10x128xbf16>
    %58 = vector.extract_strided_slice %57 {offsets = [0, 0, 0, 0], sizes = [2, 8, 8, 128], strides = [1, 1, 1, 1]} : vector<2x10x10x128xbf16> to vector<2x8x8x128xbf16>
    %59 = vector.extract_strided_slice %57 {offsets = [0, 0, 1, 0], sizes = [2, 8, 8, 128], strides = [1, 1, 1, 1]} : vector<2x10x10x128xbf16> to vector<2x8x8x128xbf16>
    %60 = vector.extract_strided_slice %57 {offsets = [0, 0, 2, 0], sizes = [2, 8, 8, 128], strides = [1, 1, 1, 1]} : vector<2x10x10x128xbf16> to vector<2x8x8x128xbf16>
    %61 = vector.extract_strided_slice %57 {offsets = [0, 1, 0, 0], sizes = [2, 8, 8, 128], strides = [1, 1, 1, 1]} : vector<2x10x10x128xbf16> to vector<2x8x8x128xbf16>
    %62 = vector.extract_strided_slice %57 {offsets = [0, 1, 1, 0], sizes = [2, 8, 8, 128], strides = [1, 1, 1, 1]} : vector<2x10x10x128xbf16> to vector<2x8x8x128xbf16>
    %63 = vector.extract_strided_slice %57 {offsets = [0, 1, 2, 0], sizes = [2, 8, 8, 128], strides = [1, 1, 1, 1]} : vector<2x10x10x128xbf16> to vector<2x8x8x128xbf16>
    %64 = vector.extract_strided_slice %57 {offsets = [0, 2, 0, 0], sizes = [2, 8, 8, 128], strides = [1, 1, 1, 1]} : vector<2x10x10x128xbf16> to vector<2x8x8x128xbf16>
    %65 = vector.extract_strided_slice %57 {offsets = [0, 2, 1, 0], sizes = [2, 8, 8, 128], strides = [1, 1, 1, 1]} : vector<2x10x10x128xbf16> to vector<2x8x8x128xbf16>
    %66 = vector.extract_strided_slice %57 {offsets = [0, 2, 2, 0], sizes = [2, 8, 8, 128], strides = [1, 1, 1, 1]} : vector<2x10x10x128xbf16> to vector<2x8x8x128xbf16>
    %67 = tpu.concatenate %58, %59, %60, %61, %62, %63, %64, %65, %66 in 3 : vector<2x8x8x128xbf16>, vector<2x8x8x128xbf16>, vector<2x8x8x128xbf16>, vector<2x8x8x128xbf16>, vector<2x8x8x128xbf16>, vector<2x8x8x128xbf16>, vector<2x8x8x128xbf16>, vector<2x8x8x128xbf16>, vector<2x8x8x128xbf16> -> vector<2x8x8x1152xbf16>
    %68 = vector.shape_cast %67 : vector<2x8x8x1152xbf16> to vector<128x1152xbf16>
    %c0_84 = arith.constant 0 : index
    %c0_85 = arith.constant 0 : index
    %69 = vector.load %arg5[%c0_84, %c0_85] : memref<1152x128xbf16, #tpu.memory_space<vmem>>, vector<1152x128xbf16>
    %cst_86 = arith.constant dense<0.000000e+00> : vector<128x128xf32>
    %70 = tpu.matmul %68, %69, %cst_86 {dimension_numbers = #tpu.dot_dimension_numbers<[1], [0], [0], [1], [0, 0, 1, 1], [], []>} : vector<128x1152xbf16>, vector<1152x128xbf16>, vector<128x128xf32> -> vector<128x128xf32>
    %c0_87 = arith.constant 0 : index
    %c0_88 = arith.constant 0 : index
    %71 = vector.load %arg6[%c0_87, %c0_88] : memref<1x128xf32, #tpu.memory_space<vmem>>, vector<1x128xf32>
    %72 = vector.shape_cast %71 : vector<1x128xf32> to vector<128xf32>
    %73 = vector.shape_cast %72 : vector<128xf32> to vector<1x128xf32>
    %74 = vector.broadcast %73 : vector<1x128xf32> to vector<128x128xf32>
    %75 = arith.mulf %70, %74 : vector<128x128xf32>
    %c0_89 = arith.constant 0 : index
    %c0_90 = arith.constant 0 : index
    %76 = vector.load %arg7[%c0_89, %c0_90] : memref<1x128xf32, #tpu.memory_space<vmem>>, vector<1x128xf32>
    %77 = vector.shape_cast %76 : vector<1x128xf32> to vector<128xf32>
    %78 = vector.shape_cast %77 : vector<128xf32> to vector<1x128xf32>
    %79 = vector.broadcast %78 : vector<1x128xf32> to vector<128x128xf32>
    %80 = arith.addf %75, %79 : vector<128x128xf32>
    %cst_91 = arith.constant 0.000000e+00 : f32
    %81 = vector.broadcast %cst_91 : f32 to vector<128x128xf32>
    %82 = arith.maximumf %80, %81 : vector<128x128xf32>
    %83 = vector.shape_cast %82 : vector<128x128xf32> to vector<2x8x8x128xf32>
    %c0_92 = arith.constant 0 : index
    %c0_93 = arith.constant 0 : index
    %c0_94 = arith.constant 0 : index
    %c0_95 = arith.constant 0 : index
    %84 = vector.load %arg8[%c0_92, %c0_93, %c0_94, %c0_95] : memref<2x8x8x128xf32, #tpu.memory_space<vmem>>, vector<2x8x8x128xf32>
    tpu.vector_store %arg8[%c0_92, %c0_93, %c0_94, %c0_95], %83 {strides = array<i32>} : memref<2x8x8x128xf32, #tpu.memory_space<vmem>>, vector<2x8x8x128xf32>,
    return
  }
  func.func @transform_0(%arg0: i32) -> (i32, i32, i32, i32, i32, i32) {
    %c0_i32 = arith.constant 0 : i32
    %c0_i32_0 = arith.constant 0 : i32
    %c0_i32_1 = arith.constant 0 : i32
    %c0_i32_2 = arith.constant 0 : i32
    %c0_i32_3 = arith.constant 0 : i32
    %c0_i32_4 = arith.constant 0 : i32
    return %c0_i32, %c0_i32_0, %arg0, %c0_i32_1, %c0_i32_2, %c0_i32_3 : i32, i32, i32, i32, i32, i32
  }
  func.func @transform_1(%arg0: i32) -> (i32, i32) {
    %c0_i32 = arith.constant 0 : i32
    %c0_i32_0 = arith.constant 0 : i32
    %c0_i32_1 = arith.constant 0 : i32
    return %c0_i32, %c0_i32_0 : i32, i32
  }
  func.func @transform_2(%arg0: i32) -> (i32, i32) {
    %c0_i32 = arith.constant 0 : i32
    %c0_i32_0 = arith.constant 0 : i32
    %c0_i32_1 = arith.constant 0 : i32
    return %c0_i32, %c0_i32_0 : i32, i32
  }
  func.func @transform_3(%arg0: i32) -> (i32, i32) {
    %c0_i32 = arith.constant 0 : i32
    %c0_i32_0 = arith.constant 0 : i32
    %c0_i32_1 = arith.constant 0 : i32
    return %c0_i32, %c0_i32_0 : i32, i32
  }
  func.func @transform_4(%arg0: i32) -> (i32, i32) {
    %c0_i32 = arith.constant 0 : i32
    %c0_i32_0 = arith.constant 0 : i32
    %c0_i32_1 = arith.constant 0 : i32
    return %c0_i32, %c0_i32_0 : i32, i32
  }
  func.func @transform_5(%arg0: i32) -> (i32, i32) {
    %c0_i32 = arith.constant 0 : i32
    %c0_i32_0 = arith.constant 0 : i32
    %c0_i32_1 = arith.constant 0 : i32
    return %c0_i32, %c0_i32_0 : i32, i32
  }
  func.func @transform_6(%arg0: i32) -> (i32, i32) {
    %c0_i32 = arith.constant 0 : i32
    %c0_i32_0 = arith.constant 0 : i32
    %c0_i32_1 = arith.constant 0 : i32
    return %c0_i32, %c0_i32_0 : i32, i32
  }
  func.func @transform_7(%arg0: i32) -> (i32, i32, i32, i32) {
    %c0_i32 = arith.constant 0 : i32
    %c0_i32_0 = arith.constant 0 : i32
    %c0_i32_1 = arith.constant 0 : i32
    %c0_i32_2 = arith.constant 0 : i32
    return %arg0, %c0_i32, %c0_i32_0, %c0_i32_1 : i32, i32, i32, i32
  }
}

</mosaic_0001>

<bundles_post_ra>
// kernel: down_forward.1
= control target key start
LH: loop header
LB: loop body
LE: loop exit
PB: predicated region body
PF: predicated region fallthrough
CT: control target
= control target key end

     0   :  { %vm27_vm0 = vcmask 27648   ;;  %vm29_vm1 = vcmask 24576   ;;  %vm39_vm2 = vsmask.f32 256  ;;  %v4475_v0 = vmov 0   ;;  %s4476_s18 = smov 8   ;;  %s6468_s0 = inlined_call_operand.vmem [shape: bf16[2,2,2,8,8,4], index: 0, kind: input, shape index: {}]   ;;  %s6469_s1 = inlined_call_operand.vmem [shape: bf16[36,128], index: 1, kind: input, shape index: {}]   ;;  %s6470_s4 = inlined_call_operand.vmem [shape: bf16[1152,128], index: 4, kind: input, shape index: {}]   ;;  %s6471_s2 = inlined_call_operand.vmem [shape: f32[1,128], index: 2, kind: input, shape index: {}]   ;;  %s6472_s3 = inlined_call_operand.vmem [shape: f32[1,128], index: 3, kind: input, shape index: {}]   ;;  %s6473_s5 = inlined_call_operand.vmem [shape: f32[1,128], index: 5, kind: input, shape index: {}]   ;;  %s6474_s6 = inlined_call_operand.vmem [shape: f32[1,128], index: 6, kind: input, shape index: {}]   ;;  %s6475_s7 = inlined_call_operand.vmem [shape: f32[2,8,8,128], index: 7, kind: output, shape index: {}]  }
   0x1   :  { %28 = vst.msk [vmem:[#allocation2] sm:$0xf] %vm27_vm0, %v4475_v0  ;;  %vm4528_vm3 = vmand %vm29_vm1, %vm39_vm2  ;;  %vm101_vm4 = vsmask.f32 7938  ;;  %v47_v2 = vld [vmem:[#allocation2 + $0x10] sm:$0x1] }
   0x2   :  { %30 = vst.msk [vmem:[#allocation2 + $0x4] sm:$0x1] %vm29_vm1, %v4475_v0  ;;  %32 = vst.msk [vmem:[#allocation2 + $0x54] sm:$0x1] %vm29_vm1, %v4475_v0  ;;  %v48_v4 = vsel %vm4528_vm3, 0, %v47_v2  ;;  %s4477_s23 = smov 12  }
   0x3   :  { %31 = vst.msk [vmem:[#allocation2 + $0x50] sm:$0xf] %vm27_vm0, %v4475_v0  ;;  %34 = vst.msk [vmem:[#allocation2 + $0x48] sm:$0xf] %vm27_vm0, %v4475_v0  ;;  %v109_v5 = vld [vmem:[#allocation2 + $0x14] sm:$0x1] }
   0x4   :  { %35 = vst.msk [vmem:[#allocation2 + $0x4c] sm:$0x1] %vm29_vm1, %v4475_v0  ;;  %37 = vst.msk [vmem:[#allocation2 + $0x9c] sm:$0x1] %vm29_vm1, %v4475_v0  ;;  %v296_v6 = vld [vmem:[%s6468_s0 + $0x4] sm:$0xf] }
   0x5   :  { %36 = vst.msk [vmem:[#allocation2 + $0x98] sm:$0xf] %vm27_vm0, %v4475_v0  ;;  %163 = vst [vmem:[#allocation3] sm:$0xf] %v4475_v0  ;;  %v3670_v8 = vld [vmem:[%s6468_s0 + $0x44] sm:$0xf] }
   0x6   :  { %164 = vst [vmem:[#allocation3 + $0x4] sm:$0x1] %v4475_v0  ;;  %165 = vst [vmem:[#allocation3 + $0x50] sm:$0xf] %v4475_v0  ;;  %v3686_v9 = vld [vmem:[%s6468_s0 + $0x84] sm:$0xf]  ;;  %v329_v10 = vmax.bf16 %v3670_v8, %v296_v6 }
   0x7   :  { %166 = vst [vmem:[#allocation3 + $0x54] sm:$0x1] %v4475_v0  ;;  %168 = vst [vmem:[#allocation3 + $0x48] sm:$0xf] %v4475_v0  ;;  %v3702_v11 = vld [vmem:[%s6468_s0 + $0xc4] sm:$0xf] }
   0x8   :  { %169 = vst [vmem:[#allocation3 + $0x4c] sm:$0x1] %v4475_v0  ;;  %170 = vst [vmem:[#allocation3 + $0x98] sm:$0xf] %v4475_v0  ;;  %v44_v12 = vld [vmem:[#allocation2 + $0x8] sm:$0x1]  ;;  %v379_v13 = vmax.bf16 %v3702_v11, %v3686_v9 }
   0x9   :  { %171 = vst [vmem:[#allocation3 + $0x9c] sm:$0x1] %v4475_v0  ;;  %vm4540_vm5 = vmand %vm29_vm1, %vm101_vm4  ;;  %v45_v14 = vsel %vm4528_vm3, 0, %v44_v12  ;;  %v295_v15 = vld [vmem:[%s6468_s0] sm:$0xf]  ;;  %s4478_s22 = smov 4  }
   0xa   :  { %49 = vst [vmem:[#allocation2 + $0x10] sm:$0x1] %v48_v4  ;;  %v110_v7 = vsel %vm4540_vm5, 0, %v109_v5  ;;  %v3669_v16 = vld [vmem:[%s6468_s0 + $0x40] sm:$0xf]  ;;  %v395_v21 = vmax.bf16 %v379_v13, %v329_v10  ;;  %vm4596_vm6 = vmand %vm27_vm0, %vm101_vm4  ;;  %s4479_s13 = smov 16  }
   0xb   :  { %111 = vst [vmem:[#allocation2 + $0x14] sm:$0x1] %v110_v7  ;;  %46 = vst [vmem:[#allocation2 + $0x8] sm:$0x1] %v45_v14  ;;  %v328_v17 = vmax.bf16 %v3669_v16, %v295_v15  ;;  %v3685_v18 = vld [vmem:[%s6468_s0 + $0x80] sm:$0xf] }
   0xc   :  { %v3701_v19 = vld [vmem:[%s6468_s0 + $0xc0] sm:$0xf]  ;;  %v53_v20 = vld [vmem:[#allocation2 + $0x20] sm:$0x1]  ;;  %v115_v24 = vld [vmem:[#allocation2 + $0x24] sm:$0x1] }
   0xd   :  { %v378_v22 = vmax.bf16 %v3701_v19, %v3685_v18  ;;  %v54_v23 = vsel %vm4528_vm3, 0, %v53_v20  ;;  %v298_v25 = vld [vmem:[%s6468_s0 + $0xc] sm:$0xf]  ;;  %v41_v26 = vld [vmem:[#allocation2] sm:$0x1]  ;;  %v116_v28 = vsel %vm4540_vm5, 0, %v115_v24 }
   0xe   :  { %v103_v27 = vld [vmem:[#allocation2 + $0x4] sm:$0x1]  ;;  %55 = vst [vmem:[#allocation2 + $0x20] sm:$0x1] %v54_v23  ;;  %v42_v29 = vsel %vm4528_vm3, 0, %v41_v26  ;;  %v419_v31 = vshrl.u32 %v395_v21, 16 }
   0xf   :  { %v104_v30 = vsel %vm4540_vm5, 0, %v103_v27  ;;  %v422_v32 = vshll.u32 %v395_v21, 16  ;;  %117 = vst [vmem:[#allocation2 + $0x24] sm:$0x1] %v116_v28  ;;  %v3672_v33 = vld [vmem:[%s6468_s0 + $0x4c] sm:$0xf]  ;;  %v394_v35 = vmax.bf16 %v378_v22, %v328_v17 }
  0x10   :  { %43 = vst [vmem:[#allocation2] sm:$0x1] %v42_v29  ;;  %105 = vst [vmem:[#allocation2 + $0x4] sm:$0x1] %v104_v30  ;;  %v331_v36 = vmax.bf16 %v3672_v33, %v298_v25  ;;  %v3688_v37 = vld [vmem:[%s6468_s0 + $0x8c] sm:$0xf] }
  0x11   :  { %v579_v34 = vld [vmem:[#allocation2 + $0x10] sm:$0xf]  ;;  %v3704_v38 = vld [vmem:[%s6468_s0 + $0xcc] sm:$0xf]  ;;  %v421_v39 = vrot.slane %v419_v31, 7  ;;  %v411_v44 = vshrl.u32 %v394_v35, 16 }
  0x12   :  { %v582_v40 = vld [vmem:[#allocation2 + $0x14] sm:$0x1]  ;;  %v381_v41 = vmax.bf16 %v3704_v38, %v3688_v37  ;;  %v50_v42 = vld [vmem:[#allocation2 + $0x18] sm:$0x1]  ;;  %v414_v45 = vshll.u32 %v394_v35, 16  ;;  %s4480_s25 = smov 20  }
  0x13   :  { %v51_v46 = vsel %vm4528_vm3, 0, %v50_v42  ;;  %v297_v47 = vld [vmem:[%s6468_s0 + $0x8] sm:$0xf]  ;;  %v424_v48 = vor.u32 %v422_v32, %v421_v39  ;;  %v425_v49 = vrot.slane %v421_v39, 4  ;;  %v4608_v52 = vrot.slane %v411_v44, 7  ;;  %s4481_s19 = smov 24  }
  0x14   :  { %v397_v50 = vmax.bf16 %v381_v41, %v331_v36  ;;  %52 = vst [vmem:[#allocation2 + $0x18] sm:$0x1] %v51_v46  ;;  %v3671_v51 = vld [vmem:[%s6468_s0 + $0x48] sm:$0xf]  ;;  %v573_v58 = vld [vmem:[#allocation2 + $0x8] sm:$0xf] }
  0x15   :  { %v330_v53 = vmax.bf16 %v3671_v51, %v297_v47  ;;  %v3687_v54 = vld [vmem:[%s6468_s0 + $0x88] sm:$0xf]  ;;  %v580_v56 = vsel %vm4596_vm6, %v424_v48, %v579_v34  ;;  %v583_v57 = vsel %vm4528_vm3, %v425_v49, %v582_v40  ;;  %v106_v61 = vld [vmem:[#allocation2 + $0xc] sm:$0x1]  ;;  %v416_v62 = vor.u32 %v414_v45, %v4608_v52  ;;  %v112_v5 = vld [vmem:[#allocation2 + $0x1c] sm:$0x1] }
  0x16   :  { %v3703_v55 = vld [vmem:[%s6468_s0 + $0xc8] sm:$0xf]  ;;  %v435_v59 = vshrl.u32 %v397_v50, 16  ;;  %v438_v60 = vshll.u32 %v397_v50, 16  ;;  %581 = vst [vmem:[#allocation2 + $0x10] sm:$0xf] %v580_v56 }
  0x17   :  { %584 = vst [vmem:[#allocation2 + $0x14] sm:$0x1] %v583_v57  ;;  %v591_v63 = vld [vmem:[#allocation2 + $0x20] sm:$0xf]  ;;  %v594_v0 = vld [vmem:[#allocation2 + $0x24] sm:$0x1]  ;;  %v380_v2 = vmax.bf16 %v3703_v55, %v3687_v54  ;;  %v574_v11 = vsel %vm4596_vm6, %v416_v62, %v573_v58 }
  0x18   :  { %v107_v4 = vsel %vm4540_vm5, 0, %v106_v61  ;;  %v669_v6 = vld [vmem:[#allocation2] sm:$0xf]  ;;  %v670_v7 = vld [vmem:[#allocation2 + $0x4] sm:$0x1]  ;;  %v437_v8 = vrot.slane %v435_v59, 7 }
  0x19   :  { %108 = vst [vmem:[#allocation2 + $0xc] sm:$0x1] %v107_v4  ;;  %v113_v9 = vsel %vm4540_vm5, 0, %v112_v5  ;;  %v4625_v10 = vcombine.low %v669_v6, %v670_v7  ;;  %v396_v12 = vmax.bf16 %v380_v2, %v330_v53  ;;  %v56_v13 = vld [vmem:[#allocation2 + $0x28] sm:$0x1]  ;;  %v417_v24 = vrot.slane %v4608_v52, 4 }
  0x1a   :  { %114 = vst [vmem:[#allocation2 + $0x1c] sm:$0x1] %v113_v9  ;;  %v118_v14 = vld [vmem:[#allocation2 + $0x2c] sm:$0x1]  ;;  %v299_v15 = vld [vmem:[%s6468_s0 + $0x10] sm:$0xf]  ;;  %v440_v16 = vor.u32 %v438_v60, %v437_v8 }
  0x1b   :  { %575 = vst [vmem:[#allocation2 + $0x8] sm:$0xf] %v574_v11  ;;  %v441_v17 = vrot.slane %v437_v8, 4  ;;  %v57_v18 = vsel %vm4528_vm3, 0, %v56_v13  ;;  %v119_v19 = vsel %vm4540_vm5, 0, %v118_v14  ;;  %v933_v21 = vrot.slane %v4625_v10, 1 }
  0x1c   :  { %v3673_v20 = vld [vmem:[%s6468_s0 + $0x50] sm:$0xf]  ;;  %v427_v22 = vshrl.u32 %v396_v12, 16  ;;  %v430_v23 = vshll.u32 %v396_v12, 16  ;;  %58 = vst [vmem:[#allocation2 + $0x28] sm:$0x1] %v57_v18  ;;  %v592_v25 = vsel %vm4596_vm6, %v440_v16, %v591_v63 }
  0x1d   :  { %120 = vst [vmem:[#allocation2 + $0x2c] sm:$0x1] %v119_v19  ;;  %v595_v26 = vsel %vm4528_vm3, %v441_v17, %v594_v0  ;;  %v585_v27 = vld [vmem:[#allocation2 + $0x18] sm:$0xf]  ;;  %v332_v28 = vmax.bf16 %v3673_v20, %v299_v15  ;;  %v3689_v29 = vld [vmem:[%s6468_s0 + $0x90] sm:$0xf]  ;;  %949 = vrot.lane.b32.xlu0 %v933_v21, %s4476_s18 }
  0x1e   :  { %v3705_v30 = vld [vmem:[%s6468_s0 + $0xd0] sm:$0xf]  ;;  %593 = vst [vmem:[#allocation2 + $0x20] sm:$0xf] %v592_v25  ;;  %596 = vst [vmem:[#allocation2 + $0x24] sm:$0x1] %v595_v26 }
  0x1f   :  { %v429_v31 = vrot.slane %v427_v22, 7  ;;  %v382_v32 = vmax.bf16 %v3705_v30, %v3689_v29  ;;  %v59_v33 = vld [vmem:[#allocation2 + $0x30] sm:$0x1]  ;;  %v121_v34 = vld [vmem:[#allocation2 + $0x34] sm:$0x1]  ;;  %v792_v57 = vshll.u32 %v4625_v10, 16 }
  0x20   :  { %v673_v35 = vld [vmem:[#allocation2 + $0x10] sm:$0xf]  ;;  %v674_v36 = vld [vmem:[#allocation2 + $0x14] sm:$0x1]  ;;  %v60_v37 = vsel %vm4528_vm3, 0, %v59_v33  ;;  %v122_v47 = vsel %vm4540_vm5, 0, %v121_v34 }
  0x21   :  { %v4654_v38 = vcombine.low %v673_v35, %v673_v35  ;;  %v432_v39 = vor.u32 %v430_v23, %v429_v31  ;;  %v576_v40 = vld [vmem:[#allocation2 + $0xc] sm:$0x1]  ;;  %v433_v41 = vrot.slane %v429_v31, 4  ;;  %61 = vst [vmem:[#allocation2 + $0x30] sm:$0x1] %v60_v37  ;;  %v398_v46 = vmax.bf16 %v382_v32, %v332_v28  ;;  %s4482_s12 = smov 28  }
  0x22   :  { %v300_v42 = vld [vmem:[%s6468_s0 + $0x14] sm:$0xf]  ;;  %v577_v44 = vsel %vm4528_vm3, %v417_v24, %v576_v40  ;;  %v588_v45 = vld [vmem:[#allocation2 + $0x1c] sm:$0x1]  ;;  %v671_v49 = vld [vmem:[#allocation2 + $0x8] sm:$0xf]  ;;  %v4675_v56 = vcombine.low %v673_v35, %v674_v36 }
  0x23   :  { %v3674_v48 = vld [vmem:[%s6468_s0 + $0x54] sm:$0xf]  ;;  %1003 = vrot.lane.b32.xlu1 %v4654_v38, %s4477_s23  ;;  %v586_v50 = vsel %vm4596_vm6, %v432_v39, %v585_v27  ;;  %578 = vst [vmem:[#allocation2 + $0xc] sm:$0x1] %v577_v44  ;;  %v589_v51 = vsel %vm4528_vm3, %v433_v41, %v588_v45  ;;  %123 = vst [vmem:[#allocation2 + $0x34] sm:$0x1] %v122_v47  ;;  %v3733_v53 = vcombine.low %v671_v49, %v671_v49 }
  0x24   :  { %v3690_v52 = vld [vmem:[%s6468_s0 + $0x94] sm:$0xf]  ;;  %587 = vst [vmem:[#allocation2 + $0x18] sm:$0xf] %v586_v50  ;;  %590 = vst [vmem:[#allocation2 + $0x1c] sm:$0x1] %v589_v51  ;;  %v333_v58 = vmax.bf16 %v3674_v48, %v300_v42 }
  0x25   :  { %v443_v54 = vshrl.u32 %v398_v46, 16  ;;  %v446_v55 = vshll.u32 %v398_v46, 16  ;;  %v3706_v59 = vld [vmem:[%s6468_s0 + $0xd4] sm:$0xf]  ;;  %v62_v60 = vld [vmem:[#allocation2 + $0x38] sm:$0x1]  ;;  %1001 = vrot.lane.b32.xlu0 %v3733_v53, %s4477_s23 }
  0x26   :  { %v677_v61 = vld [vmem:[#allocation2 + $0x20] sm:$0xf]  ;;  %v597_v63 = vld [vmem:[#allocation2 + $0x28] sm:$0xf]  ;;  %v383_v0 = vmax.bf16 %v3706_v59, %v3690_v52  ;;  %v600_v4 = vld [vmem:[#allocation2 + $0x2c] sm:$0x1] }
  0x27   :  { %v445_v62 = vrot.slane %v443_v54, 7  ;;  %v4682_v2 = vcombine.low %v677_v61, %v677_v61  ;;  %v63_v5 = vsel %vm4528_vm3, 0, %v62_v60  ;;  %v124_v6 = vld [vmem:[#allocation2 + $0x3c] sm:$0x1]  ;;  %v790_v7 = vshrl.u32 %v4625_v10, 16  ;;  %s4483_s30 = smov 32  }
  0x28   :  { %v399_v11 = vmax.bf16 %v383_v0, %v333_v58  ;;  %64 = vst [vmem:[#allocation2 + $0x38] sm:$0x1] %v63_v5  ;;  %v4690_v12 = vrot.slane %v4675_v56, 1  ;;  %v794_v13 = vrot.slane %v792_v57, 1  ;;  %v806_v14 = vshll.u32 %v4675_v56, 16 }
  0x29   :  { %v448_v8 = vor.u32 %v446_v55, %v445_v62  ;;  %v449_v9 = vrot.slane %v445_v62, 4  ;;  %1007 = vrot.lane.b32.xlu1 %v4682_v2, %s4477_s23  ;;  %v125_v15 = vsel %vm4540_vm5, 0, %v124_v6  ;;  %v301_v10 = vld [vmem:[%s6468_s0 + $0x18] sm:$0xf]  ;;  %v678_v22 = vld [vmem:[#allocation2 + $0x24] sm:$0x1] }
  0x2a   :  { %v672_v16 = vld [vmem:[#allocation2 + $0xc] sm:$0x1]  ;;  %v451_v19 = vshrl.u32 %v399_v11, 16  ;;  %v454_v20 = vshll.u32 %v399_v11, 16  ;;  %126 = vst [vmem:[#allocation2 + $0x3c] sm:$0x1] %v125_v15  ;;  %v795_v39 = vor.u32 %v794_v13, %v790_v7  ;;  %v4734_v50 = vcombine.low %v677_v61, %v678_v22 }
  0x2b   :  { %v598_v17 = vsel %vm4596_vm6, %v448_v8, %v597_v63  ;;  %v601_v18 = vsel %vm4528_vm3, %v449_v9, %v600_v4  ;;  %v3675_v21 = vld [vmem:[%s6468_s0 + $0x58] sm:$0xf]  ;;  %v675_v23 = vld [vmem:[#allocation2 + $0x18] sm:$0xf]  ;;  %v4705_v24 = vcombine.low %v671_v49, %v672_v16  ;;  %v676_v25 = vld [vmem:[#allocation2 + $0x1c] sm:$0x1] }
  0x2c   :  { %599 = vst [vmem:[#allocation2 + $0x28] sm:$0xf] %v598_v17  ;;  %602 = vst [vmem:[#allocation2 + $0x2c] sm:$0x1] %v601_v18  ;;  %v3691_v26 = vld [vmem:[%s6468_s0 + $0x98] sm:$0xf]  ;;  %v4710_v27 = vcombine.low %v675_v23, %v675_v23  ;;  %v4712_v28 = vcombine.low %v675_v23, %v676_v25  ;;  %v334_v36 = vmax.bf16 %v3675_v21, %v301_v10 }
  0x2d   :  { %v804_v29 = vshrl.u32 %v4675_v56, 16  ;;  %v453_v30 = vrot.slane %v451_v19, 7  ;;  %v3707_v31 = vld [vmem:[%s6468_s0 + $0xd8] sm:$0xf]  ;;  %v65_v32 = vld [vmem:[#allocation2 + $0x40] sm:$0x1] }
  0x2e   :  { %v934_v33 = vrot.slane %v4705_v24, 1  ;;  %v799_v34 = vshll.u32 %v4705_v24, 16  ;;  %v603_v35 = vld [vmem:[#allocation2 + $0x30] sm:$0xf]  ;;  %v127_v37 = vld [vmem:[#allocation2 + $0x44] sm:$0x1]  ;;  %1005 = vrot.lane.b32.xlu0 %v4710_v27, %s4477_s23  ;;  %v384_v48 = vmax.bf16 %v3707_v31, %v3691_v26 }
  0x2f   :  { %v808_v40 = vrot.slane %v806_v14, 1  ;;  %v813_v41 = vshll.u32 %v4712_v28, 16  ;;  %v456_v42 = vor.u32 %v454_v20, %v453_v30  ;;  %v606_v44 = vld [vmem:[#allocation2 + $0x34] sm:$0x1]  ;;  %v4730_v46 = vrot.slane %v4712_v28, 1 }
  0x30   :  { %v302_v45 = vld [vmem:[%s6468_s0 + $0x1c] sm:$0xf]  ;;  %951 = vrot.lane.b32.xlu1 %v934_v33, %s4476_s18  ;;  %v457_v47 = vrot.slane %v453_v30, 4  ;;  %v66_v49 = vsel %vm4528_vm3, 0, %v65_v32  ;;  %v797_v51 = vshrl.u32 %v4705_v24, 16  ;;  %v128_v53 = vsel %vm4540_vm5, 0, %v127_v37 }
  0x31   :  { %v604_v52 = vsel %vm4596_vm6, %v456_v42, %v603_v35  ;;  %67 = vst [vmem:[#allocation2 + $0x40] sm:$0x1] %v66_v49  ;;  %v3676_v54 = vld [vmem:[%s6468_s0 + $0x5c] sm:$0xf]  ;;  %v801_v56 = vrot.slane %v799_v34, 1  ;;  %v400_v58 = vmax.bf16 %v384_v48, %v334_v36  ;;  %v811_v62 = vshrl.u32 %v4712_v28, 16 }
  0x32   :  { %v3692_v55 = vld [vmem:[%s6468_s0 + $0x9c] sm:$0xf]  ;;  %605 = vst [vmem:[#allocation2 + $0x30] sm:$0xf] %v604_v52  ;;  %v607_v57 = vsel %vm4528_vm3, %v457_v47, %v606_v44  ;;  %129 = vst [vmem:[#allocation2 + $0x44] sm:$0x1] %v128_v53  ;;  %v335_v59 = vmax.bf16 %v3676_v54, %v302_v45  ;;  %953 = vrot.lane.b32.xlu0 %v4690_v12, %s4476_s18  ;;  %v4759_v5 = vor.u32 %v808_v40, %v804_v29 }
  0x33   :  { %v3708_v60 = vld [vmem:[%s6468_s0 + $0xdc] sm:$0xf]  ;;  %v68_v61 = vld [vmem:[#allocation2 + $0x48] sm:$0x1]  ;;  %v815_v63 = vrot.slane %v813_v41, 1  ;;  %v459_v6 = vshrl.u32 %v400_v58, 16  ;;  %v802_v16 = vor.u32 %v801_v56, %v797_v51 }
  0x34   :  { %608 = vst [vmem:[#allocation2 + $0x34] sm:$0x1] %v607_v57  ;;  %v385_v0 = vmax.bf16 %v3708_v60, %v3692_v55  ;;  %v69_v4 = vsel %vm4528_vm3, 0, %v68_v61  ;;  %955 = vrot.lane.b32.xlu1 %v4730_v46, %s4476_s18  ;;  %v462_v7 = vshll.u32 %v400_v58, 16  ;;  %v130_v8 = vld [vmem:[#allocation2 + $0x4c] sm:$0x1] }
  0x35   :  { %70 = vst [vmem:[#allocation2 + $0x48] sm:$0x1] %v69_v4  ;;  %v71_v9 = vld [vmem:[#allocation2 + $0x50] sm:$0x1]  ;;  %v131_v13 = vsel %vm4540_vm5, 0, %v130_v8  ;;  %v820_v17 = vshll.u32 %v4734_v50, 16  ;;  %v4773_v28 = vor.u32 %v815_v63, %v811_v62 }
  0x36   :  { %v401_v11 = vmax.bf16 %v385_v0, %v335_v59  ;;  %v72_v14 = vsel %vm4528_vm3, 0, %v71_v9  ;;  %v133_v15 = vld [vmem:[#allocation2 + $0x54] sm:$0x1]  ;;  %v74_v10 = vld [vmem:[#allocation2 + $0x58] sm:$0x1]  ;;  %v461_v18 = vrot.slane %v459_v6, 7  ;;  %901 = vrot.lane.b32.xlu0 %v795_v39, %s4478_s22 }
  0x37   :  { %v609_v19 = vld [vmem:[#allocation2 + $0x38] sm:$0xf]  ;;  %132 = vst [vmem:[#allocation2 + $0x4c] sm:$0x1] %v131_v13  ;;  %73 = vst [vmem:[#allocation2 + $0x50] sm:$0x1] %v72_v14 }
  0x38   :  { %v136_v20 = vld [vmem:[#allocation2 + $0x5c] sm:$0x1]  ;;  %v467_v22 = vshrl.u32 %v401_v11, 16  ;;  %v470_v23 = vshll.u32 %v401_v11, 16  ;;  %v134_v25 = vsel %vm4540_vm5, 0, %v133_v15  ;;  %v75_v26 = vsel %vm4528_vm3, 0, %v74_v10  ;;  %905 = vrot.lane.b32.xlu1 %v4759_v5, %s4478_s22 }
  0x39   :  { %v612_v21 = vld [vmem:[#allocation2 + $0x3c] sm:$0x1]  ;;  %v464_v29 = vor.u32 %v462_v7, %v461_v18  ;;  %v465_v30 = vrot.slane %v461_v18, 4  ;;  %135 = vst [vmem:[#allocation2 + $0x54] sm:$0x1] %v134_v25  ;;  %v137_v31 = vsel %vm4540_vm5, 0, %v136_v20 }
  0x3a   :  { %76 = vst [vmem:[#allocation2 + $0x58] sm:$0x1] %v75_v26  ;;  %v303_v32 = vld [vmem:[%s6468_s0 + $0x20] sm:$0xf]  ;;  %v469_v34 = vrot.slane %v467_v22, 7  ;;  %903 = vrot.lane.b32.xlu0 %v802_v16, %s4478_s22  ;;  %v818_v48 = vshrl.u32 %v4734_v50, 16 }
  0x3b   :  { %138 = vst [vmem:[#allocation2 + $0x5c] sm:$0x1] %v137_v31  ;;  %v610_v35 = vsel %vm4596_vm6, %v464_v29, %v609_v19  ;;  %v613_v36 = vsel %vm4528_vm3, %v465_v30, %v612_v21  ;;  %v615_v37 = vld [vmem:[#allocation2 + $0x40] sm:$0xf]  ;;  %v3677_v39 = vld [vmem:[%s6468_s0 + $0x60] sm:$0xf] }
  0x3c   :  { %v3693_v40 = vld [vmem:[%s6468_s0 + $0xa0] sm:$0xf]  ;;  %611 = vst [vmem:[#allocation2 + $0x38] sm:$0xf] %v610_v35  ;;  %614 = vst [vmem:[#allocation2 + $0x3c] sm:$0x1] %v613_v36  ;;  %v472_v41 = vor.u32 %v470_v23, %v469_v34  ;;  %v336_v45 = vmax.bf16 %v3677_v39, %v303_v32  ;;  %907 = vrot.lane.b32.xlu1 %v4773_v28, %s4478_s22 }
  0x3d   :  { %v473_v42 = vrot.slane %v469_v34, 4  ;;  %v618_v44 = vld [vmem:[#allocation2 + $0x44] sm:$0x1]  ;;  %v3709_v47 = vld [vmem:[%s6468_s0 + $0xe0] sm:$0xf]  ;;  %v822_v49 = vrot.slane %v820_v17, 1 }
  0x3e   :  { %v386_v51 = vmax.bf16 %v3709_v47, %v3693_v40  ;;  %v77_v52 = vld [vmem:[#allocation2 + $0x60] sm:$0x1]  ;;  %v139_v53 = vld [vmem:[#allocation2 + $0x64] sm:$0x1]  ;;  %v616_v54 = vsel %vm4596_vm6, %v472_v41, %v615_v37  ;;  %v304_v55 = vld [vmem:[%s6468_s0 + $0x24] sm:$0xf]  ;;  %1053 = vrot.lane.b32.xlu0 %v802_v16, %s4479_s13 }
  0x3f   :  { %617 = vst [vmem:[#allocation2 + $0x40] sm:$0xf] %v616_v54  ;;  %v619_v56 = vsel %vm4528_vm3, %v473_v42, %v618_v44  ;;  %v78_v58 = vsel %vm4528_vm3, 0, %v77_v52  ;;  %v3678_v59 = vld [vmem:[%s6468_s0 + $0x64] sm:$0xf]  ;;  %v140_v60 = vsel %vm4540_vm5, 0, %v139_v53  ;;  %v4814_v61 = vor.u32 %v822_v49, %v818_v48 }
  0x40   :  { %v402_v57 = vmax.bf16 %v386_v51, %v336_v45  ;;  %620 = vst [vmem:[#allocation2 + $0x44] sm:$0x1] %v619_v56  ;;  %79 = vst [vmem:[#allocation2 + $0x60] sm:$0x1] %v78_v58  ;;  %1055 = vrot.lane.b32.xlu1 %v4759_v5, %s4479_s13  ;;  %v337_v62 = vmax.bf16 %v3678_v59, %v304_v55  ;;  %v3694_v0 = vld [vmem:[%s6468_s0 + $0xa4] sm:$0xf] }
  0x41   :  { %141 = vst [vmem:[#allocation2 + $0x64] sm:$0x1] %v140_v60  ;;  %v3710_v4 = vld [vmem:[%s6468_s0 + $0xe4] sm:$0xf]  ;;  %v80_v9 = vld [vmem:[#allocation2 + $0x68] sm:$0x1] }
  0x42   :  { %v475_v63 = vshrl.u32 %v402_v57, 16  ;;  %v478_v6 = vshll.u32 %v402_v57, 16  ;;  %v387_v7 = vmax.bf16 %v3710_v4, %v3694_v0  ;;  %1057 = vrot.lane.b32.xlu0 %v4773_v28, %s4479_s13  ;;  %v142_v11 = vld [vmem:[#allocation2 + $0x6c] sm:$0x1]  ;;  %v621_v13 = vld [vmem:[#allocation2 + $0x58] sm:$0xf] }
  0x43   :  { %v81_v15 = vsel %vm4528_vm3, 0, %v80_v9  ;;  %v143_v10 = vsel %vm4540_vm5, 0, %v142_v11  ;;  %v624_v16 = vld [vmem:[#allocation2 + $0x5c] sm:$0x1]  ;;  %v305_v17 = vld [vmem:[%s6468_s0 + $0x28] sm:$0xf] }
  0x44   :  { %v477_v8 = vrot.slane %v475_v63, 7  ;;  %1059 = vrot.lane.b32.xlu1 %v4814_v61, %s4479_s13  ;;  %v403_v14 = vmax.bf16 %v387_v7, %v337_v62  ;;  %82 = vst [vmem:[#allocation2 + $0x68] sm:$0x1] %v81_v15  ;;  %144 = vst [vmem:[#allocation2 + $0x6c] sm:$0x1] %v143_v10  ;;  %v4840_v22 = vrot.slane %v4734_v50, 1 }
  0x45   :  { %v3679_v18 = vld [vmem:[%s6468_s0 + $0x68] sm:$0xf]  ;;  %v4842_v23 = vld [vmem:[#allocation2 + $0x28] sm:$0xf]  ;;  %v680_v25 = vld [vmem:[#allocation2 + $0x2c] sm:$0x1] }
  0x46   :  { %v480_v19 = vor.u32 %v478_v6, %v477_v8  ;;  %v481_v20 = vrot.slane %v477_v8, 4  ;;  %v483_v21 = vshrl.u32 %v403_v14, 16  ;;  %1087 = vrot.lane.b32.xlu0 %v934_v33, %s4480_s25  ;;  %v486_v26 = vshll.u32 %v403_v14, 16  ;;  %v3695_v29 = vld [vmem:[%s6468_s0 + $0xa8] sm:$0xf]  ;;  %v4345_v59 = vld [vmem:[%s6469_s1] sm:$0xff]  }
  0x47   :  { %v338_v50 = vmax.bf16 %v3679_v18, %v305_v17  ;;  %v3711_v31 = vld [vmem:[%s6468_s0 + $0xe8] sm:$0xf]  ;;  %v83_v32 = vld [vmem:[#allocation2 + $0x70] sm:$0x1]  ;;  %v145_v36 = vld [vmem:[#allocation2 + $0x74] sm:$0x1]  ;;  %v4857_v37 = vcombine.low %v4842_v23, %v680_v25  ;;  %v4893_v0 = vcombine.low %v4842_v23, %v4842_v23  ;;  %4239 = vmatprep.subr.bf16.mxu0 %v4345_v59 }
  0x48   :  { %1089 = vrot.lane.b32.xlu1 %v4690_v12, %s4480_s25  ;;  %v622_v30 = vsel %vm4596_vm6, %v480_v19, %v621_v13  ;;  %v625_v24 = vsel %vm4528_vm3, %v481_v20, %v624_v16  ;;  %v485_v33 = vrot.slane %v483_v21, 7  ;;  %v627_v34 = vld [vmem:[#allocation2 + $0x60] sm:$0xf]  ;;  %v630_v35 = vld [vmem:[#allocation2 + $0x64] sm:$0x1]  ;;  %v388_v41 = vmax.bf16 %v3711_v31, %v3695_v29  ;;  %4240 = vmatpush3.bf16.msra.mxu0 %v4345_v59 }
  0x49   :  { %623 = vst [vmem:[#allocation2 + $0x58] sm:$0xf] %v622_v30  ;;  %626 = vst [vmem:[#allocation2 + $0x5c] sm:$0x1] %v625_v24  ;;  %v306_v42 = vld [vmem:[%s6468_s0 + $0x2c] sm:$0xf] }
  0x4a   :  { %v488_v39 = vor.u32 %v486_v26, %v485_v33  ;;  %v489_v40 = vrot.slane %v485_v33, 4  ;;  %v3680_v44 = vld [vmem:[%s6468_s0 + $0x6c] sm:$0xf]  ;;  %1091 = vrot.lane.b32.xlu0 %v4730_v46, %s4480_s25  ;;  %v84_v45 = vsel %vm4528_vm3, 0, %v83_v32  ;;  %v146_v47 = vsel %vm4540_vm5, 0, %v145_v36 }
  0x4b   :  { %v339_v48 = vmax.bf16 %v3680_v44, %v306_v42  ;;  %v3696_v49 = vld [vmem:[%s6468_s0 + $0xac] sm:$0xf]  ;;  %v404_v53 = vmax.bf16 %v388_v41, %v338_v50  ;;  %85 = vst [vmem:[#allocation2 + $0x70] sm:$0x1] %v84_v45  ;;  %147 = vst [vmem:[#allocation2 + $0x74] sm:$0x1] %v146_v47 }
  0x4c   :  { %1093 = vrot.lane.b32.xlu1 %v4840_v22, %s4480_s25  ;;  %v628_v51 = vsel %vm4596_vm6, %v488_v39, %v627_v34  ;;  %v631_v52 = vsel %vm4528_vm3, %v489_v40, %v630_v35  ;;  %v3712_v54 = vld [vmem:[%s6468_s0 + $0xec] sm:$0xf]  ;;  %v827_v56 = vshll.u32 %v4857_v37, 16  ;;  %v86_v62 = vld [vmem:[#allocation2 + $0x78] sm:$0x1]  ;;  %v825_v16 = vshrl.u32 %v4857_v37, 16 }
  0x4d   :  { %629 = vst [vmem:[#allocation2 + $0x60] sm:$0xf] %v628_v51  ;;  %632 = vst [vmem:[#allocation2 + $0x64] sm:$0x1] %v631_v52  ;;  %v389_v55 = vmax.bf16 %v3712_v54, %v3696_v49  ;;  %v491_v57 = vshrl.u32 %v404_v53, 16  ;;  %v494_v58 = vshll.u32 %v404_v53, 16 }
  0x4e   :  { %1125 = vrot.lane.b32.xlu0 %v4654_v38, %s4481_s19  ;;  %v148_v63 = vld [vmem:[#allocation2 + $0x7c] sm:$0x1]  ;;  %v633_v6 = vld [vmem:[#allocation2 + $0x68] sm:$0xf]  ;;  %v636_v7 = vld [vmem:[#allocation2 + $0x6c] sm:$0x1] }
  0x4f   :  { %v405_v60 = vmax.bf16 %v389_v55, %v339_v48  ;;  %v493_v4 = vrot.slane %v491_v57, 7  ;;  %v4346_v38 = vld [vmem:[%s6469_s1 + $0x8] sm:$0xff]   ;;  %v307_v11 = vld [vmem:[%s6468_s0 + $0x30] sm:$0xf]  ;;  %v87_v14 = vsel %vm4528_vm3, 0, %v86_v62  ;;  %v149_v15 = vsel %vm4540_vm5, 0, %v148_v63 }
  0x50   :  { %1127 = vrot.lane.b32.xlu1 %v4710_v27, %s4481_s19  ;;  %v3681_v10 = vld [vmem:[%s6468_s0 + $0x70] sm:$0xf]  ;;  %v829_v17 = vrot.slane %v827_v56, 1  ;;  %4241 = vmatprep.subr.bf16.mxu0 %v4346_v38  ;;  %88 = vst [vmem:[#allocation2 + $0x78] sm:$0x1] %v87_v14  ;;  %vm1608_vm7 = vcmask 1041408  }
  0x51   :  { %v499_v8 = vshrl.u32 %v405_v60, 16  ;;  %v502_v9 = vshll.u32 %v405_v60, 16  ;;  %v496_v27 = vor.u32 %v494_v58, %v493_v4  ;;  %v497_v13 = vrot.slane %v493_v4, 4  ;;  %150 = vst [vmem:[#allocation2 + $0x7c] sm:$0x1] %v149_v15  ;;  %4242 = vmatpush3.bf16.msra.mxu0 %v4346_v38 }
  0x52   :  { %1129 = vrot.lane.b32.xlu0 %v4682_v2, %s4481_s19  ;;  %v4913_v19 = vld [vmem:[#allocation2 + $0x30] sm:$0xf]  ;;  %v682_v20 = vld [vmem:[#allocation2 + $0x34] sm:$0x1]  ;;  %v340_v26 = vmax.bf16 %v3681_v10, %v307_v11  ;;  %v3697_v24 = vld [vmem:[%s6468_s0 + $0xb0] sm:$0xf]  ;;  %v4930_v34 = vor.u32 %v829_v17, %v825_v16 }
  0x53   :  { %v501_v18 = vrot.slane %v499_v8, 7  ;;  %v634_v21 = vsel %vm4596_vm6, %v496_v27, %v633_v6  ;;  %v637_v25 = vsel %vm4528_vm3, %v497_v13, %v636_v7  ;;  %v639_v2 = vld [vmem:[#allocation2 + $0x70] sm:$0xf]  ;;  %v642_v30 = vld [vmem:[#allocation2 + $0x74] sm:$0x1]  ;;  %v4933_v35 = vcombine.low %v4913_v19, %v682_v20 }
  0x54   :  { %1131 = vrot.lane.b32.xlu1 %v4893_v0, %s4481_s19  ;;  %635 = vst [vmem:[#allocation2 + $0x68] sm:$0xf] %v634_v21  ;;  %638 = vst [vmem:[#allocation2 + $0x6c] sm:$0x1] %v637_v25  ;;  %v3713_v33 = vld [vmem:[%s6468_s0 + $0xf0] sm:$0xf] }
  0x55   :  { %v504_v29 = vor.u32 %v502_v9, %v501_v18  ;;  %v505_v50 = vrot.slane %v501_v18, 4  ;;  %v390_v31 = vmax.bf16 %v3713_v33, %v3697_v24  ;;  %v4349_v32 = vld [vmem:[%s6469_s1 + $0x10] ss:$0 sps:$4 sm:$0x33]   ;;  %v4935_v36 = vld [vmem:[#allocation2 + $0x38] sm:$0xf] }
  0x56   :  { %1177 = vrot.lane.b32.xlu0 %v4759_v5, %s4482_s12  ;;  %v684_v39 = vld [vmem:[#allocation2 + $0x3c] sm:$0x1]  ;;  %v89_v40 = vld [vmem:[#allocation2 + $0x80] sm:$0x1]  ;;  %v151_v5 = vld [vmem:[#allocation2 + $0x84] sm:$0x1]  ;;  %4309 = vmatprep.subr.msk.bf16.mxu0 %vm1608_vm7, %v4349_v32 }
  0x57   :  { %v640_v41 = vsel %vm4596_vm6, %v504_v29, %v639_v2  ;;  %v643_v42 = vsel %vm4528_vm3, %v505_v50, %v642_v30  ;;  %v406_v44 = vmax.bf16 %v390_v31, %v340_v26  ;;  %v308_v45 = vld [vmem:[%s6468_s0 + $0x34] sm:$0xf]  ;;  %v1610_v47 = vsel %vm1608_vm7, %v4349_v32, 0  ;;  %v645_v60 = vld [vmem:[#allocation2 + $0x78] sm:$0xf] }
  0x58   :  { %1179 = vrot.lane.b32.xlu1 %v4773_v28, %s4482_s12  ;;  %641 = vst [vmem:[#allocation2 + $0x70] sm:$0xf] %v640_v41  ;;  %644 = vst [vmem:[#allocation2 + $0x74] sm:$0x1] %v643_v42  ;;  %v90_v28 = vsel %vm4528_vm3, 0, %v89_v40  ;;  %4244 = vmatpush3.bf16.msra.mxu0 %v1610_v47  ;;  %v4954_v53 = vcombine.low %v4935_v36, %v684_v39  ;;  %v152_v54 = vsel %vm4540_vm5, 0, %v151_v5 }
  0x59   :  { %v3682_v48 = vld [vmem:[%s6468_s0 + $0x74] sm:$0xf]  ;;  %v507_v49 = vshrl.u32 %v406_v44, 16  ;;  %v510_v51 = vshll.u32 %v406_v44, 16  ;;  %91 = vst [vmem:[#allocation2 + $0x80] sm:$0x1] %v90_v28 }
  0x5a   :  { %v341_v52 = vmax.bf16 %v3682_v48, %v308_v45  ;;  %1181 = vrot.lane.b32.xlu0 %v4814_v61, %s4482_s12  ;;  %v3698_v55 = vld [vmem:[%s6468_s0 + $0xb4] sm:$0xf]  ;;  %v4967_v57 = vrot.slane %v4857_v37, 1  ;;  %v834_v58 = vshll.u32 %v4933_v35, 16  ;;  %153 = vst [vmem:[#allocation2 + $0x84] sm:$0x1] %v152_v54 }
  0x5b   :  { %v3714_v56 = vld [vmem:[%s6468_s0 + $0xf4] sm:$0xf]  ;;  %v509_v59 = vrot.slane %v507_v49, 7  ;;  %v648_v63 = vld [vmem:[#allocation2 + $0x7c] sm:$0x1]  ;;  %v841_v27 = vshll.u32 %v4954_v53, 16 }
  0x5c   :  { %1183 = vrot.lane.b32.xlu1 %v4930_v34, %s4482_s12  ;;  %v391_v62 = vmax.bf16 %v3714_v56, %v3698_v55  ;;  %v92_v4 = vld [vmem:[#allocation2 + $0x88] sm:$0x1]  ;;  %v154_v6 = vld [vmem:[#allocation2 + $0x8c] sm:$0x1]  ;;  %v309_v37 = vld [vmem:[%s6468_s0 + $0x38] sm:$0xf] }
  0x5d   :  { %v512_v7 = vor.u32 %v510_v51, %v509_v59  ;;  %v513_v8 = vrot.slane %v509_v59, 4  ;;  %v93_v38 = vsel %vm4528_vm3, 0, %v92_v4  ;;  %v3683_v11 = vld [vmem:[%s6468_s0 + $0x78] sm:$0xf]  ;;  %v155_v13 = vsel %vm4540_vm5, 0, %v154_v6 }
  0x5e   :  { %v407_v9 = vmax.bf16 %v391_v62, %v341_v52  ;;  %1211 = vrot.lane.b32.xlu0 %v4690_v12, %s4483_s30  ;;  %94 = vst [vmem:[#allocation2 + $0x88] sm:$0x1] %v93_v38  ;;  %v3699_v14 = vld [vmem:[%s6468_s0 + $0xb8] sm:$0xf]  ;;  %156 = vst [vmem:[#allocation2 + $0x8c] sm:$0x1] %v155_v13  ;;  %v342_v18 = vmax.bf16 %v3683_v11, %v309_v37 }
  0x5f   :  { %v3715_v15 = vld [vmem:[%s6468_s0 + $0xf8] sm:$0xf]  ;;  %v646_v12 = vsel %vm4596_vm6, %v512_v7, %v645_v60  ;;  %v649_v10 = vsel %vm4528_vm3, %v513_v8, %v648_v63  ;;  %v832_v20 = vshrl.u32 %v4933_v35, 16  ;;  %v839_v2 = vshrl.u32 %v4954_v53, 16  ;;  %v310_v41 = vld [vmem:[%s6468_s0 + $0x3c] sm:$0xf] }
  0x60   :  { %1213 = vrot.lane.b32.xlu1 %v4730_v46, %s4483_s30  ;;  %v515_v16 = vshrl.u32 %v407_v9, 16  ;;  %v518_v17 = vshll.u32 %v407_v9, 16  ;;  %647 = vst [vmem:[#allocation2 + $0x78] sm:$0xf] %v646_v12  ;;  %650 = vst [vmem:[#allocation2 + $0x7c] sm:$0x1] %v649_v10  ;;  %v392_v25 = vmax.bf16 %v3715_v15, %v3699_v14  ;;  %v3739_v12 = vcombine.low %v4935_v36, %v4935_v36 }
  0x61   :  { %v836_v46 = vrot.slane %v834_v58, 1  ;;  %v651_v26 = vld [vmem:[#allocation2 + $0x80] sm:$0xf]  ;;  %v654_v29 = vld [vmem:[#allocation2 + $0x84] sm:$0x1]  ;;  %v843_v30 = vrot.slane %v841_v27, 1 }
  0x62   :  { %v517_v21 = vrot.slane %v515_v16, 7  ;;  %1215 = vrot.lane.b32.xlu0 %v4840_v22, %s4483_s30  ;;  %v408_v50 = vmax.bf16 %v392_v25, %v342_v18  ;;  %v95_v44 = vld [vmem:[#allocation2 + $0x90] sm:$0x1]  ;;  %v3684_v5 = vld [vmem:[%s6468_s0 + $0x7c] sm:$0xf]  ;;  %v5040_v7 = vrot.slane %v4933_v35, 1 }
  0x63   :  { %v5010_v42 = vor.u32 %v836_v46, %v832_v20  ;;  %v5017_v45 = vor.u32 %v843_v30, %v839_v2  ;;  %v343_v49 = vmax.bf16 %v3684_v5, %v310_v41  ;;  %v157_v51 = vld [vmem:[#allocation2 + $0x94] sm:$0x1]  ;;  %v5045_v8 = vrot.slane %v4954_v53, 1  ;;  %v686_v38 = vld [vmem:[#allocation2 + $0x44] sm:$0x1] }
  0x64   :  { %1217 = vrot.lane.b32.xlu1 %v4967_v57, %s4483_s30  ;;  %v520_v24 = vor.u32 %v518_v17, %v517_v21  ;;  %v521_v33 = vrot.slane %v517_v21, 4  ;;  %v523_v39 = vshrl.u32 %v408_v50, 16  ;;  %v526_v40 = vshll.u32 %v408_v50, 16  ;;  %v3700_v52 = vld [vmem:[%s6468_s0 + $0xbc] sm:$0xf] }
  0x65   :  { %v657_v28 = vld [vmem:[#allocation2 + $0x88] sm:$0xf]  ;;  %v660_v48 = vld [vmem:[#allocation2 + $0x8c] sm:$0x1]  ;;  %v3716_v54 = vld [vmem:[%s6468_s0 + $0xfc] sm:$0xf] }
  0x66   :  { %v652_v31 = vsel %vm4596_vm6, %v520_v24, %v651_v26  ;;  %v655_v32 = vsel %vm4528_vm3, %v521_v33, %v654_v29  ;;  %909 = vrot.lane.b32.xlu0 %v4814_v61, %s4478_s22  ;;  %v525_v47 = vrot.slane %v523_v39, 7  ;;  %v96_v61 = vsel %vm4528_vm3, 0, %v95_v44  ;;  %v685_v14 = vld [vmem:[#allocation2 + $0x40] sm:$0xf]  ;;  %v98_v20 = vld [vmem:[#allocation2 + $0x98] sm:$0x1] }
  0x67   :  { %653 = vst [vmem:[#allocation2 + $0x80] sm:$0xf] %v652_v31  ;;  %656 = vst [vmem:[#allocation2 + $0x84] sm:$0x1] %v655_v32  ;;  %v158_v58 = vsel %vm4540_vm5, 0, %v157_v51  ;;  %v393_v59 = vmax.bf16 %v3716_v54, %v3700_v52  ;;  %v5053_v35 = vcombine.low %v685_v14, %v686_v38  ;;  %v3740_v10 = vcombine.low %v685_v14, %v685_v14 }
  0x68   :  { %911 = vrot.lane.b32.xlu1 %v4930_v34, %s4478_s22  ;;  %97 = vst [vmem:[#allocation2 + $0x90] sm:$0x1] %v96_v61  ;;  %v528_v55 = vor.u32 %v526_v40, %v525_v47  ;;  %v529_v56 = vrot.slane %v525_v47, 4  ;;  %159 = vst [vmem:[#allocation2 + $0x94] sm:$0x1] %v158_v58  ;;  %vm1243_vm8 = vcmask 31744  }
  0x69   :  { %v409_v63 = vmax.bf16 %v393_v59, %v343_v49  ;;  %v1042_v16 = vshll.u32 %v5053_v35, 16  ;;  %v1040_v43 = vshrl.u32 %v5053_v35, 16  ;;  %v1085_v18 = vrot.slane %v5053_v35, 1  ;;  %v688_v21 = vld [vmem:[#allocation2 + $0x4c] sm:$0x1] }
  0x6a   :  { %913 = vrot.lane.b32.xlu0 %v5010_v42, %s4478_s22  ;;  %v658_v60 = vsel %vm4596_vm6, %v528_v55, %v657_v28  ;;  %v661_v62 = vsel %vm4528_vm3, %v529_v56, %v660_v48  ;;  %v160_v25 = vld [vmem:[#allocation2 + $0x9c] sm:$0x1]  ;;  %v687_v46 = vld [vmem:[#allocation2 + $0x48] sm:$0xf]  ;;  %v689_v24 = vld [vmem:[#allocation2 + $0x50] sm:$0xf] }
  0x6b   :  { %659 = vst [vmem:[#allocation2 + $0x88] sm:$0xf] %v658_v60  ;;  %662 = vst [vmem:[#allocation2 + $0x8c] sm:$0x1] %v661_v62  ;;  %v531_v4 = vshrl.u32 %v409_v63, 16  ;;  %v534_v6 = vshll.u32 %v409_v63, 16  ;;  %v3751_v26 = vcombine.low %v687_v46, %v687_v46 }
  0x6c   :  { %915 = vrot.lane.b32.xlu1 %v5017_v45, %s4478_s22  ;;  %v1044_v17 = vrot.slane %v1042_v16, 1  ;;  %v161_v2 = vsel %vm4540_vm5, 0, %v160_v25  ;;  %v690_v33 = vld [vmem:[#allocation2 + $0x54] sm:$0x1]  ;;  %v5093_v50 = vld [vmem:[#allocation2 + $0x58] sm:$0xf] }
  0x6d   :  { %v533_v9 = vrot.slane %v531_v4, 7  ;;  %162 = vst [vmem:[#allocation2 + $0x9c] sm:$0x1] %v161_v2  ;;  %v692_v31 = vld [vmem:[#allocation2 + $0x5c] sm:$0x1]  ;;  %v3725_v39 = vcombine.low %v689_v24, %v690_v33  ;;  %vm1292_vm9 = vcmask 64512  }
  0x6e   :  { %957 = vrot.lane.b32.xlu0 %v4840_v22, %s4476_s18  ;;  %v3738_v22 = vcombine.low %v4913_v19, %v4913_v19  ;;  %v5102_v41 = vcombine.low %v5093_v50, %v692_v31  ;;  %v693_v44 = vld [vmem:[#allocation2 + $0x60] sm:$0xf]  ;;  %v694_v5 = vld [vmem:[#allocation2 + $0x64] sm:$0x1]  ;;  %v695_v47 = vld [vmem:[#allocation2 + $0x68] sm:$0xf] }
  0x6f   :  { %v663_v37 = vld [vmem:[#allocation2 + $0x90] sm:$0xf]  ;;  %v536_v11 = vor.u32 %v534_v6, %v533_v9  ;;  %v537_v27 = vrot.slane %v533_v9, 4  ;;  %v666_v13 = vld [vmem:[#allocation2 + $0x94] sm:$0x1]  ;;  %v848_v61 = vshll.u32 %v3725_v39, 16  ;;  %v3727_v49 = vcombine.low %v693_v44, %v694_v5 }
  0x70   :  { %959 = vrot.lane.b32.xlu1 %v4967_v57, %s4476_s18  ;;  %v696_v28 = vld [vmem:[#allocation2 + $0x6c] sm:$0x1]  ;;  %v846_v52 = vshrl.u32 %v3725_v39, 16  ;;  %v853_v58 = vshrl.u32 %v5102_v41, 16  ;;  %v941_v35 = vrot.slane %v3725_v39, 1  ;;  %v3743_v2 = vcombine.low %v695_v47, %v695_v47 }
  0x71   :  { %v664_v53 = vsel %vm4596_vm6, %v536_v11, %v663_v37  ;;  %v667_v15 = vsel %vm4528_vm3, %v537_v27, %v666_v13  ;;  %v3728_v51 = vcombine.low %v695_v47, %v696_v28  ;;  %v850_v54 = vrot.slane %v848_v61, 1  ;;  %v4462_v5 = vld [vmem:[#allocation2] sm:$0xf]  ;;  %v4463_v28 = vld [vmem:[#allocation2 + $0x8] sm:$0xf] }
  0x72   :  { %961 = vrot.lane.b32.xlu0 %v5040_v7, %s4476_s18  ;;  %665 = vst [vmem:[#allocation2 + $0x90] sm:$0xf] %v664_v53  ;;  %668 = vst [vmem:[#allocation2 + $0x94] sm:$0x1] %v667_v15  ;;  %v862_v55 = vshll.u32 %v3727_v49, 16  ;;  %v860_v6 = vshrl.u32 %v3727_v49, 16 }
  0x73   :  { %v869_v60 = vshll.u32 %v3728_v51, 16  ;;  %v851_v4 = vor.u32 %v850_v54, %v846_v52  ;;  %v867_v38 = vshrl.u32 %v3728_v51, 16  ;;  %v942_v53 = vrot.slane %v5102_v41, 1 }
  0x74   :  { %963 = vrot.lane.b32.xlu1 %v5045_v8, %s4476_s18  ;;  %v5141_v16 = vrot.slane %v3728_v51, 1  ;;  %v700_v51 = vld [vmem:[#allocation2 + $0x7c] sm:$0x1]  ;;  %vm1325_vm10 = vcmask 97280   ;;  %vm1358_vm11 = vcmask 130048   ;;  %vm1391_vm12 = vcmask 162816  }
  0x75   :  { %v871_v37 = vrot.slane %v869_v60, 1  ;;  %v4465_v60 = vld [vmem:[#allocation2 + $0x18] sm:$0xf]  ;;  %vm1424_vm13 = vcmask 195584   ;;  %vm1457_vm14 = vcmask 228352   ;;  %vm1490_vm15 = vcmask 261120  }
  0x76   :  { %1009 = vrot.lane.b32.xlu0 %v4893_v0, %s4477_s23  ;;  %v1045_v0 = vor.u32 %v1044_v17, %v1040_v43  ;;  %v698_v17 = vld [vmem:[#allocation2 + $0x74] sm:$0x1]  ;;  %vm1583_vm0 = vcmask 293888   ;;  %vm172_vm1 = vcmask 1040384  }
  0x77   :  { %v5130_v13 = vor.u32 %v871_v37, %v867_v38  ;;  %vm5420_vm5 = vmand %vm172_vm1, %vm39_vm2  ;;  %vm1980_vm2 = vcmask 1043456  }
  0x78   :  { %1011 = vrot.lane.b32.xlu1 %v3738_v22, %s4477_s23  ;;  %vm5744_vm6 = vmand %vm1980_vm2, %vm101_vm4 }
  0x7a   :  { %1013 = vrot.lane.b32.xlu0 %v3739_v12, %s4477_s23 }
  0x7c   :  { %1015 = vrot.lane.b32.xlu1 %v3740_v10, %s4477_s23 }
  0x7e   :  { %1061 = vrot.lane.b32.xlu0 %v4930_v34, %s4479_s13  ;;  %v99_v34 = vsel %vm4528_vm3, 0, %v98_v20  ;;  %v697_v20 = vld [vmem:[#allocation2 + $0x70] sm:$0xf]  ;;  %vm5409_vm3 = vmand %vm172_vm1, %vm101_vm4 }
  0x7f   :  { %100 = vst [vmem:[#allocation2 + $0x98] sm:$0x1] %v99_v34  ;;  %v3729_v34 = vcombine.low %v697_v20, %v698_v17 }
  0x80   :  { %1063 = vrot.lane.b32.xlu1 %v5010_v42, %s4479_s13 }
  0x82   :  { %1065 = vrot.lane.b32.xlu0 %v5017_v45, %s4479_s13 }
  0x84   :  { %1067 = vrot.lane.b32.xlu1 %v1045_v0, %s4479_s13 }
  0x86   :  { %1095 = vrot.lane.b32.xlu0 %v4967_v57, %s4480_s25  ;;  %v3753_v57 = vcombine.low %v687_v46, %v688_v21  ;;  %v5153_v21 = vcombine.low %v693_v44, %v693_v44 }
  0x88   :  { %1097 = vrot.lane.b32.xlu1 %v5040_v7, %s4480_s25  ;;  %v1166_v1 = vshll.u32 %v3753_v57, 16  ;;  %v1164_v29 = vshrl.u32 %v3753_v57, 16  ;;  %v1209_v56 = vrot.slane %v3753_v57, 1  ;;  %v5162_v57 = vcombine.low %v697_v20, %v697_v20 }
  0x8a   :  { %1099 = vrot.lane.b32.xlu0 %v5045_v8, %s4480_s25  ;;  %v1168_v30 = vrot.slane %v1166_v1, 1 }
  0x8c   :  { %1101 = vrot.lane.b32.xlu1 %v1085_v18, %s4480_s25  ;;  %v1169_v40 = vor.u32 %v1168_v30, %v1164_v29  ;;  %v874_v30 = vshrl.u32 %v3729_v34, 16 }
  0x8e   :  { %1133 = vrot.lane.b32.xlu0 %v3738_v22, %s4481_s19 }
  0x8f   :  { %v5091_v3 = vpop.permute.xlu0 %949 }
  0x90   :  { %1135 = vrot.lane.b32.xlu1 %v3739_v12, %s4481_s19 }
  0x92   :  { %1137 = vrot.lane.b32.xlu0 %v3740_v10, %s4481_s19  ;;  %v5138_v10 = vrot.slane %v3727_v49, 1  ;;  %v5187_v49 = vrot.slane %v3729_v34, 1 }
  0x94   :  { %1139 = vrot.lane.b32.xlu1 %v3751_v26, %s4481_s19  ;;  %v876_v26 = vshll.u32 %v3729_v34, 16 }
  0x95   :  { %v5095_v32 = vpop.permute.xlu1 %1003 }
  0x96   :  { %1185 = vrot.lane.b32.xlu0 %v5010_v42, %s4482_s12  ;;  %v878_v24 = vrot.slane %v876_v26, 1 }
  0x97   :  { %v5105_v48 = vpop.permute.xlu0 %1001 }
  0x98   :  { %1187 = vrot.lane.b32.xlu1 %v5017_v45, %s4482_s12  ;;  %v855_v45 = vshll.u32 %v5102_v41, 16  ;;  %v5174_v31 = vor.u32 %v878_v24, %v874_v30 }
  0x9a   :  { %1189 = vrot.lane.b32.xlu0 %v1045_v0, %s4482_s12  ;;  %v857_v59 = vrot.slane %v855_v45, 1 }
  0x9b   :  { %v5108_v42 = vpop.permute.xlu1 %1007 }
  0x9c   :  { %1191 = vrot.lane.b32.xlu1 %v1169_v40, %s4482_s12  ;;  %v858_v9 = vor.u32 %v857_v59, %v853_v58  ;;  %v699_v59 = vld [vmem:[#allocation2 + $0x78] sm:$0xf] }
  0x9e   :  { %1219 = vrot.lane.b32.xlu0 %v5040_v7, %s4483_s30  ;;  %v864_v7 = vrot.slane %v862_v55, 1  ;;  %v4464_v55 = vld [vmem:[#allocation2 + $0x10] sm:$0xf] }
  0xa0   :  { %1221 = vrot.lane.b32.xlu1 %v5045_v8, %s4483_s30  ;;  %v5116_v62 = vpop.permute.xlu0 %1005  ;;  %v5127_v27 = vor.u32 %v864_v7, %v860_v6 }
  0xa2   :  { %v5118_v63 = vpop.permute.xlu1 %951  ;;  %1223 = vrot.lane.b32.xlu0 %v1085_v18, %s4483_s30  ;;  %v3741_v18 = vcombine.low %v5093_v50, %v5093_v50 }
  0xa4   :  { %1225 = vrot.lane.b32.xlu1 %v1209_v56, %s4483_s30  ;;  %v5122_v8 = vpop.permute.xlu0 %953 }
  0xa6   :  { %v5124_v11 = vpop.permute.xlu1 %955  ;;  %917 = vrot.lane.b32.xlu0 %v851_v4, %s4478_s22 }
  0xa8   :  { %919 = vrot.lane.b32.xlu1 %v858_v9, %s4478_s22  ;;  %v902_v14 = vpop.permute.xlu0 %901 }
  0xa9   :  { %v1246_v47 = vsel %vm1243_vm8, %v4462_v5, %v902_v14  ;;  %v702_v5 = vld [vmem:[#allocation2 + $0x84] sm:$0x1] }
  0xaa   :  { %v906_v22 = vpop.permute.xlu1 %905  ;;  %921 = vrot.lane.b32.xlu0 %v5127_v27, %s4478_s22  ;;  %v1294_v52 = vsel %vm1292_vm9, %v1246_v47, %v5091_v3  ;;  %v5199_v3 = vcombine.low %v699_v59, %v700_v51 }
  0xab   :  { %v1252_v56 = vsel %vm1243_vm8, %v4464_v55, %v906_v22  ;;  %v1327_v6 = vsel %vm1325_vm10, %v1294_v52, %v5105_v48 }
  0xac   :  { %923 = vrot.lane.b32.xlu1 %v5130_v13, %s4478_s22  ;;  %v904_v15 = vpop.permute.xlu0 %903  ;;  %v946_v55 = vrot.slane %v5199_v3, 1 }
  0xad   :  { %v1249_v61 = vsel %vm1243_vm8, %v4463_v28, %v904_v15  ;;  %v703_v28 = vld [vmem:[#allocation2 + $0x88] sm:$0xf] }
  0xae   :  { %v908_v12 = vpop.permute.xlu1 %907  ;;  %965 = vrot.lane.b32.xlu0 %v941_v35, %s4476_s18  ;;  %v1296_v58 = vsel %vm1292_vm9, %v1249_v61, %v5118_v63  ;;  %v1298_v63 = vsel %vm1292_vm9, %v1252_v56, %v5122_v8  ;;  %v704_v61 = vld [vmem:[#allocation2 + $0x8c] sm:$0x1] }
  0xaf   :  { %v1255_v4 = vsel %vm1243_vm8, %v4465_v60, %v908_v12  ;;  %v1329_v38 = vsel %vm1325_vm10, %v1296_v58, %v5095_v32  ;;  %v5219_v32 = vcombine.low %v699_v59, %v699_v59 }
  0xb0   :  { %967 = vrot.lane.b32.xlu1 %v942_v53, %s4476_s18  ;;  %v5143_v43 = vpop.permute.xlu0 %1053  ;;  %v1300_v14 = vsel %vm1292_vm9, %v1255_v4, %v5124_v11  ;;  %v1331_v11 = vsel %vm1325_vm10, %v1298_v63, %v5116_v62 }
  0xb2   :  { %v5145_v0 = vpop.permute.xlu1 %1055  ;;  %969 = vrot.lane.b32.xlu0 %v5138_v10, %s4476_s18 }
  0xb3   :  { %v1362_v22 = vsel %vm1358_vm11, %v1329_v38, %v5145_v0  ;;  %v1333_v0 = vsel %vm1325_vm10, %v1300_v14, %v5108_v42 }
  0xb4   :  { %971 = vrot.lane.b32.xlu1 %v5141_v16, %s4476_s18  ;;  %v5155_v25 = vpop.permute.xlu0 %1057 }
  0xb5   :  { %v1364_v17 = vsel %vm1358_vm11, %v1331_v11, %v5155_v25  ;;  %v881_v25 = vshrl.u32 %v5199_v3, 16 }
  0xb6   :  { %v5157_v46 = vpop.permute.xlu1 %1059  ;;  %1017 = vrot.lane.b32.xlu0 %v3741_v18, %s4477_s23 }
  0xb7   :  { %v1366_v62 = vsel %vm1358_vm11, %v1333_v0, %v5157_v46 }
  0xb8   :  { %1019 = vrot.lane.b32.xlu1 %v5153_v21, %s4477_s23  ;;  %v1088_v1 = vpop.permute.xlu0 %1087 }
  0xba   :  { %v1090_v29 = vpop.permute.xlu1 %1089  ;;  %1021 = vrot.lane.b32.xlu0 %v3743_v2, %s4477_s23 }
  0xbb   :  { %v1395_v8 = vsel %vm1391_vm12, %v1362_v22, %v1090_v29 }
  0xbc   :  { %1023 = vrot.lane.b32.xlu1 %v5162_v57, %s4477_s23  ;;  %v5167_v33 = vpop.permute.xlu0 %1091 }
  0xbd   :  { %v1397_v34 = vsel %vm1391_vm12, %v1364_v17, %v5167_v33 }
  0xbe   :  { %v5169_v50 = vpop.permute.xlu1 %1093  ;;  %1069 = vrot.lane.b32.xlu0 %v858_v9, %s4479_s13  ;;  %v1360_v9 = vsel %vm1358_vm11, %v1327_v6, %v5143_v43 }
  0xbf   :  { %v1393_v48 = vsel %vm1391_vm12, %v1360_v9, %v1088_v1  ;;  %v1399_v42 = vsel %vm1391_vm12, %v1366_v62, %v5169_v50 }
  0xc0   :  { %1071 = vrot.lane.b32.xlu1 %v5127_v27, %s4479_s13  ;;  %v1126_v39 = vpop.permute.xlu0 %1125 }
  0xc1   :  { %v1426_v35 = vsel %vm1424_vm13, %v1393_v48, %v1126_v39 }
  0xc2   :  { %v1128_v40 = vpop.permute.xlu1 %1127  ;;  %1073 = vrot.lane.b32.xlu0 %v5130_v13, %s4479_s13 }
  0xc3   :  { %v1428_v15 = vsel %vm1424_vm13, %v1395_v8, %v1128_v40  ;;  %v706_v8 = vld [vmem:[#allocation2 + $0x94] sm:$0x1] }
  0xc4   :  { %1075 = vrot.lane.b32.xlu1 %v5174_v31, %s4479_s13  ;;  %v1130_v41 = vpop.permute.xlu0 %1129 }
  0xc5   :  { %v1430_v26 = vsel %vm1424_vm13, %v1397_v34, %v1130_v41 }
  0xc6   :  { %v5180_v44 = vpop.permute.xlu1 %1131  ;;  %1103 = vrot.lane.b32.xlu0 %v942_v53, %s4480_s25  ;;  %v883_v53 = vshll.u32 %v5199_v3, 16 }
  0xc7   :  { %v1432_v29 = vsel %vm1424_vm13, %v1399_v42, %v5180_v44  ;;  %v701_v44 = vld [vmem:[#allocation2 + $0x80] sm:$0xf] }
  0xc8   :  { %1105 = vrot.lane.b32.xlu1 %v5138_v10, %s4480_s25  ;;  %v1178_v45 = vpop.permute.xlu0 %1177  ;;  %v885_v46 = vrot.slane %v883_v53, 1  ;;  %v705_v53 = vld [vmem:[#allocation2 + $0x90] sm:$0xf]  ;;  %v3746_v11 = vcombine.low %v701_v44, %v701_v44 }
  0xc9   :  { %v1459_v12 = vsel %vm1457_vm14, %v1426_v35, %v1178_v45  ;;  %v5321_v17 = vcombine.low %v705_v53, %v705_v53 }
  0xca   :  { %v1180_v54 = vpop.permute.xlu1 %1179  ;;  %1107 = vrot.lane.b32.xlu0 %v5141_v16, %s4480_s25  ;;  %v5256_v41 = vor.u32 %v885_v46, %v881_v25 }
  0xcb   :  { %v1461_v18 = vsel %vm1457_vm14, %v1428_v15, %v1180_v54  ;;  %v5314_v15 = vcombine.low %v705_v53, %v706_v8 }
  0xcc   :  { %1109 = vrot.lane.b32.xlu1 %v5187_v49, %s4480_s25  ;;  %v1182_v7 = vpop.permute.xlu0 %1181 }
  0xcd   :  { %v1463_v30 = vsel %vm1457_vm14, %v1430_v26, %v1182_v7  ;;  %v1049_v0 = vshll.u32 %v5314_v15, 16  ;;  %v1086_v46 = vrot.slane %v5314_v15, 1 }
  0xce   :  { %v1184_v37 = vpop.permute.xlu1 %1183  ;;  %1141 = vrot.lane.b32.xlu0 %v5153_v21, %s4481_s19 }
  0xcf   :  { %v1051_v62 = vrot.slane %v1049_v0, 1 }
  0xd0   :  { %1143 = vrot.lane.b32.xlu1 %v3743_v2, %s4481_s19  ;;  %v1212_v43 = vpop.permute.xlu0 %1211 }
  0xd1   :  { %v1492_v20 = vsel %vm1490_vm15, %v1459_v12, %v1212_v43  ;;  %v3747_v43 = vcombine.low %v703_v28, %v703_v28 }
  0xd2   :  { %v1214_v21 = vpop.permute.xlu1 %1213  ;;  %1145 = vrot.lane.b32.xlu0 %v5162_v57, %s4481_s19  ;;  %v1465_v57 = vsel %vm1457_vm14, %v1432_v29, %v1184_v37  ;;  %v708_v29 = vld [vmem:[#allocation2 + $0x9c] sm:$0x1] }
  0xd3   :  { %v1494_v2 = vsel %vm1490_vm15, %v1461_v18, %v1214_v21  ;;  %v1047_v21 = vshrl.u32 %v5314_v15, 16  ;;  %v4360_v15 = vld [vmem:[%s6470_s4 + $0xc8] sm:$0xff]  }
  0xd4   :  { %1147 = vrot.lane.b32.xlu1 %v5219_v32, %s4481_s19  ;;  %v3755_v1 = vcombine.low %v1492_v20, %v1494_v2  ;;  %v1216_v24 = vpop.permute.xlu0 %1215 }
  0xd5   :  { %v1496_v33 = vsel %vm1490_vm15, %v1463_v30, %v1216_v24 }
  0xd6   :  { %v1218_v39 = vpop.permute.xlu1 %1217  ;;  %4245 = vmatprep.mubr.msk.bf16.mxu0 %vm1583_vm0, %v3755_v1  ;;  %1193 = vrot.lane.b32.xlu0 %v5127_v27, %s4482_s12  ;;  %v3731_v27 = vcombine.low %v701_v44, %v702_v5 }
  0xd7   :  { %v1498_v50 = vsel %vm1490_vm15, %v1465_v57, %v1218_v39  ;;  %v707_v57 = vld [vmem:[#allocation2 + $0x98] sm:$0xf] }
  0xd8   :  { %v3756_v40 = vcombine.low %v1496_v33, %v1498_v50  ;;  %1195 = vrot.lane.b32.xlu1 %v5130_v13, %s4482_s12  ;;  %v5258_v47 = vpop.permute.xlu0 %909  ;;  %v3732_v13 = vcombine.low %v703_v28, %v704_v61  ;;  %v890_v54 = vshll.u32 %v3731_v27, 16  ;;  %v888_v60 = vshrl.u32 %v3731_v27, 16  ;;  %v4466_v33 = vld [vmem:[#allocation2 + $0x20] sm:$0xf] }
  0xd9   :  { %v1258_v39 = vsel %vm1243_vm8, %v4466_v33, %v5258_v47  ;;  %v5346_v50 = vcombine.low %v707_v57, %v708_v29 }
  0xda   :  { %v5260_v45 = vpop.permute.xlu1 %911  ;;  %4246 = vmatmul.mubr.msk.bf16.vlgmr.msra.gmra.mrb[0].mxu0 %vm1583_vm0, %v3756_v40  ;;  %1197 = vrot.lane.b32.xlu0 %v5174_v31, %s4482_s12  ;;  %v897_v56 = vshll.u32 %v3732_v13, 16  ;;  %v892_v4 = vrot.slane %v890_v54, 1  ;;  %v895_v6 = vshrl.u32 %v3732_v13, 16  ;;  %v5308_v22 = vrot.slane %v3732_v13, 1 }
  0xdb   :  { %v1261_v40 = vsel %vm1243_vm8, %v4842_v23, %v5260_v45  ;;  %v3752_v13 = vcombine.low %v707_v57, %v707_v57  ;;  %v1171_v8 = vshrl.u32 %v5346_v50, 16  ;;  %v1210_v29 = vrot.slane %v5346_v50, 1 }
  0xdc   :  { %1199 = vrot.lane.b32.xlu1 %v5256_v41, %s4482_s12  ;;  %v5267_v51 = vpop.permute.xlu0 %913 }
  0xdd   :  { %v1264_v23 = vsel %vm1243_vm8, %v4913_v19, %v5267_v51 }
  0xde   :  { %v5269_v52 = vpop.permute.xlu1 %915  ;;  %1227 = vrot.lane.b32.xlu0 %v5138_v10, %s4483_s30  ;;  %v899_v10 = vrot.slane %v897_v56, 1 }
  0xdf   :  { %v1267_v56 = vsel %vm1243_vm8, %v4935_v36, %v5269_v52 }
  0xe0   :  { %1229 = vrot.lane.b32.xlu1 %v5141_v16, %s4483_s30  ;;  %v5276_v58 = vpop.permute.xlu0 %957  ;;  %v5289_v16 = vor.u32 %v892_v4, %v888_v60  ;;  %v5293_v3 = vor.u32 %v899_v10, %v895_v6 }
  0xe2   :  { %v5278_v59 = vpop.permute.xlu1 %959  ;;  %1231 = vrot.lane.b32.xlu0 %v5187_v49, %s4483_s30 }
  0xe3   :  { %v1304_v44 = vsel %vm1292_vm9, %v1261_v40, %v5278_v59 }
  0xe4   :  { %1233 = vrot.lane.b32.xlu1 %v946_v55, %s4483_s30  ;;  %v5283_v7 = vpop.permute.xlu0 %961 }
  0xe6   :  { %v5285_v63 = vpop.permute.xlu1 %963  ;;  %925 = vrot.lane.b32.xlu0 %v5174_v31, %s4478_s22  ;;  %v5305_v31 = vrot.slane %v3731_v27, 1 }
  0xe7   :  { %v1308_v19 = vsel %vm1292_vm9, %v1267_v56, %v5285_v63  ;;  %v186_v56 = vld [vmem:[#allocation3 + $0x20] sm:$0x1] }
  0xe8   :  { %927 = vrot.lane.b32.xlu1 %v5256_v41, %s4478_s22  ;;  %v1010_v9 = vpop.permute.xlu0 %1009 }
  0xea   :  { %v1012_v38 = vpop.permute.xlu1 %1011  ;;  %929 = vrot.lane.b32.xlu0 %v5289_v16, %s4478_s22 }
  0xeb   :  { %v1337_v28 = vsel %vm1325_vm10, %v1304_v44, %v1012_v38 }
  0xec   :  { %931 = vrot.lane.b32.xlu1 %v5293_v3, %s4478_s22  ;;  %v5299_v37 = vpop.permute.xlu0 %1013 }
  0xee   :  { %v5301_v14 = vpop.permute.xlu1 %1015  ;;  %973 = vrot.lane.b32.xlu0 %v5187_v49, %s4476_s18 }
  0xef   :  { %v1341_v52 = vsel %vm1325_vm10, %v1308_v19, %v5301_v14 }
  0xf0   :  { %975 = vrot.lane.b32.xlu1 %v946_v55, %s4476_s18  ;;  %v1062_v48 = vpop.permute.xlu0 %1061 }
  0xf2   :  { %v1064_v35 = vpop.permute.xlu1 %1063  ;;  %977 = vrot.lane.b32.xlu0 %v5305_v31, %s4476_s18 }
  0xf3   :  { %v1370_v45 = vsel %vm1358_vm11, %v1337_v28, %v1064_v35 }
  0xf4   :  { %979 = vrot.lane.b32.xlu1 %v5308_v22, %s4476_s18  ;;  %v1066_v49 = vpop.permute.xlu0 %1065 }
  0xf6   :  { %v5316_v12 = vpop.permute.xlu1 %1067  ;;  %1025 = vrot.lane.b32.xlu0 %v5219_v32, %s4477_s23  ;;  %v5332_v32 = vor.u32 %v1051_v62, %v1047_v21 }
  0xf7   :  { %v1374_v63 = vsel %vm1358_vm11, %v1341_v52, %v5316_v12 }
  0xf8   :  { %1027 = vrot.lane.b32.xlu1 %v3746_v11, %s4477_s23  ;;  %v1096_v18 = vpop.permute.xlu0 %1095 }
  0xfa   :  { %v1098_v20 = vpop.permute.xlu1 %1097  ;;  %1029 = vrot.lane.b32.xlu0 %v3747_v43, %s4477_s23 }
  0xfb   :  { %v1403_v59 = vsel %vm1391_vm12, %v1370_v45, %v1098_v20  ;;  %v4365_v45 = vld [vmem:[%s6470_s4 + $0x48] sm:$0xff]  }
  0xfc   :  { %1031 = vrot.lane.b32.xlu1 %v5321_v17, %s4477_s23  ;;  %v1100_v34 = vpop.permute.xlu0 %1099 }
  0xfe   :  { %v1102_v2 = vpop.permute.xlu1 %1101  ;;  %1077 = vrot.lane.b32.xlu0 %v5256_v41, %s4479_s13  ;;  %v1302_v41 = vsel %vm1292_vm9, %v1258_v39, %v5276_v58  ;;  %v1306_v58 = vsel %vm1292_vm9, %v1264_v23, %v5283_v7  ;;  %v238_v23 = vld [vmem:[#allocation3 + $0xc] sm:$0x1] }
  0xff   :  { %v1335_v5 = vsel %vm1325_vm10, %v1302_v41, %v1010_v9  ;;  %v1339_v51 = vsel %vm1325_vm10, %v1306_v58, %v5299_v37  ;;  %v1407_v14 = vsel %vm1391_vm12, %v1374_v63, %v1102_v2  ;;  %v247_v58 = vld [vmem:[#allocation3 + $0x24] sm:$0x1]  ;;  %v4370_v63 = vld [vmem:[%s6470_s4 + $0x98] sm:$0xff]  }
 0x100   :  { %1079 = vrot.lane.b32.xlu1 %v5289_v16, %s4479_s13  ;;  %v1134_v25 = vpop.permute.xlu0 %1133  ;;  %v1368_v61 = vsel %vm1358_vm11, %v1335_v5, %v1062_v48  ;;  %v1372_v10 = vsel %vm1358_vm11, %v1339_v51, %v1066_v49  ;;  %v4362_v5 = vld [vmem:[%s6470_s4 + $0x88] sm:$0xff]   ;;  %v248_v19 = vsel %vm5409_vm3, 0, %v247_v58  ;;  %v180_v51 = vld [vmem:[#allocation3 + $0x10] sm:$0x1]  ;;  %v4468_v58 = vld [vmem:[#allocation2 + $0x58] sm:$0xf] }
 0x101   :  { %v1401_v54 = vsel %vm1391_vm12, %v1368_v61, %v1096_v18  ;;  %v1405_v37 = vsel %vm1391_vm12, %v1372_v10, %v1100_v34  ;;  %249 = vst [vmem:[#allocation3 + $0x24] sm:$0x1] %v248_v19  ;;  %v4366_v10 = vld [vmem:[%s6470_s4 + $0x90] sm:$0xff]  }
 0x102   :  { %v1136_v42 = vpop.permute.xlu1 %1135  ;;  %1081 = vrot.lane.b32.xlu0 %v5293_v3, %s4479_s13  ;;  %v1434_v60 = vsel %vm1424_vm13, %v1401_v54, %v1134_v25 }
 0x103   :  { %v1436_v4 = vsel %vm1424_vm13, %v1403_v59, %v1136_v42  ;;  %v244_v42 = vld [vmem:[#allocation3 + $0x1c] sm:$0x1] }
 0x104   :  { %1083 = vrot.lane.b32.xlu1 %v5332_v32, %s4479_s13  ;;  %v1138_v26 = vpop.permute.xlu0 %1137 }
 0x105   :  { %v1438_v35 = vsel %vm1424_vm13, %v1405_v37, %v1138_v26  ;;  %v4358_v26 = vld [vmem:[%s6470_s4 + $0xc0] sm:$0xff]   ;;  %v4371_v37 = vld [vmem:[%s6470_s4 + $0x10] sm:$0xff]  }
 0x106   :  { %v1140_v1 = vpop.permute.xlu1 %1139  ;;  %1111 = vrot.lane.b32.xlu0 %v946_v55, %s4480_s25  ;;  %v1173_v55 = vshll.u32 %v5346_v50, 16  ;;  %4031 = vmatprep.subr.bf16.mxu0 %v4358_v26  ;;  %v4380_v26 = vld [vmem:[%s6470_s4 + $0xf0] sm:$0xff]  }
 0x107   :  { %v1440_v49 = vsel %vm1424_vm13, %v1407_v14, %v1140_v1  ;;  %v4372_v14 = vld [vmem:[%s6470_s4 + $0xe0] sm:$0xff]  }
 0x108   :  { %1113 = vrot.lane.b32.xlu1 %v5305_v31, %s4480_s25  ;;  %v1186_v30 = vpop.permute.xlu0 %1185 }
 0x109   :  { %v1467_v6 = vsel %vm1457_vm14, %v1434_v60, %v1186_v30  ;;  %v245_v30 = vsel %vm5409_vm3, 0, %v244_v42  ;;  %v187_v60 = vsel %vm5420_vm5, 0, %v186_v56  ;;  %v4392_v56 = vld [vmem:[%s6470_s4 + $0x78] sm:$0xff]  }
 0x10a   :  { %v1188_v24 = vpop.permute.xlu1 %1187  ;;  %1115 = vrot.lane.b32.xlu0 %v5308_v22, %s4480_s25  ;;  %246 = vst [vmem:[#allocation3 + $0x1c] sm:$0x1] %v245_v30  ;;  %188 = vst [vmem:[#allocation3 + $0x20] sm:$0x1] %v187_v60  ;;  %v4382_v30 = vld [vmem:[%s6470_s4 + $0xb0] sm:$0xff]  }
 0x10b   :  { %v1469_v7 = vsel %vm1457_vm14, %v1436_v4, %v1188_v24  ;;  %v241_v4 = vld [vmem:[#allocation3 + $0x14] sm:$0x1] }
 0x10c   :  { %1117 = vrot.lane.b32.xlu1 %v1086_v46, %s4480_s25  ;;  %v1190_v47 = vpop.permute.xlu0 %1189  ;;  %v242_v52 = vsel %vm5409_vm3, 0, %v241_v4 }
 0x10d   :  { %v1471_v12 = vsel %vm1457_vm14, %v1438_v35, %v1190_v47  ;;  %v4363_v47 = vld [vmem:[%s6470_s4] sm:$0xff]   ;;  %243 = vst [vmem:[#allocation3 + $0x14] sm:$0x1] %v242_v52  ;;  %v4373_v35 = vld [vmem:[%s6470_s4 + $0x58] sm:$0xff]  }
 0x10e   :  { %v1192_v27 = vpop.permute.xlu1 %1191  ;;  %1149 = vrot.lane.b32.xlu0 %v3746_v11, %s4481_s19  ;;  %v1175_v11 = vrot.slane %v1173_v55, 1  ;;  %v239_v55 = vsel %vm5409_vm3, 0, %v238_v23 }
 0x10f   :  { %v1473_v0 = vsel %vm1457_vm14, %v1440_v49, %v1192_v27  ;;  %v4364_v27 = vld [vmem:[%s6470_s4 + $0xd0] sm:$0xff]   ;;  %240 = vst [vmem:[#allocation3 + $0xc] sm:$0x1] %v239_v55 }
 0x110   :  { %1151 = vrot.lane.b32.xlu1 %v3747_v43, %s4481_s19  ;;  %v1220_v36 = vpop.permute.xlu0 %1219  ;;  %v1176_v62 = vor.u32 %v1175_v11, %v1171_v8  ;;  %v4375_v11 = vld [vmem:[%s6470_s4 + $0x18] sm:$0xff]  }
 0x111   :  { %v1500_v9 = vsel %vm1490_vm15, %v1467_v6, %v1220_v36  ;;  %v181_v36 = vsel %vm5420_vm5, 0, %v180_v51  ;;  %v4396_v51 = vld [vmem:[%s6470_s4 + $0x38] sm:$0xff]  }
 0x112   :  { %v1222_v38 = vpop.permute.xlu1 %1221  ;;  %1153 = vrot.lane.b32.xlu0 %v5321_v17, %s4481_s19  ;;  %182 = vst [vmem:[#allocation3 + $0x10] sm:$0x1] %v181_v36 }
 0x113   :  { %v1502_v48 = vsel %vm1490_vm15, %v1469_v7, %v1222_v38  ;;  %v4367_v7 = vld [vmem:[%s6470_s4 + $0x8] sm:$0xff]   ;;  %v4369_v38 = vld [vmem:[%s6470_s4 + $0x50] sm:$0xff]  }
 0x114   :  { %v3757_v53 = vcombine.low %v1500_v9, %v1502_v48  ;;  %1155 = vrot.lane.b32.xlu1 %v3752_v13, %s4481_s19  ;;  %v1224_v43 = vpop.permute.xlu0 %1223  ;;  %v177_v13 = vld [vmem:[#allocation3 + $0x8] sm:$0x1]  ;;  %v4368_v9 = vld [vmem:[%s6470_s4 + $0xd8] sm:$0xff]  }
 0x115   :  { %v1504_v17 = vsel %vm1490_vm15, %v1471_v12, %v1224_v43  ;;  %v178_v54 = vsel %vm5420_vm5, 0, %v177_v13  ;;  %v174_v12 = vld [vmem:[#allocation3] sm:$0x1]  ;;  %v4387_v13 = vld [vmem:[%s6470_s4 + $0x30] sm:$0xff]  }
 0x116   :  { %v1226_v18 = vpop.permute.xlu1 %1225  ;;  %4249 = vmatprep.mubr.msk.bf16.mxu0 %vm1583_vm0, %v3757_v53  ;;  %1201 = vrot.lane.b32.xlu0 %v5289_v16, %s4482_s12  ;;  %179 = vst [vmem:[#allocation3 + $0x8] sm:$0x1] %v178_v54  ;;  %v4374_v53 = vld [vmem:[%s6470_s4 + $0xa0] sm:$0xff]   ;;  %v4467_v54 = vld [vmem:[#allocation2 + $0x50] sm:$0xf] }
 0x117   :  { %v1506_v20 = vsel %vm1490_vm15, %v1473_v0, %v1226_v18  ;;  %v4376_v0 = vld [vmem:[%s6470_s4 + $0xe8] sm:$0xff]   ;;  %v4377_v18 = vld [vmem:[%s6470_s4 + $0x60] sm:$0xff]  }
 0x118   :  { %v3758_v21 = vcombine.low %v1504_v17, %v1506_v20  ;;  %1203 = vrot.lane.b32.xlu1 %v5293_v3, %s4482_s12  ;;  %v5413_v2 = vpop.permute.xlu0 %917  ;;  %v183_v3 = vld [vmem:[#allocation3 + $0x18] sm:$0x1]  ;;  %v175_v17 = vsel %vm5420_vm5, 0, %v174_v12  ;;  %v235_v20 = vld [vmem:[#allocation3 + $0x4] sm:$0x1] }
 0x119   :  { %v184_v1 = vsel %vm5420_vm5, 0, %v183_v3  ;;  %176 = vst [vmem:[#allocation3] sm:$0x1] %v175_v17  ;;  %v236_v3 = vsel %vm5409_vm3, 0, %v235_v20  ;;  %v1270_v55 = vsel %vm1243_vm8, %v4467_v54, %v5413_v2 }
 0x11a   :  { %v5415_v25 = vpop.permute.xlu1 %919  ;;  %4250 = vmatmul.mubr.msk.bf16.gmra.mrb[4].mxu0 %vm1583_vm0, %v3758_v21  ;;  %1205 = vrot.lane.b32.xlu0 %v5332_v32, %s4482_s12  ;;  %185 = vst [vmem:[#allocation3 + $0x18] sm:$0x1] %v184_v1  ;;  %v4378_v21 = vld [vmem:[%s6470_s4 + $0xa8] sm:$0xff]   ;;  %237 = vst [vmem:[#allocation3 + $0x4] sm:$0x1] %v236_v3 }
 0x11b   :  { %v4381_v1 = vld [vmem:[%s6470_s4 + $0x68] sm:$0xff]   ;;  %v1273_v60 = vsel %vm1243_vm8, %v4468_v58, %v5415_v25  ;;  %v189_v58 = vld [vmem:[#allocation3 + $0x28] sm:$0x1] }
 0x11c   :  { %1207 = vrot.lane.b32.xlu1 %v1176_v62, %s4482_s12  ;;  %v5435_v24 = vpop.permute.xlu0 %921  ;;  %v4379_v62 = vld [vmem:[%s6470_s4 + $0x20] sm:$0xff]  }
 0x11e   :  { %v5437_v32 = vpop.permute.xlu1 %923  ;;  %1235 = vrot.lane.b32.xlu0 %v5305_v31, %s4483_s30 }
 0x120   :  { %1237 = vrot.lane.b32.xlu1 %v5308_v22, %s4483_s30  ;;  %v5443_v57 = vpop.permute.xlu0 %965  ;;  %v4359_v22 = vld [vmem:[%s6470_s4 + $0x80] sm:$0xff]  }
 0x121   :  { %4032 = vmatpush3.bf16.msra.mxu0 %v4359_v22  ;;  %v4383_v22 = vld [vmem:[%s6470_s4 + $0x28] sm:$0xff]   ;;  %v1310_v19 = vsel %vm1292_vm9, %v1270_v55, %v5443_v57 }
 0x122   :  { %v5445_v33 = vpop.permute.xlu1 %967  ;;  %1239 = vrot.lane.b32.xlu0 %v1086_v46, %s4483_s30  ;;  %v4361_v46 = vld [vmem:[%s6470_s4 + $0x40] sm:$0xff]   ;;  %4033 = vmatprep.subr.bf16.mxu0 %v4360_v15  ;;  %v4384_v15 = vld [vmem:[%s6470_s4 + $0xf8] sm:$0xff]  }
 0x123   :  { %3967 = vmatprep.subr.bf16.mxu1 %v4361_v46  ;;  %v4385_v46 = vld [vmem:[%s6470_s4 + $0x70] sm:$0xff]   ;;  %v1312_v2 = vsel %vm1292_vm9, %v1273_v60, %v5445_v33 }
 0x124   :  { %1241 = vrot.lane.b32.xlu1 %v1210_v29, %s4483_s30  ;;  %v5451_v39 = vpop.permute.xlu0 %969  ;;  %3968 = vmatpush3.bf16.msra.mxu1 %v4363_v47  ;;  %v250_v60 = vld [vmem:[#allocation3 + $0x2c] sm:$0x1] }
 0x125   :  { %4034 = vmatpush3.bf16.msra.mxu0 %v4362_v5  ;;  %3969 = vmatprep.subr.bf16.mxu1 %v4365_v45 }
 0x126   :  { %v5453_v50 = vpop.permute.xlu1 %971  ;;  %4035 = vmatprep.subr.bf16.mxu0 %v4364_v27  ;;  %v4386_v27 = vld [vmem:[%s6470_s4 + $0xb8] sm:$0xff]  }
 0x128   :  { %v5455_v40 = vpop.permute.xlu0 %1017  ;;  %3970 = vmatpush3.bf16.msra.mxu1 %v4367_v7 }
 0x129   :  { %4036 = vmatpush3.bf16.msra.mxu0 %v4366_v10  ;;  %3971 = vmatprep.subr.bf16.mxu1 %v4369_v38  ;;  %v1343_v4 = vsel %vm1325_vm10, %v1310_v19, %v5455_v40  ;;  %v4469_v10 = vld [vmem:[#allocation2 + $0x60] sm:$0xf]  ;;  %v4470_v40 = vld [vmem:[#allocation2 + $0x68] sm:$0xf] }
 0x12a   :  { %v5457_v31 = vpop.permute.xlu1 %1019  ;;  %4037 = vmatprep.subr.bf16.mxu0 %v4368_v9  ;;  %v1276_v7 = vsel %vm1243_vm8, %v4469_v10, %v5435_v24  ;;  %v1279_v38 = vsel %vm1243_vm8, %v4470_v40, %v5437_v32  ;;  %v253_v10 = vld [vmem:[#allocation3 + $0x34] sm:$0x1] }
 0x12b   :  { %v1345_v25 = vsel %vm1325_vm10, %v1312_v2, %v5457_v31  ;;  %v1314_v31 = vsel %vm1292_vm9, %v1276_v7, %v5451_v39  ;;  %v1316_v24 = vsel %vm1292_vm9, %v1279_v38, %v5453_v50  ;;  %v251_v2 = vsel %vm5409_vm3, 0, %v250_v60 }
 0x12c   :  { %v5462_v41 = vpop.permute.xlu0 %1021  ;;  %3972 = vmatpush3.bf16.msra.mxu1 %v4371_v37  ;;  %252 = vst [vmem:[#allocation3 + $0x2c] sm:$0x1] %v251_v2 }
 0x12d   :  { %4038 = vmatpush3.bf16.msra.mxu0 %v4370_v63  ;;  %3973 = vmatprep.subr.bf16.mxu1 %v4373_v35 }
 0x12e   :  { %v5464_v44 = vpop.permute.xlu1 %1023  ;;  %4039 = vmatprep.subr.bf16.mxu0 %v4372_v14 }
 0x12f   :  { %v1349_v39 = vsel %vm1325_vm10, %v1316_v24, %v5464_v44 }
 0x130   :  { %v5478_v28 = vpop.permute.xlu0 %1069  ;;  %3974 = vmatpush3.bf16.msra.mxu1 %v4375_v11 }
 0x131   :  { %4040 = vmatpush3.bf16.msra.mxu0 %v4374_v53  ;;  %3975 = vmatprep.subr.bf16.mxu1 %v4377_v18  ;;  %v1376_v57 = vsel %vm1358_vm11, %v1343_v4, %v5478_v28  ;;  %v198_v4 = vld [vmem:[#allocation3 + $0x40] sm:$0x1] }
 0x132   :  { %v5480_v61 = vpop.permute.xlu1 %1071  ;;  %4041 = vmatprep.subr.bf16.mxu0 %v4376_v0 }
 0x133   :  { %v1378_v9 = vsel %vm1358_vm11, %v1345_v25, %v5480_v61  ;;  %v1347_v61 = vsel %vm1325_vm10, %v1314_v31, %v5462_v41  ;;  %v199_v25 = vsel %vm5420_vm5, 0, %v198_v4 }
 0x134   :  { %v5492_v59 = vpop.permute.xlu0 %1073  ;;  %3976 = vmatpush3.bf16.msra.mxu1 %v4379_v62  ;;  %200 = vst [vmem:[#allocation3 + $0x40] sm:$0x1] %v199_v25 }
 0x135   :  { %4042 = vmatpush3.bf16.msra.mxu0 %v4378_v21  ;;  %3977 = vmatprep.subr.bf16.mxu1 %v4381_v1 }
 0x136   :  { %v5498_v6 = vpop.permute.xlu1 %1075  ;;  %4043 = vmatprep.subr.bf16.mxu0 %v4380_v26  ;;  %v256_v26 = vld [vmem:[#allocation3 + $0x3c] sm:$0x1] }
 0x137   :  { %v1382_v50 = vsel %vm1358_vm11, %v1349_v39, %v5498_v6 }
 0x138   :  { %v5522_v48 = vpop.permute.xlu0 %1103  ;;  %3978 = vmatpush3.bf16.msra.mxu1 %v4383_v22 }
 0x139   :  { %4044 = vmatpush3.bf16.msra.mxu0 %v4382_v30  ;;  %3979 = vmatprep.subr.bf16.mxu1 %v4385_v46  ;;  %v1409_v33 = vsel %vm1391_vm12, %v1376_v57, %v5522_v48 }
 0x13a   :  { %v5524_v8 = vpop.permute.xlu1 %1105  ;;  %4045 = vmatprep.subr.bf16.mxu0 %v4384_v15 }
 0x13b   :  { %v1411_v28 = vsel %vm1391_vm12, %v1378_v9, %v5524_v8  ;;  %v1380_v8 = vsel %vm1358_vm11, %v1347_v61, %v5492_v59  ;;  %v254_v9 = vsel %vm5409_vm3, 0, %v253_v10  ;;  %v262_v61 = vld [vmem:[#allocation3 + $0x4c] sm:$0x1] }
 0x13c   :  { %v5538_v49 = vpop.permute.xlu0 %1107  ;;  %3980 = vmatpush3.bf16.msra.mxu1 %v4387_v13  ;;  %255 = vst [vmem:[#allocation3 + $0x34] sm:$0x1] %v254_v9  ;;  %v274_v10 = vld [vmem:[#allocation3 + $0x6c] sm:$0x1] }
 0x13d   :  { %4046 = vmatpush3.bf16.msra.mxu0 %v4386_v27  ;;  %3981 = vmatprep.subr.bf16.mxu1 %v4392_v56  ;;  %v1413_v41 = vsel %vm1391_vm12, %v1380_v8, %v5538_v49  ;;  %v275_v9 = vsel %vm5409_vm3, 0, %v274_v10 }
 0x13e   :  { %v5540_v43 = vpop.permute.xlu1 %1109  ;;  %276 = vst [vmem:[#allocation3 + $0x6c] sm:$0x1] %v275_v9 }
 0x13f   :  { %v1415_v12 = vsel %vm1391_vm12, %v1382_v50, %v5540_v43  ;;  %v4472_v50 = vld [vmem:[#allocation2 + $0x78] sm:$0xf] }
 0x140   :  { %v1142_v42 = vpop.permute.xlu0 %1141  ;;  %3982 = vmatpush3.bf16.msra.mxu1 %v4396_v51  ;;  %v190_v51 = vsel %vm5420_vm5, 0, %v189_v58 }
 0x141   :  { %v1442_v63 = vsel %vm1424_vm13, %v1409_v33, %v1142_v42  ;;  %v195_v42 = vld [vmem:[#allocation3 + $0x38] sm:$0x1]  ;;  %191 = vst [vmem:[#allocation3 + $0x28] sm:$0x1] %v190_v51 }
 0x142   :  { %v1144_v29 = vpop.permute.xlu1 %1143  ;;  %v196_v1 = vsel %vm5420_vm5, 0, %v195_v42 }
 0x143   :  { %v1444_v37 = vsel %vm1424_vm13, %v1411_v28, %v1144_v29  ;;  %v257_v29 = vsel %vm5409_vm3, 0, %v256_v26  ;;  %197 = vst [vmem:[#allocation3 + $0x38] sm:$0x1] %v196_v1  ;;  %v201_v28 = vld [vmem:[#allocation3 + $0x48] sm:$0x1] }
 0x144   :  { %v1146_v5 = vpop.permute.xlu0 %1145  ;;  %258 = vst [vmem:[#allocation3 + $0x3c] sm:$0x1] %v257_v29  ;;  %v202_v24 = vsel %vm5420_vm5, 0, %v201_v28 }
 0x145   :  { %v1446_v44 = vsel %vm1424_vm13, %v1413_v41, %v1146_v5  ;;  %203 = vst [vmem:[#allocation3 + $0x48] sm:$0x1] %v202_v24 }
 0x146   :  { %v1148_v47 = vpop.permute.xlu1 %1147 }
 0x147   :  { %v1448_v59 = vsel %vm1424_vm13, %v1415_v12, %v1148_v47 }
 0x148   :  { %v1194_v23 = vpop.permute.xlu0 %1193 }
 0x149   :  { %v1475_v48 = vsel %vm1457_vm14, %v1442_v63, %v1194_v23 }
 0x14a   :  { %v1196_v45 = vpop.permute.xlu1 %1195 }
 0x14b   :  { %v1477_v14 = vsel %vm1457_vm14, %v1444_v37, %v1196_v45 }
 0x14c   :  { %v1198_v36 = vpop.permute.xlu0 %1197 }
 0x14d   :  { %v1479_v17 = vsel %vm1457_vm14, %v1446_v44, %v1198_v36  ;;  %v259_v36 = vld [vmem:[#allocation3 + $0x44] sm:$0x1] }
 0x14e   :  { %v1200_v52 = vpop.permute.xlu1 %1199  ;;  %v260_v57 = vsel %vm5409_vm3, 0, %v259_v36 }
 0x14f   :  { %v1481_v20 = vsel %vm1457_vm14, %v1448_v59, %v1200_v52  ;;  %v192_v52 = vld [vmem:[#allocation3 + $0x30] sm:$0x1]  ;;  %261 = vst [vmem:[#allocation3 + $0x44] sm:$0x1] %v260_v57 }
 0x150   :  { %v1228_v32 = vpop.permute.xlu0 %1227  ;;  %v193_v7 = vsel %vm5420_vm5, 0, %v192_v52  ;;  %v213_v52 = vld [vmem:[#allocation3 + $0x68] sm:$0x1] }
 0x151   :  { %v1508_v35 = vsel %vm1490_vm15, %v1475_v48, %v1228_v32  ;;  %194 = vst [vmem:[#allocation3 + $0x30] sm:$0x1] %v193_v7  ;;  %v263_v48 = vsel %vm5409_vm3, 0, %v262_v61  ;;  %v214_v7 = vsel %vm5420_vm5, 0, %v213_v52  ;;  %v271_v52 = vld [vmem:[#allocation3 + $0x64] sm:$0x1] }
 0x152   :  { %v1230_v53 = vpop.permute.xlu1 %1229  ;;  %264 = vst [vmem:[#allocation3 + $0x4c] sm:$0x1] %v263_v48  ;;  %215 = vst [vmem:[#allocation3 + $0x68] sm:$0x1] %v214_v7 }
 0x153   :  { %v1510_v11 = vsel %vm1490_vm15, %v1477_v14, %v1230_v53 }
 0x154   :  { %v3759_v0 = vcombine.low %v1508_v35, %v1510_v11  ;;  %v1232_v18 = vpop.permute.xlu0 %1231  ;;  %v4471_v35 = vld [vmem:[#allocation2 + $0x70] sm:$0xf] }
 0x155   :  { %v1512_v6 = vsel %vm1490_vm15, %v1479_v17, %v1232_v18 }
 0x156   :  { %v1234_v21 = vpop.permute.xlu1 %1233  ;;  %4253 = vmatprep.mubr.msk.bf16.mxu0 %vm1583_vm0, %v3759_v0 }
 0x157   :  { %v1514_v49 = vsel %vm1490_vm15, %v1481_v20, %v1234_v21  ;;  %v4473_v20 = vld [vmem:[#allocation2 + $0x80] sm:$0xf] }
 0x158   :  { %v3760_v62 = vcombine.low %v1512_v6, %v1514_v49  ;;  %v926_v3 = vpop.permute.xlu0 %925 }
 0x159   :  { %v1282_v53 = vsel %vm1243_vm8, %v4471_v35, %v926_v3 }
 0x15a   :  { %v928_v43 = vpop.permute.xlu1 %927  ;;  %4254 = vmatmul.mubr.msk.bf16.gmra.mrb[8].mxu0 %vm1583_vm0, %v3760_v62  ;;  %v4474_v62 = vld [vmem:[#allocation2 + $0x88] sm:$0xf] }
 0x15b   :  { %v1285_v41 = vsel %vm1243_vm8, %v4472_v50, %v928_v43  ;;  %v5733_v50 = vld [vmem:[#allocation3] sm:$0xf] }
 0x15c   :  { %v930_v30 = vpop.permute.xlu0 %929 }
 0x15d   :  { %v1288_v6 = vsel %vm1243_vm8, %v4473_v20, %v930_v30 }
 0x15e   :  { %v5646_v22 = vpop.permute.xlu1 %931 }
 0x15f   :  { %v1291_v3 = vsel %vm1243_vm8, %v4474_v62, %v5646_v22  ;;  %v1997_v62 = vld [vmem:[#allocation3 + $0x1c] sm:$0x1] }
 0x160   :  { %v974_v15 = vpop.permute.xlu0 %973 }
 0x161   :  { %v1318_v11 = vsel %vm1292_vm9, %v1282_v53, %v974_v15 }
 0x162   :  { %v976_v46 = vpop.permute.xlu1 %975 }
 0x163   :  { %v1320_v12 = vsel %vm1292_vm9, %v1285_v41, %v976_v46  ;;  %v2079_v41 = vld [vmem:[#allocation3 + $0x4] sm:$0x1] }
 0x164   :  { %v978_v5 = vpop.permute.xlu0 %977  ;;  %v5736_v20 = vcombine.low %v5733_v50, %v2079_v41 }
 0x165   :  { %v1322_v43 = vsel %vm1292_vm9, %v1288_v6, %v978_v5  ;;  %v207_v6 = vld [vmem:[#allocation3 + $0x58] sm:$0x1] }
 0x166   :  { %v5648_v47 = vpop.permute.xlu1 %979 }
 0x167   :  { %v1324_v1 = vsel %vm1292_vm9, %v1291_v3, %v5648_v47 }
 0x168   :  { %v1026_v27 = vpop.permute.xlu0 %1025 }
 0x169   :  { %v1351_v44 = vsel %vm1325_vm10, %v1318_v11, %v1026_v27 }
 0x16a   :  { %v1028_v13 = vpop.permute.xlu1 %1027 }
 0x16b   :  { %v1353_v59 = vsel %vm1325_vm10, %v1320_v12, %v1028_v13 }
 0x16c   :  { %v1030_v23 = vpop.permute.xlu0 %1029 }
 0x16d   :  { %v1355_v29 = vsel %vm1325_vm10, %v1322_v43, %v1030_v23 }
 0x16e   :  { %v5650_v45 = vpop.permute.xlu1 %1031 }
 0x16f   :  { %v1357_v27 = vsel %vm1325_vm10, %v1324_v1, %v5650_v45  ;;  %v216_v1 = vld [vmem:[#allocation3 + $0x70] sm:$0x1] }
 0x170   :  { %v1078_v54 = vpop.permute.xlu0 %1077 }
 0x171   :  { %v1384_v17 = vsel %vm1358_vm11, %v1351_v44, %v1078_v54 }
 0x172   :  { %v1080_v55 = vpop.permute.xlu1 %1079 }
 0x173   :  { %v1386_v21 = vsel %vm1358_vm11, %v1353_v59, %v1080_v55 }
 0x174   :  { %v5652_v56 = vpop.permute.xlu0 %1081 }
 0x175   :  { %v1388_v22 = vsel %vm1358_vm11, %v1355_v29, %v5652_v56 }
 0x176   :  { %v5654_v19 = vpop.permute.xlu1 %1083 }
 0x177   :  { %v1390_v47 = vsel %vm1358_vm11, %v1357_v27, %v5654_v19 }
 0x178   :  { %v1112_v33 = vpop.permute.xlu0 %1111 }
 0x179   :  { %v1417_v49 = vsel %vm1391_vm12, %v1384_v17, %v1112_v33  ;;  %v5718_v33 = vld [vmem:[%s6471_s2] ss:$0 sm:$0xff] }
 0x17a   :  { %v1114_v40 = vpop.permute.xlu1 %1113 }
 0x17b   :  { %v1419_v42 = vsel %vm1391_vm12, %v1386_v21, %v1114_v40  ;;  %v268_v21 = vld [vmem:[#allocation3 + $0x5c] sm:$0x1] }
 0x17c   :  { %v1116_v38 = vpop.permute.xlu0 %1115 }
 0x17d   :  { %v1421_v23 = vsel %vm1391_vm12, %v1388_v22, %v1116_v38  ;;  %v5723_v38 = vld [vmem:[%s6472_s3] ss:$0 sm:$0xff]  ;;  %v269_v22 = vsel %vm5409_vm3, 0, %v268_v21 }
 0x17e   :  { %v1118_v31 = vpop.permute.xlu1 %1117  ;;  %270 = vst [vmem:[#allocation3 + $0x5c] sm:$0x1] %v269_v22 }
 0x17f   :  { %v1423_v58 = vsel %vm1391_vm12, %v1390_v47, %v1118_v31  ;;  %v2000_v47 = vld [vmem:[#allocation3 + $0x20] sm:$0xf] }
 0x180   :  { %v1150_v63 = vpop.permute.xlu0 %1149 }
 0x181   :  { %v1450_v26 = vsel %vm1424_vm13, %v1417_v49, %v1150_v63  ;;  %v1994_v49 = vld [vmem:[#allocation3 + $0x18] sm:$0xf] }
 0x182   :  { %v1152_v37 = vpop.permute.xlu1 %1151 }
 0x183   :  { %v1452_v30 = vsel %vm1424_vm13, %v1419_v42, %v1152_v37 }
 0x184   :  { %v1154_v32 = vpop.permute.xlu0 %1153 }
 0x185   :  { %v1454_v60 = vsel %vm1424_vm13, %v1421_v23, %v1154_v32 }
 0x186   :  { %v1156_v39 = vpop.permute.xlu1 %1155 }
 0x187   :  { %v1456_v51 = vsel %vm1424_vm13, %v1423_v58, %v1156_v39  ;;  %v217_v58 = vsel %vm5420_vm5, 0, %v216_v1 }
 0x188   :  { %v1202_v8 = vpop.permute.xlu0 %1201  ;;  %218 = vst [vmem:[#allocation3 + $0x70] sm:$0x1] %v217_v58 }
 0x189   :  { %v1483_v15 = vsel %vm1457_vm14, %v1450_v26, %v1202_v8  ;;  %v208_v26 = vsel %vm5420_vm5, 0, %v207_v6  ;;  %v2199_v6 = vshrl.u32 %v5736_v20, 16 }
 0x18a   :  { %v1204_v14 = vpop.permute.xlu1 %1203  ;;  %209 = vst [vmem:[#allocation3 + $0x58] sm:$0x1] %v208_v26 }
 0x18b   :  { %v1485_v5 = vsel %vm1457_vm14, %v1452_v30, %v1204_v14  ;;  %v1982_v30 = vld [vmem:[#allocation3 + $0x8] sm:$0xf] }
 0x18c   :  { %v1206_v0 = vpop.permute.xlu0 %1205 }
 0x18d   :  { %v1487_v56 = vsel %vm1457_vm14, %v1454_v60, %v1206_v0  ;;  %v210_v60 = vld [vmem:[#allocation3 + $0x60] sm:$0x1] }
 0x18e   :  { %v1208_v18 = vpop.permute.xlu1 %1207 }
 0x18f   :  { %v1489_v4 = vsel %vm1457_vm14, %v1456_v51, %v1208_v18 }
 0x190   :  { %v1236_v46 = vpop.permute.xlu0 %1235 }
 0x191   :  { %v1516_v13 = vsel %vm1490_vm15, %v1483_v15, %v1236_v46  ;;  %v1985_v15 = vld [vmem:[#allocation3 + $0xc] sm:$0x1] }
 0x192   :  { %v1238_v54 = vpop.permute.xlu1 %1237 }
 0x193   :  { %v1518_v55 = vsel %vm1490_vm15, %v1485_v5, %v1238_v54  ;;  %v277_v5 = vld [vmem:[#allocation3 + $0x74] sm:$0x1] }
 0x194   :  { %v3761_v45 = vcombine.low %v1516_v13, %v1518_v55  ;;  %v1240_v2 = vpop.permute.xlu0 %1239 }
 0x195   :  { %v1520_v36 = vsel %vm1490_vm15, %v1487_v56, %v1240_v2  ;;  %v2003_v2 = vld [vmem:[#allocation3 + $0x24] sm:$0x1] }
 0x196   :  { %v1242_v25 = vpop.permute.xlu1 %1241  ;;  %4257 = vmatprep.mubr.msk.bf16.mxu0 %vm1583_vm0, %v3761_v45 }
 0x197   :  { %v1522_v19 = vsel %vm1490_vm15, %v1489_v4, %v1242_v25  ;;  %v278_v4 = vsel %vm5409_vm3, 0, %v277_v5 }
 0x198   :  { %v3762_v57 = vcombine.low %v1520_v36, %v1522_v19  ;;  %279 = vst [vmem:[#allocation3 + $0x74] sm:$0x1] %v278_v4 }
 0x19a   :  { %4258 = vmatmul.mubr.msk.bf16.gmra.mrb[12].mxu0 %vm1583_vm0, %v3762_v57  ;;  %v211_v57 = vsel %vm5420_vm5, 0, %v210_v60 }
 0x19b   :  { %212 = vst [vmem:[#allocation3 + $0x60] sm:$0x1] %v211_v57 }
 0x1ad   :  { %v4247_v40 = vpop.f32.mrb[0].mxu0 }
 0x1ae   :  { %v1718_v31 = vmul.f32 %v4247_v40, %v5718_v33  ;;  %v1646_v28 = vpop.f32.mrb[1].mxu0 }
 0x1af   :  { %v1716_v63 = vmul.f32 %v5718_v33, %v1646_v28  ;;  %v4248_v24 = vpop.f32.mrb[2].mxu0  ;;  %v1991_v28 = vld [vmem:[#allocation3 + $0x14] sm:$0x1] }
 0x1b0   :  { %v1741_v61 = vadd.f32 %v5723_v38, %v1718_v31  ;;  %v1719_v37 = vmul.f32 %v4248_v24, %v5718_v33  ;;  %v1649_v48 = vpop.f32.mrb[3].mxu0  ;;  %v1988_v31 = vld [vmem:[#allocation3 + $0x10] sm:$0xf] }
 0x1b1   :  { %v1739_v32 = vadd.f32 %v5723_v38, %v1716_v63  ;;  %v1717_v39 = vmul.f32 %v5718_v33, %v1649_v48 }
 0x1b2   :  { %v1757_v8 = vmax.f32 %v1741_v61, 0.0  ;;  %v1742_v14 = vadd.f32 %v5723_v38, %v1719_v37 }
 0x1b3   :  { %v1755_v35 = vmax.f32 %v1739_v32, 0.0  ;;  %v1740_v53 = vadd.f32 %v5723_v38, %v1717_v39  ;;  %v272_v39 = vsel %vm5409_vm3, 0, %v271_v52 }
 0x1b4   :  { %v3942_v11 = vpack.c.bf16 %v1757_v8, %v1757_v8  ;;  %v1758_v12 = vmax.f32 %v1742_v14, 0.0  ;;  %273 = vst [vmem:[#allocation3 + $0x64] sm:$0x1] %v272_v39  ;;  %v225_v39 = vld [vmem:[#allocation3 + $0x88] sm:$0x1] }
 0x1b5   :  { %v3940_v44 = vpack.c.bf16 %v1755_v35, %v1755_v35  ;;  %v1756_v0 = vmax.f32 %v1740_v53, 0.0  ;;  %v204_v35 = vld [vmem:[#allocation3 + $0x50] sm:$0x1]  ;;  %v265_v53 = vld [vmem:[#allocation3 + $0x54] sm:$0x1] }
 0x1b6   :  { %v1836_v59 = vshrl.u32 %v3942_v11, 16  ;;  %v1839_v17 = vshll.u32 %v3942_v11, 16  ;;  %v3943_v18 = vpack.c.bf16 %v1758_v12, %v1758_v12  ;;  %v205_v41 = vsel %vm5420_vm5, 0, %v204_v35 }
 0x1b7   :  { %v1820_v3 = vshrl.u32 %v3940_v44, 16  ;;  %v1823_v43 = vshll.u32 %v3940_v44, 16  ;;  %v3941_v42 = vpack.c.bf16 %v1756_v0, %v1756_v0  ;;  %v266_v11 = vsel %vm5409_vm3, 0, %v265_v53  ;;  %206 = vst [vmem:[#allocation3 + $0x50] sm:$0x1] %v205_v41  ;;  %v4416_v53 = vld [vmem:[%s6470_s4 + $0x108] sm:$0xff]  }
 0x1b8   :  { %v1838_v29 = vrot.slane %v1836_v59, 7  ;;  %v1844_v46 = vshrl.u32 %v3943_v18, 16  ;;  %v1847_v27 = vshll.u32 %v3943_v18, 16  ;;  %v2201_v12 = vshll.u32 %v5736_v20, 16  ;;  %267 = vst [vmem:[#allocation3 + $0x54] sm:$0x1] %v266_v11 }
 0x1b9   :  { %v1822_v54 = vrot.slane %v1820_v3, 7  ;;  %v1828_v23 = vshrl.u32 %v3941_v42, 16  ;;  %v1831_v55 = vshll.u32 %v3941_v42, 16 }
 0x1ba   :  { %v1841_v45 = vor.u32 %v1839_v17, %v1838_v29  ;;  %v1842_v51 = vrot.slane %v1838_v29, 4  ;;  %v1846_v56 = vrot.slane %v1844_v46, 7  ;;  %v2203_v21 = vrot.slane %v2201_v12, 1 }
 0x1bb   :  { %v1825_v36 = vor.u32 %v1823_v43, %v1822_v54  ;;  %v1826_v25 = vrot.slane %v1822_v54, 4  ;;  %v1830_v19 = vrot.slane %v1828_v23, 7 }
 0x1bc   :  { %v1995_v10 = vsel %vm5744_vm6, %v1841_v45, %v1994_v49  ;;  %v1998_v7 = vsel %vm5420_vm5, %v1842_v51, %v1997_v62  ;;  %v1849_v9 = vor.u32 %v1847_v27, %v1846_v56  ;;  %v1850_v40 = vrot.slane %v1846_v56, 4 }
 0x1bd   :  { %1996 = vst [vmem:[#allocation3 + $0x18] sm:$0xf] %v1995_v10  ;;  %1999 = vst [vmem:[#allocation3 + $0x1c] sm:$0x1] %v1998_v7  ;;  %v1983_v63 = vsel %vm5744_vm6, %v1825_v36, %v1982_v30  ;;  %v1986_v24 = vsel %vm5420_vm5, %v1826_v25, %v1985_v15  ;;  %v1833_v61 = vor.u32 %v1831_v55, %v1830_v19  ;;  %v1834_v37 = vrot.slane %v1830_v19, 4 }
 0x1be   :  { %1984 = vst [vmem:[#allocation3 + $0x8] sm:$0xf] %v1983_v63  ;;  %1987 = vst [vmem:[#allocation3 + $0xc] sm:$0x1] %v1986_v24  ;;  %v2001_v48 = vsel %vm5744_vm6, %v1849_v9, %v2000_v47  ;;  %v2004_v32 = vsel %vm5420_vm5, %v1850_v40, %v2003_v2  ;;  %v2310_v62 = vrot.slane %v5736_v20, 1  ;;  %v2204_v22 = vor.u32 %v2203_v21, %v2199_v6 }
 0x1bf   :  { %2002 = vst [vmem:[#allocation3 + $0x20] sm:$0xf] %v2001_v48  ;;  %2005 = vst [vmem:[#allocation3 + $0x24] sm:$0x1] %v2004_v32  ;;  %v1989_v8 = vsel %vm5744_vm6, %v1833_v61, %v1988_v31  ;;  %v1992_v14 = vsel %vm5420_vm5, %v1834_v37, %v1991_v28  ;;  %v4414_v48 = vld [vmem:[%s6470_s4 + $0x100] sm:$0xff]   ;;  %v4415_v32 = vld [vmem:[%s6470_s4 + $0x148] sm:$0xff]  }
 0x1c0   :  { %1990 = vst [vmem:[#allocation3 + $0x10] sm:$0xf] %v1989_v8  ;;  %1993 = vst [vmem:[#allocation3 + $0x14] sm:$0x1] %v1992_v14  ;;  %v286_v8 = vld [vmem:[#allocation3 + $0x8c] sm:$0x1] }
 0x1c1   :  { %v226_v14 = vsel %vm5420_vm5, 0, %v225_v39  ;;  %v287_v35 = vsel %vm5409_vm3, 0, %v286_v8 }
 0x1c2   :  { %227 = vst [vmem:[#allocation3 + $0x88] sm:$0x1] %v226_v14  ;;  %288 = vst [vmem:[#allocation3 + $0x8c] sm:$0x1] %v287_v35  ;;  %v222_v14 = vld [vmem:[#allocation3 + $0x80] sm:$0x1] }
 0x1c4   :  { %v2084_v44 = vld [vmem:[#allocation3 + $0x18] sm:$0xf]  ;;  %v2085_v0 = vld [vmem:[#allocation3 + $0x1c] sm:$0x1] }
 0x1c5   :  { %v2080_v59 = vld [vmem:[#allocation3 + $0x8] sm:$0xf]  ;;  %v2081_v17 = vld [vmem:[#allocation3 + $0xc] sm:$0x1]  ;;  %v3795_v18 = vcombine.low %v2084_v44, %v2085_v0 }
 0x1c6   :  { %v3793_v49 = vcombine.low %v2080_v59, %v2081_v17  ;;  %v5779_v3 = vld [vmem:[#allocation3 + $0x20] sm:$0xf]  ;;  %v2087_v43 = vld [vmem:[#allocation3 + $0x24] sm:$0x1]  ;;  %v3812_v31 = vcombine.low %v5733_v50, %v2080_v59  ;;  %v4413_v50 = vld [vmem:[%s6470_s4 + $0x140] sm:$0xff]  }
 0x1c7   :  { %v2082_v42 = vld [vmem:[#allocation3 + $0x10] sm:$0xf]  ;;  %v2083_v26 = vld [vmem:[#allocation3 + $0x14] sm:$0x1]  ;;  %v5782_v1 = vcombine.low %v5779_v3, %v2087_v43  ;;  %v2222_v29 = vshll.u32 %v3795_v18, 16  ;;  %v3821_v27 = vcombine.low %v2084_v44, %v5779_v3  ;;  %v2313_v60 = vrot.slane %v3795_v18, 1  ;;  %4095 = vmatprep.subr.bf16.mxu1 %v4413_v50 }
 0x1c8   :  { %v3794_v30 = vcombine.low %v2082_v42, %v2083_v26  ;;  %v2311_v15 = vrot.slane %v3793_v49, 1  ;;  %v3815_v46 = vcombine.low %v2080_v59, %v2082_v42  ;;  %v2208_v5 = vshll.u32 %v3793_v49, 16 }
 0x1c9   :  { %v2224_v20 = vrot.slane %v2222_v29, 1  ;;  %v2206_v55 = vshrl.u32 %v3793_v49, 16  ;;  %v2314_v45 = vrot.slane %v5782_v1, 1  ;;  %v2220_v2 = vshrl.u32 %v3795_v18, 16 }
 0x1ca   :  { %3231 = vmatprep.mubr.bf16.mxu0 %v3815_v46  ;;  %v3814_v54 = vcombine.low %v2310_v62, %v2311_v15  ;;  %v2215_v47 = vshll.u32 %v3794_v30, 16  ;;  %v2312_v23 = vrot.slane %v3794_v30, 1  ;;  %v2210_v58 = vrot.slane %v2208_v5, 1  ;;  %v219_v5 = vld [vmem:[#allocation3 + $0x78] sm:$0x1] }
 0x1cb   :  { %v2213_v51 = vshrl.u32 %v3794_v30, 16  ;;  %v2229_v4 = vshll.u32 %v5782_v1, 16  ;;  %v5793_v19 = vcombine.low %v2313_v60, %v2314_v45  ;;  %v5797_v52 = vor.u32 %v2224_v20, %v2220_v2  ;;  %v2021_v20 = vld [vmem:[#allocation3 + $0x3c] sm:$0x1]  ;;  %v2006_v2 = vld [vmem:[#allocation3 + $0x28] sm:$0xf] }
 0x1cc   :  { %3232 = vmatmul.mubr.bf16.vlgmr.msra.gmra.mrb[16].mxu0 %v3814_v54  ;;  %v2217_v56 = vrot.slane %v2215_v47, 1  ;;  %v5787_v36 = vor.u32 %v2210_v58, %v2206_v55  ;;  %v5789_v25 = vcombine.low %v2311_v15, %v2312_v23  ;;  %v2227_v10 = vshrl.u32 %v5782_v1, 16  ;;  %v280_v54 = vld [vmem:[#allocation3 + $0x7c] sm:$0x1]  ;;  %v2018_v47 = vld [vmem:[#allocation3 + $0x38] sm:$0xf] }
 0x1cd   :  { %3239 = vmatprep.mubr.bf16.mxu0 %v3821_v27  ;;  %v2231_v7 = vrot.slane %v2229_v4, 1  ;;  %v5810_v24 = vcombine.low %v2312_v23, %v2313_v60  ;;  %v5816_v37 = vcombine.low %v2082_v42, %v2084_v44  ;;  %v220_v60 = vsel %vm5420_vm5, 0, %v219_v5  ;;  %v2009_v4 = vld [vmem:[#allocation3 + $0x2c] sm:$0x1] }
 0x1ce   :  { %v5795_v57 = vor.u32 %v2217_v56, %v2213_v51  ;;  %v3813_v9 = vcombine.low %v2204_v22, %v5787_v36  ;;  %v228_v51 = vld [vmem:[#allocation3 + $0x90] sm:$0x1]  ;;  %221 = vst [vmem:[#allocation3 + $0x78] sm:$0x1] %v220_v60  ;;  %v4422_v60 = vld [vmem:[%s6470_s4 + $0x1c8] sm:$0xff]  }
 0x1cf   :  { %v5808_v63 = vor.u32 %v2231_v7, %v2227_v10  ;;  %v229_v8 = vsel %vm5420_vm5, 0, %v228_v51  ;;  %v4424_v51 = vld [vmem:[%s6470_s4 + $0x188] sm:$0xff]  }
 0x1d0   :  { %v3816_v40 = vcombine.low %v5787_v36, %v5795_v57  ;;  %v5806_v28 = vcombine.low %v5795_v57, %v5797_v52  ;;  %3134 = vmatprep.mubr.bf16.mxu1 %v3813_v9  ;;  %v281_v9 = vsel %vm5409_vm3, 0, %v280_v54  ;;  %230 = vst [vmem:[#allocation3 + $0x90] sm:$0x1] %v229_v8  ;;  %v4420_v54 = vld [vmem:[%s6470_s4 + $0x180] sm:$0xff]  }
 0x1d1   :  { %3135 = vmatmul.mubr.bf16.vlgmr.msra.gmra.mrb[0].mxu1 %v3812_v31  ;;  %v289_v31 = vld [vmem:[#allocation3 + $0x94] sm:$0x1]  ;;  %282 = vst [vmem:[#allocation3 + $0x7c] sm:$0x1] %v281_v9  ;;  %v4457_v57 = vld [vmem:[%s6470_s4 + $0x220] sm:$0xff]  }
 0x1d2   :  { %3142 = vmatprep.mubr.bf16.mxu1 %v5806_v28  ;;  %4096 = vmatpush3.bf16.msra.mxu1 %v4414_v48  ;;  %v2024_v48 = vld [vmem:[#allocation3 + $0x40] sm:$0xf] }
 0x1d3   :  { %4097 = vmatprep.subr.bf16.mxu1 %v4415_v32 }
 0x1d4   :  { %3240 = vmatmul.mubr.bf16.gmra.mrb[20].mxu0 %v5810_v24 }
 0x1d6   :  { %4098 = vmatpush3.bf16.msra.mxu1 %v4416_v53 }
 0x1d9   :  { %3143 = vmatmul.mubr.bf16.gmra.mrb[4].mxu1 %v5816_v37 }
 0x1ed   :  { %v4251_v41 = vpop.f32.mrb[4].mxu0 }
 0x1ee   :  { %v1722_v11 = vmul.f32 %v4251_v41, %v5718_v33  ;;  %v1662_v12 = vpop.f32.mrb[5].mxu0 }
 0x1ef   :  { %v1720_v44 = vmul.f32 %v5718_v33, %v1662_v12  ;;  %v4252_v0 = vpop.f32.mrb[6].mxu0  ;;  %v290_v12 = vsel %vm5409_vm3, 0, %v289_v31 }
 0x1f0   :  { %v1745_v59 = vadd.f32 %v5723_v38, %v1722_v11  ;;  %v1723_v17 = vmul.f32 %v4252_v0, %v5718_v33  ;;  %v1665_v18 = vpop.f32.mrb[7].mxu0  ;;  %v2027_v11 = vld [vmem:[#allocation3 + $0x44] sm:$0x1]  ;;  %291 = vst [vmem:[#allocation3 + $0x94] sm:$0x1] %v290_v12 }
 0x1f1   :  { %v1743_v6 = vadd.f32 %v5723_v38, %v1720_v44  ;;  %v1721_v21 = vmul.f32 %v5718_v33, %v1665_v18  ;;  %v283_v18 = vld [vmem:[#allocation3 + $0x84] sm:$0x1] }
 0x1f2   :  { %v1761_v49 = vmax.f32 %v1745_v59, 0.0  ;;  %v1746_v62 = vadd.f32 %v5723_v38, %v1723_v17  ;;  %v223_v17 = vsel %vm5420_vm5, 0, %v222_v14  ;;  %v284_v5 = vsel %vm5409_vm3, 0, %v283_v18 }
 0x1f3   :  { %v1759_v43 = vmax.f32 %v1743_v6, 0.0  ;;  %v1744_v42 = vadd.f32 %v5723_v38, %v1721_v21  ;;  %224 = vst [vmem:[#allocation3 + $0x80] sm:$0x1] %v223_v17  ;;  %285 = vst [vmem:[#allocation3 + $0x84] sm:$0x1] %v284_v5  ;;  %v4430_v17 = vld [vmem:[%s6470_s4 + $0x1d8] sm:$0xff]  }
 0x1f4   :  { %v3946_v26 = vpack.c.bf16 %v1761_v49, %v1761_v49  ;;  %v1762_v29 = vmax.f32 %v1746_v62, 0.0 }
 0x1f5   :  { %v3944_v30 = vpack.c.bf16 %v1759_v43, %v1759_v43  ;;  %v1760_v15 = vmax.f32 %v1744_v42, 0.0  ;;  %v2012_v43 = vld [vmem:[#allocation3 + $0x30] sm:$0xf]  ;;  %v2015_v42 = vld [vmem:[#allocation3 + $0x34] sm:$0x1] }
 0x1f6   :  { %v1868_v46 = vshrl.u32 %v3946_v26, 16  ;;  %v1871_v27 = vshll.u32 %v3946_v26, 16  ;;  %v3947_v22 = vpack.c.bf16 %v1762_v29, %v1762_v29 }
 0x1f7   :  { %v1852_v23 = vshrl.u32 %v3944_v30, 16  ;;  %v1855_v55 = vshll.u32 %v3944_v30, 16  ;;  %v3945_v58 = vpack.c.bf16 %v1760_v15, %v1760_v15 }
 0x1f8   :  { %v1870_v56 = vrot.slane %v1868_v46, 7  ;;  %v1876_v10 = vshrl.u32 %v3947_v22, 16  ;;  %v1879_v7 = vshll.u32 %v3947_v22, 16  ;;  %v4418_v46 = vld [vmem:[%s6470_s4 + $0x1c0] sm:$0xff]  }
 0x1f9   :  { %v1854_v50 = vrot.slane %v1852_v23, 7  ;;  %v1860_v32 = vshrl.u32 %v3945_v58, 16  ;;  %v1863_v39 = vshll.u32 %v3945_v58, 16  ;;  %4159 = vmatprep.subr.bf16.mxu0 %v4418_v46  ;;  %v4417_v23 = vld [vmem:[%s6470_s4 + $0x150] sm:$0xff]   ;;  %v4421_v58 = vld [vmem:[%s6470_s4 + $0x158] sm:$0xff]  }
 0x1fa   :  { %v1873_v35 = vor.u32 %v1871_v27, %v1870_v56  ;;  %v1874_v53 = vrot.slane %v1870_v56, 4  ;;  %v1878_v41 = vrot.slane %v1876_v10, 7  ;;  %4160 = vmatpush3.bf16.msra.mxu0 %v4420_v54  ;;  %4099 = vmatprep.subr.bf16.mxu1 %v4417_v23  ;;  %v4423_v56 = vld [vmem:[%s6470_s4 + $0x118] sm:$0xff]   ;;  %v4436_v54 = vld [vmem:[%s6470_s4 + $0x1e0] sm:$0xff]   ;;  %v2063_v61 = vld [vmem:[#allocation3 + $0x84] sm:$0x1] }
 0x1fb   :  { %v1857_v44 = vor.u32 %v1855_v55, %v1854_v50  ;;  %v1858_v0 = vrot.slane %v1854_v50, 4  ;;  %v1862_v59 = vrot.slane %v1860_v32, 7  ;;  %v4419_v55 = vld [vmem:[%s6470_s4 + $0x110] sm:$0xff]   ;;  %4161 = vmatprep.subr.bf16.mxu0 %v4422_v60 }
 0x1fc   :  { %v2019_v6 = vsel %vm5744_vm6, %v1873_v35, %v2018_v47  ;;  %v2022_v21 = vsel %vm5420_vm5, %v1874_v53, %v2021_v20  ;;  %v1881_v49 = vor.u32 %v1879_v7, %v1878_v41  ;;  %v1882_v62 = vrot.slane %v1878_v41, 4  ;;  %4100 = vmatpush3.bf16.msra.mxu1 %v4419_v55  ;;  %v4425_v7 = vld [vmem:[%s6470_s4 + $0x160] sm:$0xff]  }
 0x1fd   :  { %2020 = vst [vmem:[#allocation3 + $0x38] sm:$0xf] %v2019_v6  ;;  %2023 = vst [vmem:[#allocation3 + $0x3c] sm:$0x1] %v2022_v21  ;;  %v2007_v26 = vsel %vm5744_vm6, %v1857_v44, %v2006_v2  ;;  %v2010_v29 = vsel %vm5420_vm5, %v1858_v0, %v2009_v4  ;;  %v1865_v30 = vor.u32 %v1863_v39, %v1862_v59  ;;  %v1866_v15 = vrot.slane %v1862_v59, 4  ;;  %v4426_v2 = vld [vmem:[%s6470_s4 + $0x1d0] sm:$0xff]  }
 0x1fe   :  { %2008 = vst [vmem:[#allocation3 + $0x28] sm:$0xf] %v2007_v26  ;;  %2011 = vst [vmem:[#allocation3 + $0x2c] sm:$0x1] %v2010_v29  ;;  %v2025_v27 = vsel %vm5744_vm6, %v1881_v49, %v2024_v48  ;;  %v2028_v22 = vsel %vm5420_vm5, %v1882_v62, %v2027_v11  ;;  %4101 = vmatprep.subr.bf16.mxu1 %v4421_v58  ;;  %4162 = vmatpush3.bf16.msra.mxu0 %v4424_v51  ;;  %v4428_v48 = vld [vmem:[%s6470_s4 + $0x190] sm:$0xff]   ;;  %v4427_v11 = vld [vmem:[%s6470_s4 + $0x120] sm:$0xff]  }
 0x1ff   :  { %2026 = vst [vmem:[#allocation3 + $0x40] sm:$0xf] %v2025_v27  ;;  %2029 = vst [vmem:[#allocation3 + $0x44] sm:$0x1] %v2028_v22  ;;  %v2013_v47 = vsel %vm5744_vm6, %v1865_v30, %v2012_v43  ;;  %v2016_v20 = vsel %vm5420_vm5, %v1866_v15, %v2015_v42  ;;  %4163 = vmatprep.subr.bf16.mxu0 %v4426_v2  ;;  %v4429_v59 = vld [vmem:[%s6470_s4 + $0x168] sm:$0xff]   ;;  %v4432_v49 = vld [vmem:[%s6470_s4 + $0x198] sm:$0xff]  }
 0x200   :  { %2014 = vst [vmem:[#allocation3 + $0x30] sm:$0xf] %v2013_v47  ;;  %2017 = vst [vmem:[#allocation3 + $0x34] sm:$0x1] %v2016_v20  ;;  %4102 = vmatpush3.bf16.msra.mxu1 %v4423_v56  ;;  %v231_v29 = vld [vmem:[#allocation3 + $0x98] sm:$0x1] }
 0x201   :  { %4103 = vmatprep.subr.bf16.mxu1 %v4425_v7  ;;  %v4431_v27 = vld [vmem:[%s6470_s4 + $0x128] sm:$0xff]   ;;  %v4440_v55 = vld [vmem:[%s6470_s4 + $0x1a0] sm:$0xff]   ;;  %v232_v51 = vsel %vm5420_vm5, 0, %v231_v29 }
 0x202   :  { %4164 = vmatpush3.bf16.msra.mxu0 %v4428_v48  ;;  %233 = vst [vmem:[#allocation3 + $0x98] sm:$0x1] %v232_v51 }
 0x203   :  { %4165 = vmatprep.subr.bf16.mxu0 %v4430_v17 }
 0x204   :  { %v5898_v4 = vld [vmem:[#allocation3 + $0x38] sm:$0xf]  ;;  %v2093_v10 = vld [vmem:[#allocation3 + $0x3c] sm:$0x1]  ;;  %4104 = vmatpush3.bf16.msra.mxu1 %v4427_v11  ;;  %v4444_v11 = vld [vmem:[%s6470_s4 + $0x1a8] sm:$0xff]  }
 0x205   :  { %v5903_v9 = vld [vmem:[#allocation3 + $0x28] sm:$0xf]  ;;  %v2089_v31 = vld [vmem:[#allocation3 + $0x2c] sm:$0x1]  ;;  %v5906_v50 = vcombine.low %v5898_v4, %v2093_v10  ;;  %4105 = vmatprep.subr.bf16.mxu1 %v4429_v59  ;;  %v4448_v59 = vld [vmem:[%s6470_s4 + $0x1f8] sm:$0xff]  }
 0x206   :  { %v3797_v32 = vcombine.low %v5903_v9, %v2089_v31  ;;  %v5912_v39 = vld [vmem:[#allocation3 + $0x40] sm:$0xf]  ;;  %v2095_v8 = vld [vmem:[#allocation3 + $0x44] sm:$0x1]  ;;  %4166 = vmatpush3.bf16.msra.mxu0 %v4432_v49  ;;  %v5980_v48 = vcombine.low %v5779_v3, %v5903_v9 }
 0x207   :  { %v5914_v14 = vld [vmem:[#allocation3 + $0x30] sm:$0xf]  ;;  %v2091_v35 = vld [vmem:[#allocation3 + $0x34] sm:$0x1]  ;;  %v5917_v53 = vcombine.low %v5912_v39, %v2095_v8  ;;  %v2250_v41 = vshll.u32 %v5906_v50, 16  ;;  %v2248_v21 = vshrl.u32 %v5906_v50, 16  ;;  %v3833_v30 = vcombine.low %v5898_v4, %v5912_v39  ;;  %4167 = vmatprep.subr.bf16.mxu0 %v4436_v54 }
 0x208   :  { %v3798_v12 = vcombine.low %v5914_v14, %v2091_v35  ;;  %v3827_v44 = vcombine.low %v5903_v9, %v5914_v14  ;;  %v2315_v0 = vrot.slane %v3797_v32, 1  ;;  %v2234_v18 = vshrl.u32 %v3797_v32, 16  ;;  %4106 = vmatpush3.bf16.msra.mxu1 %v4431_v27  ;;  %v4441_v8 = vld [vmem:[%s6470_s4 + $0x170] sm:$0xff]   ;;  %v4442_v35 = vld [vmem:[%s6470_s4 + $0x1e8] sm:$0xff]  }
 0x209   :  { %v2236_v6 = vshll.u32 %v3797_v32, 16  ;;  %v2252_v42 = vrot.slane %v2250_v41, 1  ;;  %v2317_v46 = vrot.slane %v5906_v50, 1  ;;  %v2339_v1 = vshll.u32 %v5917_v53, 16  ;;  %v4443_v41 = vld [vmem:[%s6470_s4 + $0x130] sm:$0xff]   ;;  %4107 = vmatprep.subr.bf16.mxu1 %v4441_v8 }
 0x20a   :  { %3247 = vmatprep.mubr.bf16.mxu0 %v3827_v44  ;;  %v5938_v62 = vcombine.low %v2314_v45, %v2315_v0  ;;  %v2243_v43 = vshll.u32 %v3798_v12, 16  ;;  %v2316_v26 = vrot.slane %v3798_v12, 1  ;;  %v292_v45 = vld [vmem:[#allocation3 + $0x9c] sm:$0x1]  ;;  %v2241_v22 = vshrl.u32 %v3798_v12, 16  ;;  %4168 = vmatpush3.bf16.msra.mxu0 %v4440_v55  ;;  %v4445_v12 = vld [vmem:[%s6470_s4 + $0x1f0] sm:$0xff]  }
 0x20b   :  { %v2238_v15 = vrot.slane %v2236_v6, 1  ;;  %v6476_v20 = vrot.slane %v5917_v53, 1  ;;  %v2337_v58 = vshrl.u32 %v5917_v53, 16  ;;  %v2341_v60 = vrot.slane %v2339_v1, 1  ;;  %4169 = vmatprep.subr.bf16.mxu0 %v4442_v35  ;;  %v4446_v44 = vld [vmem:[%s6470_s4 + $0x1b0] sm:$0xff]   ;;  %v4451_v6 = vld [vmem:[%s6470_s4 + $0x1b8] sm:$0xff]  }
 0x20c   :  { %3248 = vmatmul.mubr.bf16.gmra.mrb[24].mxu0 %v5938_v62  ;;  %v2245_v5 = vrot.slane %v2243_v43, 1  ;;  %v5951_v47 = vcombine.low %v2315_v0, %v2316_v26  ;;  %v5964_v2 = vor.u32 %v2252_v42, %v2248_v21  ;;  %v293_v7 = vsel %vm5409_vm3, 0, %v292_v45  ;;  %4108 = vmatpush3.bf16.msra.mxu1 %v4443_v41  ;;  %v4447_v0 = vld [vmem:[%s6470_s4 + $0x178] sm:$0xff]   ;;  %v6034_v21 = vld [vmem:[%s6470_s4 + $0x200] sm:$0xff]   ;;  %v2045_v8 = vld [vmem:[#allocation3 + $0x6c] sm:$0x1] }
 0x20d   :  { %3255 = vmatprep.mubr.bf16.mxu0 %v3833_v30  ;;  %v5954_v23 = vor.u32 %v2238_v15, %v2234_v18  ;;  %v5968_v10 = vcombine.low %v2317_v46, %v6476_v20  ;;  %v5976_v50 = vor.u32 %v2341_v60, %v2337_v58  ;;  %294 = vst [vmem:[#allocation3 + $0x9c] sm:$0x1] %v293_v7  ;;  %v4450_v18 = vld [vmem:[%s6470_s4 + $0x138] sm:$0xff]   ;;  %v2042_v7 = vld [vmem:[#allocation3 + $0x68] sm:$0xf] }
 0x20e   :  { %v5962_v56 = vor.u32 %v2245_v5, %v2241_v22  ;;  %v5998_v9 = vcombine.low %v2316_v26, %v2317_v46  ;;  %4170 = vmatpush3.bf16.msra.mxu0 %v4444_v11  ;;  %4109 = vmatprep.subr.bf16.mxu1 %v4447_v0  ;;  %v6022_v17 = vcombine.low %v5914_v14, %v5898_v4  ;;  %v2033_v0 = vld [vmem:[#allocation3 + $0x5c] sm:$0x1] }
 0x20f   :  { %v5974_v31 = vcombine.low %v5808_v63, %v5954_v23  ;;  %4171 = vmatprep.subr.bf16.mxu0 %v4445_v12 }
 0x210   :  { %v5984_v32 = vcombine.low %v5962_v56, %v5964_v2  ;;  %4110 = vmatpush3.bf16.msra.mxu1 %v4450_v18 }
 0x211   :  { %3150 = vmatprep.mubr.bf16.mxu1 %v5974_v31  ;;  %4293 = vmatprep.subr.bf16.mxu1 %v6034_v21 }
 0x212   :  { %3151 = vmatmul.mubr.bf16.gmra.mrb[8].mxu1 %v5980_v48  ;;  %4172 = vmatpush3.bf16.msra.mxu0 %v4446_v44  ;;  %v2030_v44 = vld [vmem:[#allocation3 + $0x58] sm:$0xf] }
 0x213   :  { %3158 = vmatprep.mubr.bf16.mxu1 %v5984_v32  ;;  %4173 = vmatprep.subr.bf16.mxu0 %v4448_v59 }
 0x214   :  { %3256 = vmatmul.mubr.bf16.gmra.mrb[28].mxu0 %v5998_v9 }
 0x216   :  { %4174 = vmatpush3.bf16.msra.mxu0 %v4451_v6 }
 0x217   :  { %4261 = vmatprep.subr.bf16.mxu0 %v6034_v21 }
 0x21a   :  { %3159 = vmatmul.mubr.bf16.gmra.mrb[12].mxu1 %v6022_v17 }
 0x22d   :  { %v4255_v4 = vpop.f32.mrb[8].mxu0 }
 0x22e   :  { %v1726_v14 = vmul.f32 %v4255_v4, %v5718_v33  ;;  %v1678_v49 = vpop.f32.mrb[9].mxu0  ;;  %v2048_v4 = vld [vmem:[#allocation3 + $0x70] sm:$0xf] }
 0x22f   :  { %v1724_v43 = vmul.f32 %v5718_v33, %v1678_v49  ;;  %v4256_v42 = vpop.f32.mrb[10].mxu0 }
 0x230   :  { %v1749_v26 = vadd.f32 %v5723_v38, %v1726_v14  ;;  %v1727_v29 = vmul.f32 %v4256_v42, %v5718_v33  ;;  %v1681_v30 = vpop.f32.mrb[11].mxu0  ;;  %v2051_v14 = vld [vmem:[#allocation3 + $0x74] sm:$0x1] }
 0x231   :  { %v1747_v15 = vadd.f32 %v5723_v38, %v1724_v43  ;;  %v1725_v46 = vmul.f32 %v5718_v33, %v1681_v30  ;;  %v2036_v30 = vld [vmem:[#allocation3 + $0x60] sm:$0xf] }
 0x232   :  { %v1765_v27 = vmax.f32 %v1749_v26, 0.0  ;;  %v1750_v1 = vadd.f32 %v5723_v38, %v1727_v29 }
 0x233   :  { %v1763_v45 = vmax.f32 %v1747_v15, 0.0  ;;  %v1748_v22 = vadd.f32 %v5723_v38, %v1725_v46 }
 0x234   :  { %v3950_v5 = vpack.c.bf16 %v1765_v27, %v1765_v27  ;;  %v1766_v54 = vmax.f32 %v1750_v1, 0.0 }
 0x235   :  { %v3948_v55 = vpack.c.bf16 %v1763_v45, %v1763_v45  ;;  %v1764_v58 = vmax.f32 %v1748_v22, 0.0  ;;  %v2039_v45 = vld [vmem:[#allocation3 + $0x64] sm:$0x1] }
 0x236   :  { %v1900_v60 = vshrl.u32 %v3950_v5, 16  ;;  %v3951_v51 = vpack.c.bf16 %v1766_v54, %v1766_v54  ;;  %v1903_v12 = vshll.u32 %v3950_v5, 16 }
 0x237   :  { %v1884_v35 = vshrl.u32 %v3948_v55, 16  ;;  %v3949_v41 = vpack.c.bf16 %v1764_v58, %v1764_v58  ;;  %v1887_v6 = vshll.u32 %v3948_v55, 16  ;;  %v2098_v58 = vld [vmem:[#allocation3 + $0x50] sm:$0xf] }
 0x238   :  { %v1902_v11 = vrot.slane %v1900_v60, 7  ;;  %v1908_v59 = vshrl.u32 %v3951_v51, 16  ;;  %v1911_v29 = vshll.u32 %v3951_v51, 16  ;;  %v2099_v60 = vld [vmem:[#allocation3 + $0x54] sm:$0x1] }
 0x239   :  { %v1886_v18 = vrot.slane %v1884_v35, 7  ;;  %v1892_v49 = vshrl.u32 %v3949_v41, 16  ;;  %v1895_v1 = vshll.u32 %v3949_v41, 16 }
 0x23a   :  { %v1905_v43 = vor.u32 %v1903_v12, %v1902_v11  ;;  %v1906_v42 = vrot.slane %v1902_v11, 4  ;;  %v1910_v26 = vrot.slane %v1908_v59, 7  ;;  %v3800_v59 = vcombine.low %v2098_v58, %v2099_v60 }
 0x23b   :  { %v1889_v15 = vor.u32 %v1887_v6, %v1886_v18  ;;  %v1890_v46 = vrot.slane %v1886_v18, 4  ;;  %v1894_v27 = vrot.slane %v1892_v49, 7 }
 0x23c   :  { %v2043_v22 = vsel %vm5744_vm6, %v1905_v43, %v2042_v7  ;;  %v2046_v5 = vsel %vm5420_vm5, %v1906_v42, %v2045_v8  ;;  %v1913_v54 = vor.u32 %v1911_v29, %v1910_v26  ;;  %v1914_v55 = vrot.slane %v1910_v26, 4 }
 0x23d   :  { %2044 = vst [vmem:[#allocation3 + $0x68] sm:$0xf] %v2043_v22  ;;  %2047 = vst [vmem:[#allocation3 + $0x6c] sm:$0x1] %v2046_v5  ;;  %v2031_v51 = vsel %vm5744_vm6, %v1889_v15, %v2030_v44  ;;  %v2034_v35 = vsel %vm5420_vm5, %v1890_v46, %v2033_v0  ;;  %v1897_v41 = vor.u32 %v1895_v1, %v1894_v27  ;;  %v1898_v11 = vrot.slane %v1894_v27, 4 }
 0x23e   :  { %2032 = vst [vmem:[#allocation3 + $0x58] sm:$0xf] %v2031_v51  ;;  %2035 = vst [vmem:[#allocation3 + $0x5c] sm:$0x1] %v2034_v35  ;;  %v2049_v7 = vsel %vm5744_vm6, %v1913_v54, %v2048_v4  ;;  %v2052_v8 = vsel %vm5420_vm5, %v1914_v55, %v2051_v14  ;;  %v2257_v0 = vshll.u32 %v3800_v59, 16  ;;  %v2318_v14 = vrot.slane %v3800_v59, 1 }
 0x23f   :  { %2050 = vst [vmem:[#allocation3 + $0x70] sm:$0xf] %v2049_v7  ;;  %2053 = vst [vmem:[#allocation3 + $0x74] sm:$0x1] %v2052_v8  ;;  %v2037_v12 = vsel %vm5744_vm6, %v1897_v41, %v2036_v30  ;;  %v2040_v44 = vsel %vm5420_vm5, %v1898_v11, %v2039_v45  ;;  %v2255_v26 = vshrl.u32 %v3800_v59, 16 }
 0x240   :  { %2038 = vst [vmem:[#allocation3 + $0x60] sm:$0xf] %v2037_v12  ;;  %2041 = vst [vmem:[#allocation3 + $0x64] sm:$0x1] %v2040_v44  ;;  %v2259_v46 = vrot.slane %v2257_v0, 1 }
 0x242   :  { %v2260_v41 = vor.u32 %v2259_v46, %v2255_v26  ;;  %v2054_v46 = vld [vmem:[#allocation3 + $0x78] sm:$0xf] }
 0x244   :  { %v2104_v18 = vld [vmem:[#allocation3 + $0x68] sm:$0xf]  ;;  %v2105_v6 = vld [vmem:[#allocation3 + $0x6c] sm:$0x1] }
 0x245   :  { %v2100_v49 = vld [vmem:[#allocation3 + $0x58] sm:$0xf]  ;;  %v2101_v43 = vld [vmem:[#allocation3 + $0x5c] sm:$0x1]  ;;  %v6062_v4 = vcombine.low %v2104_v18, %v2105_v6 }
 0x246   :  { %v3801_v42 = vcombine.low %v2100_v49, %v2101_v43  ;;  %v6065_v22 = vld [vmem:[#allocation3 + $0x70] sm:$0xf] }
 0x247   :  { %v2102_v29 = vld [vmem:[#allocation3 + $0x60] sm:$0xf]  ;;  %v2103_v15 = vld [vmem:[#allocation3 + $0x64] sm:$0x1]  ;;  %v2278_v30 = vshll.u32 %v6062_v4, 16  ;;  %v3848_v35 = vcombine.low %v2104_v18, %v6065_v22  ;;  %v2276_v44 = vshrl.u32 %v6062_v4, 16 }
 0x248   :  { %v3802_v27 = vcombine.low %v2102_v29, %v2103_v15  ;;  %v3842_v1 = vcombine.low %v2100_v49, %v2102_v29  ;;  %v2319_v45 = vrot.slane %v3801_v42, 1  ;;  %v2264_v5 = vshll.u32 %v3801_v42, 16 }
 0x249   :  { %v2280_v60 = vrot.slane %v2278_v30, 1  ;;  %v2262_v11 = vshrl.u32 %v3801_v42, 16  ;;  %v3839_v15 = vcombine.low %v2098_v58, %v2100_v49  ;;  %v6477_v26 = vrot.slane %v6062_v4, 1 }
 0x24a   :  { %3263 = vmatprep.mubr.bf16.mxu0 %v3842_v1  ;;  %v3841_v54 = vcombine.low %v2318_v14, %v2319_v45  ;;  %v2271_v55 = vshll.u32 %v3802_v27, 16  ;;  %v2320_v51 = vrot.slane %v3802_v27, 1  ;;  %v2266_v7 = vrot.slane %v2264_v5, 1 }
 0x24b   :  { %v2269_v8 = vshrl.u32 %v3802_v27, 16  ;;  %v6075_v43 = vor.u32 %v2280_v60, %v2276_v44  ;;  %v6091_v58 = vcombine.low %v2102_v29, %v2104_v18 }
 0x24c   :  { %3264 = vmatmul.mubr.bf16.gmra.mrb[32].mxu0 %v3841_v54  ;;  %v2273_v12 = vrot.slane %v2271_v55, 1  ;;  %v6069_v59 = vcombine.low %v2319_v45, %v2320_v51  ;;  %v6071_v0 = vor.u32 %v2266_v7, %v2262_v11  ;;  %v6087_v30 = vcombine.low %v2320_v51, %v6477_v26 }
 0x24d   :  { %3271 = vmatprep.mubr.bf16.mxu0 %v3848_v35 }
 0x24e   :  { %v6073_v6 = vor.u32 %v2273_v12, %v2269_v8  ;;  %v3840_v14 = vcombine.low %v2260_v41, %v6071_v0 }
 0x250   :  { %v6080_v42 = vcombine.low %v6073_v6, %v6075_v43  ;;  %3166 = vmatprep.mubr.bf16.mxu1 %v3840_v14 }
 0x251   :  { %3167 = vmatmul.mubr.bf16.gmra.mrb[16].mxu1 %v3839_v15 }
 0x252   :  { %3174 = vmatprep.mubr.bf16.mxu1 %v6080_v42 }
 0x254   :  { %3272 = vmatmul.mubr.bf16.gmra.mrb[36].mxu0 %v6087_v30 }
 0x259   :  { %3175 = vmatmul.mubr.bf16.gmra.mrb[20].mxu1 %v6091_v58 }
 0x26d   :  { %v4259_v49 = vpop.f32.mrb[12].mxu0 }
 0x26e   :  { %v1730_v27 = vmul.f32 %v4259_v49, %v5718_v33  ;;  %v1694_v1 = vpop.f32.mrb[13].mxu0  ;;  %v2066_v49 = vld [vmem:[#allocation3 + $0x88] sm:$0xf] }
 0x26f   :  { %v1728_v45 = vmul.f32 %v5718_v33, %v1694_v1  ;;  %v4260_v5 = vpop.f32.mrb[14].mxu0 }
 0x270   :  { %v1753_v54 = vadd.f32 %v5723_v38, %v1730_v27  ;;  %v1731_v55 = vmul.f32 %v4260_v5, %v5718_v33  ;;  %v1697_v60 = vpop.f32.mrb[15].mxu0  ;;  %v2069_v27 = vld [vmem:[#allocation3 + $0x8c] sm:$0x1] }
 0x271   :  { %v1751_v51 = vadd.f32 %v5723_v38, %v1728_v45  ;;  %v1729_v35 = vmul.f32 %v5718_v33, %v1697_v60 }
 0x272   :  { %v1769_v18 = vmax.f32 %v1753_v54, 0.0  ;;  %v1754_v29 = vadd.f32 %v5723_v38, %v1731_v55  ;;  %v2057_v55 = vld [vmem:[#allocation3 + $0x7c] sm:$0x1] }
 0x273   :  { %v1767_v41 = vmax.f32 %v1751_v51, 0.0  ;;  %v1752_v11 = vadd.f32 %v5723_v38, %v1729_v35 }
 0x274   :  { %v3954_v7 = vpack.c.bf16 %v1769_v18, %v1769_v18  ;;  %v1770_v8 = vmax.f32 %v1754_v29, 0.0  ;;  %v2072_v29 = vld [vmem:[#allocation3 + $0x90] sm:$0xf] }
 0x275   :  { %v3952_v12 = vpack.c.bf16 %v1767_v41, %v1767_v41  ;;  %v1768_v44 = vmax.f32 %v1752_v11, 0.0 }
 0x276   :  { %v1932_v14 = vshrl.u32 %v3954_v7, 16  ;;  %v3955_v15 = vpack.c.bf16 %v1770_v8, %v1770_v8  ;;  %v1935_v45 = vshll.u32 %v3954_v7, 16  ;;  %v2075_v8 = vld [vmem:[#allocation3 + $0x94] sm:$0x1] }
 0x277   :  { %v1916_v1 = vshrl.u32 %v3952_v12, 16  ;;  %v3953_v5 = vpack.c.bf16 %v1768_v44, %v1768_v44  ;;  %v1919_v60 = vshll.u32 %v3952_v12, 16 }
 0x278   :  { %v1934_v20 = vrot.slane %v1932_v14, 7  ;;  %v1940_v33 = vshrl.u32 %v3955_v15, 16  ;;  %v1943_v18 = vshll.u32 %v3955_v15, 16 }
 0x279   :  { %v1918_v54 = vrot.slane %v1916_v1, 7  ;;  %v1924_v51 = vshrl.u32 %v3953_v5, 16  ;;  %v1927_v34 = vshll.u32 %v3953_v5, 16  ;;  %v2060_v1 = vld [vmem:[#allocation3 + $0x80] sm:$0xf] }
 0x27a   :  { %v1937_v26 = vor.u32 %v1935_v45, %v1934_v20  ;;  %v1938_v38 = vrot.slane %v1934_v20, 4  ;;  %v1942_v35 = vrot.slane %v1940_v33, 7  ;;  %v2107_v33 = vld [vmem:[#allocation3 + $0x74] sm:$0x1] }
 0x27b   :  { %v1921_v41 = vor.u32 %v1919_v60, %v1918_v54  ;;  %v1922_v11 = vrot.slane %v1918_v54, 4  ;;  %v1926_v3 = vrot.slane %v1924_v51, 7 }
 0x27c   :  { %v2067_v44 = vsel %vm5744_vm6, %v1937_v26, %v2066_v49  ;;  %v2070_v7 = vsel %vm5420_vm5, %v1938_v38, %v2069_v27  ;;  %v1945_v14 = vor.u32 %v1943_v18, %v1942_v35  ;;  %v1946_v12 = vrot.slane %v1942_v35, 4 }
 0x27d   :  { %2068 = vst [vmem:[#allocation3 + $0x88] sm:$0xf] %v2067_v44  ;;  %2071 = vst [vmem:[#allocation3 + $0x8c] sm:$0x1] %v2070_v7  ;;  %v2055_v20 = vsel %vm5744_vm6, %v1921_v41, %v2054_v46  ;;  %v2058_v15 = vsel %vm5420_vm5, %v1922_v11, %v2057_v55  ;;  %v1929_v45 = vor.u32 %v1927_v34, %v1926_v3  ;;  %v1930_v5 = vrot.slane %v1926_v3, 4 }
 0x27e   :  { %2056 = vst [vmem:[#allocation3 + $0x78] sm:$0xf] %v2055_v20  ;;  %2059 = vst [vmem:[#allocation3 + $0x7c] sm:$0x1] %v2058_v15  ;;  %v2073_v26 = vsel %vm5744_vm6, %v1945_v14, %v2072_v29  ;;  %v2076_v49 = vsel %vm5420_vm5, %v1946_v12, %v2075_v8  ;;  %v6119_v34 = vcombine.low %v6065_v22, %v2107_v33 }
 0x27f   :  { %2074 = vst [vmem:[#allocation3 + $0x90] sm:$0xf] %v2073_v26  ;;  %2077 = vst [vmem:[#allocation3 + $0x94] sm:$0x1] %v2076_v49  ;;  %v2061_v27 = vsel %vm5744_vm6, %v1929_v45, %v2060_v1  ;;  %v2064_v46 = vsel %vm5420_vm5, %v1930_v5, %v2063_v61 }
 0x280   :  { %2062 = vst [vmem:[#allocation3 + $0x80] sm:$0xf] %v2061_v27  ;;  %2065 = vst [vmem:[#allocation3 + $0x84] sm:$0x1] %v2064_v46  ;;  %v2285_v38 = vshll.u32 %v6119_v34, 16  ;;  %v2322_v41 = vrot.slane %v6119_v34, 1 }
 0x281   :  { %v2283_v15 = vshrl.u32 %v6119_v34, 16 }
 0x282   :  { %v2287_v44 = vrot.slane %v2285_v38, 1 }
 0x284   :  { %v2112_v3 = vld [vmem:[#allocation3 + $0x88] sm:$0xf]  ;;  %v2113_v54 = vld [vmem:[#allocation3 + $0x8c] sm:$0x1]  ;;  %v6147_v27 = vor.u32 %v2287_v44, %v2283_v15 }
 0x285   :  { %v2108_v60 = vld [vmem:[#allocation3 + $0x78] sm:$0xf]  ;;  %v2109_v55 = vld [vmem:[#allocation3 + $0x7c] sm:$0x1]  ;;  %v6121_v51 = vcombine.low %v2112_v3, %v2113_v54 }
 0x286   :  { %v6124_v35 = vcombine.low %v2108_v60, %v2109_v55  ;;  %v6131_v8 = vld [vmem:[#allocation3 + $0x90] sm:$0xf] }
 0x287   :  { %v2110_v13 = vld [vmem:[#allocation3 + $0x80] sm:$0xf]  ;;  %v2111_v18 = vld [vmem:[#allocation3 + $0x84] sm:$0x1]  ;;  %v2306_v16 = vshll.u32 %v6121_v51, 16  ;;  %v3860_v20 = vcombine.low %v2112_v3, %v6131_v8  ;;  %v2304_v49 = vshrl.u32 %v6121_v51, 16 }
 0x288   :  { %v6127_v61 = vcombine.low %v2110_v13, %v2111_v18  ;;  %v3854_v29 = vcombine.low %v2108_v60, %v2110_v13  ;;  %v2323_v11 = vrot.slane %v6124_v35, 1  ;;  %v2292_v7 = vshll.u32 %v6124_v35, 16 }
 0x289   :  { %v2308_v1 = vrot.slane %v2306_v16, 1  ;;  %v2290_v45 = vshrl.u32 %v6124_v35, 16  ;;  %v6161_v16 = vcombine.low %v6065_v22, %v2108_v60  ;;  %v6478_v44 = vrot.slane %v6121_v51, 1  ;;  %v6183_v60 = vld [vmem:[#allocation3 + $0x48] sm:$0xf] }
 0x28a   :  { %3279 = vmatprep.mubr.bf16.mxu0 %v3854_v29  ;;  %v6138_v14 = vcombine.low %v2322_v41, %v2323_v11  ;;  %v2299_v12 = vshll.u32 %v6127_v61, 16  ;;  %v2294_v5 = vrot.slane %v2292_v7, 1  ;;  %v2297_v33 = vshrl.u32 %v6127_v61, 16 }
 0x28b   :  { %v6153_v55 = vor.u32 %v2308_v1, %v2304_v49  ;;  %v2324_v38 = vrot.slane %v6127_v61, 1  ;;  %v6181_v22 = vcombine.low %v2110_v13, %v2112_v3  ;;  %v2097_v1 = vld [vmem:[#allocation3 + $0x4c] sm:$0x1]  ;;  %v6491_v7 = vcombine.low %v5797_v52, %v5808_v63 }
 0x28c   :  { %3280 = vmatmul.mubr.bf16.gmra.mrb[40].mxu0 %v6138_v14  ;;  %v2301_v26 = vrot.slane %v2299_v12, 1  ;;  %v6149_v46 = vor.u32 %v2294_v5, %v2290_v45  ;;  %v6191_v15 = vcombine.low %v6183_v60, %v2097_v1  ;;  %v4460_v63 = vld [vmem:[%s6470_s4 + $0x230] sm:$0xff]  }
 0x28d   :  { %3287 = vmatprep.mubr.bf16.mxu0 %v3860_v20  ;;  %v6176_v12 = vcombine.low %v2324_v38, %v6478_v44  ;;  %v4453_v20 = vld [vmem:[%s6470_s4 + $0x208] sm:$0xff]  }
 0x28e   :  { %v6151_v54 = vor.u32 %v2301_v26, %v2297_v33  ;;  %v6158_v18 = vcombine.low %v6147_v27, %v6149_v46  ;;  %v2365_v13 = vshll.u32 %v6191_v15, 16  ;;  %v2363_v26 = vshrl.u32 %v6191_v15, 16 }
 0x28f   :  { %v2376_v61 = vrot.slane %v6191_v15, 1 }
 0x290   :  { %v6165_v29 = vcombine.low %v6151_v54, %v6153_v55  ;;  %3182 = vmatprep.mubr.bf16.mxu1 %v6158_v18  ;;  %v2367_v49 = vrot.slane %v2365_v13, 1 }
 0x291   :  { %3183 = vmatmul.mubr.bf16.gmra.mrb[24].mxu1 %v6161_v16 }
 0x292   :  { %3190 = vmatprep.mubr.bf16.mxu1 %v6165_v29 }
 0x294   :  { %3288 = vmatmul.mubr.bf16.gmra.mrb[44].mxu0 %v6176_v12 }
 0x295   :  { %3425 = vmatprep.mubr.bf16.mxu0 %v5806_v28  ;;  %v4455_v28 = vld [vmem:[%s6470_s4 + $0x210] sm:$0xff]  }
 0x299   :  { %3191 = vmatmul.mubr.bf16.gmra.mrb[28].mxu1 %v6181_v22 }
 0x29a   :  { %3328 = vmatprep.mubr.bf16.mxu1 %v5789_v25 }
 0x29c   :  { %3426 = vmatmul.mubr.bf16.vlgmr.msra.gmra.mrb[48].mxu0 %v5816_v37 }
 0x29d   :  { %3433 = vmatprep.mubr.bf16.mxu0 %v5974_v31  ;;  %4262 = vmatpush3.bf16.msra.mxu0 %v6034_v21  ;;  %v4456_v31 = vld [vmem:[%s6470_s4 + $0x218] sm:$0xff]  }
 0x29e   :  { %4263 = vmatprep.subr.bf16.mxu0 %v4453_v20 }
 0x29f   :  { %v4047_v3 = vpop.f32.mrb[16].mxu0 }
 0x2a0   :  { %v4048_v45 = vpop.f32.mrb[17].mxu0 }
 0x2a1   :  { %v4049_v5 = vadd.f32 %v4048_v45, %v4047_v3  ;;  %v4050_v25 = vpop.f32.mrb[18].mxu0  ;;  %4264 = vmatpush3.bf16.msra.mxu0 %v4453_v20  ;;  %3329 = vmatmul.mubr.bf16.vlgmr.msra.gmra.mrb[32].mxu1 %v3816_v40 }
 0x2a2   :  { %v4051_v37 = vpop.f32.mrb[19].mxu0  ;;  %4265 = vmatprep.subr.bf16.mxu0 %v4455_v28  ;;  %4301 = vmatpush3.bf16.msra.mxu1 %v6034_v21 }
 0x2a3   :  { %v4052_v33 = vadd.f32 %v4051_v37, %v4050_v25  ;;  %3336 = vmatprep.mubr.bf16.mxu1 %v5793_v19  ;;  %4294 = vmatprep.subr.bf16.mxu1 %v4453_v20  ;;  %v2368_v19 = vor.u32 %v2367_v49, %v2363_v26 }
 0x2a4   :  { %3434 = vmatmul.mubr.bf16.gmra.mrb[52].mxu0 %v5980_v48  ;;  %v3983_v1 = vpop.f32.mrb[0].mxu1 }
 0x2a5   :  { %3441 = vmatprep.mubr.bf16.mxu0 %v5984_v32  ;;  %4266 = vmatpush3.bf16.msra.mxu0 %v4455_v28  ;;  %v3984_v36 = vpop.f32.mrb[1].mxu1 }
 0x2a6   :  { %4267 = vmatprep.subr.bf16.mxu0 %v4456_v31  ;;  %v3985_v40 = vadd.f32 %v3984_v36, %v3983_v1  ;;  %v3986_v21 = vpop.f32.mrb[2].mxu1  ;;  %4302 = vmatpush3.bf16.msra.mxu1 %v4453_v20  ;;  %v4458_v1 = vld [vmem:[%s6470_s4 + $0x228] sm:$0xff]   ;;  %v3836_v36 = vcombine.low %v5912_v39, %v6183_v60  ;;  %v2117_v39 = vld [vmem:[#allocation3 + $0x9c] sm:$0x1]  ;;  %v6493_v60 = vcombine.low %v5964_v2, %v5976_v50  ;;  %v6494_v2 = vrot.slane %v6062_v4, 1 }
 0x2a7   :  { %v4053_v3 = vpop.f32.mrb[20].mxu0  ;;  %v3987_v45 = vpop.f32.mrb[3].mxu1  ;;  %4295 = vmatprep.subr.bf16.mxu1 %v4455_v28  ;;  %v3849_v4 = vcombine.low %v6075_v43, %v6147_v27 }
 0x2a8   :  { %v4054_v13 = vpop.f32.mrb[21].mxu0  ;;  %v6214_v48 = vadd.f32 %v4049_v5, %v3985_v40  ;;  %v3988_v25 = vadd.f32 %v3987_v45, %v3986_v21  ;;  %v3837_v5 = vcombine.low %v5976_v50, %v2368_v19  ;;  %v4461_v40 = vld [vmem:[%s6470_s4 + $0x238] sm:$0xff]   ;;  %v3850_v50 = vcombine.low %v6494_v2, %v2322_v41 }
 0x2a9   :  { %v4055_v37 = vadd.f32 %v4054_v13, %v4053_v3  ;;  %v4056_v32 = vpop.f32.mrb[22].mxu0  ;;  %4268 = vmatpush3.bf16.msra.mxu0 %v4456_v31  ;;  %3337 = vmatmul.mubr.bf16.gmra.mrb[36].mxu1 %v6491_v7  ;;  %v6497_v13 = vcombine.low %v6149_v46, %v6151_v54 }
 0x2aa   :  { %v4057_v44 = vpop.f32.mrb[23].mxu0  ;;  %4269 = vmatprep.subr.bf16.mxu0 %v4457_v57  ;;  %v6222_v20 = vadd.f32 %v4052_v33, %v3988_v25  ;;  %3344 = vmatprep.mubr.bf16.mxu1 %v5951_v47 }
 0x2ab   :  { %v4058_v26 = vadd.f32 %v4057_v44, %v4056_v32  ;;  %4303 = vmatpush3.bf16.msra.mxu1 %v4455_v28 }
 0x2ac   :  { %3442 = vmatmul.mubr.bf16.gmra.mrb[56].mxu0 %v6022_v17  ;;  %4296 = vmatprep.subr.bf16.mxu1 %v4456_v31  ;;  %v3989_v49 = vpop.f32.mrb[4].mxu1  ;;  %v6492_v17 = vcombine.low %v5954_v23, %v5962_v56  ;;  %v2115_v23 = vld [vmem:[#allocation3 + $0x94] sm:$0x1]  ;;  %v2116_v56 = vld [vmem:[#allocation3 + $0x98] sm:$0xf] }
 0x2ad   :  { %3449 = vmatprep.mubr.bf16.mxu0 %v3837_v5  ;;  %4270 = vmatpush3.bf16.msra.mxu0 %v4457_v57  ;;  %v3990_v52 = vpop.f32.mrb[5].mxu1  ;;  %v3863_v43 = vcombine.low %v6131_v8, %v2116_v56 }
 0x2ae   :  { %4271 = vmatprep.subr.bf16.mxu0 %v4458_v1  ;;  %v3991_v7 = vadd.f32 %v3990_v52, %v3989_v49  ;;  %v3992_v33 = vpop.f32.mrb[6].mxu1 }
 0x2af   :  { %4304 = vmatpush3.bf16.msra.mxu1 %v4456_v31  ;;  %v3993_v44 = vpop.f32.mrb[7].mxu1  ;;  %v6248_v31 = vcombine.low %v6131_v8, %v2115_v23 }
 0x2b0   :  { %4297 = vmatprep.subr.bf16.mxu1 %v4457_v57  ;;  %v6230_v47 = vadd.f32 %v4055_v37, %v3991_v7  ;;  %v3994_v28 = vadd.f32 %v3993_v44, %v3992_v33 }
 0x2b1   :  { %4272 = vmatpush3.bf16.msra.mxu0 %v4458_v1  ;;  %3345 = vmatmul.mubr.bf16.gmra.mrb[40].mxu1 %v6492_v17  ;;  %v2351_v41 = vrot.slane %v6248_v31, 1 }
 0x2b2   :  { %4273 = vmatprep.subr.bf16.mxu0 %v4460_v63  ;;  %v6240_v21 = vadd.f32 %v4058_v26, %v3994_v28  ;;  %3352 = vmatprep.mubr.bf16.mxu1 %v5968_v10  ;;  %v6251_v10 = vcombine.low %v2116_v56, %v2117_v39 }
 0x2b3   :  { %4305 = vmatpush3.bf16.msra.mxu1 %v4457_v57 }
 0x2b4   :  { %3450 = vmatmul.mubr.bf16.gmra.mrb[60].mxu0 %v3836_v36  ;;  %4298 = vmatprep.subr.bf16.mxu1 %v4458_v1  ;;  %v2372_v57 = vshll.u32 %v6251_v10, 16 }
 0x2b5   :  { %3457 = vmatprep.mubr.bf16.mxu0 %v6080_v42  ;;  %4274 = vmatpush3.bf16.msra.mxu0 %v4460_v63  ;;  %v2346_v42 = vshll.u32 %v6248_v31, 16 }
 0x2b6   :  { %4275 = vmatprep.subr.bf16.mxu0 %v4461_v40  ;;  %v2374_v19 = vrot.slane %v2372_v57, 1 }
 0x2b7   :  { %4306 = vmatpush3.bf16.msra.mxu1 %v4458_v1  ;;  %v2348_v3 = vrot.slane %v2346_v42, 1 }
 0x2b8   :  { %4299 = vmatprep.subr.bf16.mxu1 %v4460_v63 }
 0x2b9   :  { %4276 = vmatpush3.bf16.msra.mxu0 %v4461_v40  ;;  %3353 = vmatmul.mubr.bf16.gmra.mrb[44].mxu1 %v6493_v60 }
 0x2ba   :  { %3360 = vmatprep.mubr.bf16.mxu1 %v6069_v59  ;;  %v6495_v59 = vcombine.low %v6071_v0, %v6073_v6  ;;  %v3856_v0 = vcombine.low %v2323_v11, %v2324_v38  ;;  %v6498_v11 = vrot.slane %v5917_v53, 1 }
 0x2bb   :  { %4307 = vmatpush3.bf16.msra.mxu1 %v4460_v63 }
 0x2bc   :  { %3458 = vmatmul.mubr.bf16.gmra.mrb[64].mxu0 %v6091_v58  ;;  %4300 = vmatprep.subr.bf16.mxu1 %v4461_v40  ;;  %v2370_v58 = vshrl.u32 %v6251_v10, 16  ;;  %v3838_v27 = vcombine.low %v6498_v11, %v2376_v61 }
 0x2bd   :  { %3465 = vmatprep.mubr.bf16.mxu0 %v6158_v18  ;;  %v2344_v18 = vshrl.u32 %v6248_v31, 16 }
 0x2be   :  { %v2375_v34 = vor.u32 %v2374_v19, %v2370_v58 }
 0x2bf   :  { %4308 = vmatpush3.bf16.msra.mxu1 %v4461_v40  ;;  %v2349_v45 = vor.u32 %v2348_v3, %v2344_v18 }
 0x2c1   :  { %3361 = vmatmul.mubr.bf16.gmra.mrb[48].mxu1 %v6495_v59  ;;  %v3864_v6 = vcombine.low %v2349_v45, %v2375_v34  ;;  %v3861_v35 = vcombine.low %v6153_v55, %v2349_v45 }
 0x2c2   :  { %3368 = vmatprep.mubr.bf16.mxu1 %v3850_v50 }
 0x2c4   :  { %3466 = vmatmul.mubr.bf16.gmra.mrb[68].mxu0 %v6161_v16  ;;  %v6496_v16 = vrot.slane %v6121_v51, 1 }
 0x2c5   :  { %3473 = vmatprep.mubr.bf16.mxu0 %v6165_v29 }
 0x2c6   :  { %v3862_v29 = vcombine.low %v6496_v16, %v2351_v41 }
 0x2c9   :  { %3369 = vmatmul.mubr.bf16.gmra.mrb[52].mxu1 %v3849_v4 }
 0x2ca   :  { %3376 = vmatprep.mubr.bf16.mxu1 %v3856_v0 }
 0x2cc   :  { %3474 = vmatmul.mubr.bf16.gmra.mrb[72].mxu0 %v6181_v22 }
 0x2cd   :  { %3481 = vmatprep.mubr.bf16.mxu0 %v3864_v6 }
 0x2d1   :  { %3377 = vmatmul.mubr.bf16.gmra.mrb[56].mxu1 %v6497_v13 }
 0x2d2   :  { %3384 = vmatprep.mubr.bf16.mxu1 %v3862_v29 }
 0x2d4   :  { %3482 = vmatmul.mubr.bf16.gmra.mrb[76].mxu0 %v3863_v43 }
 0x2d5   :  { %4277 = vmatprep.mubr.bf16.mxu0 %v5810_v24 }
 0x2d9   :  { %3385 = vmatmul.mubr.bf16.gmra.mrb[60].mxu1 %v3861_v35 }
 0x2da   :  { %4281 = vmatprep.mubr.bf16.mxu1 %v5998_v9 }
 0x2dc   :  { %4278 = vmatmul.mubr.bf16.vlgmr.msra.gmra.mrb[80].mxu0 %v5938_v62 }
 0x2df   :  { %v4059_v51 = vpop.f32.mrb[24].mxu0 }
 0x2e0   :  { %v4060_v46 = vpop.f32.mrb[25].mxu0 }
 0x2e1   :  { %v4061_v54 = vadd.f32 %v4060_v46, %v4059_v51  ;;  %v4062_v8 = vpop.f32.mrb[26].mxu0  ;;  %4282 = vmatmul.mubr.bf16.vlgmr.msra.gmra.mrb[64].mxu1 %v3838_v27 }
 0x2e2   :  { %v4063_v38 = vpop.f32.mrb[27].mxu0  ;;  %4285 = vmatprep.mubr.bf16.mxu1 %v6087_v30  ;;  %v2377_v30 = vrot.slane %v6251_v10, 1 }
 0x2e3   :  { %v4064_v22 = vadd.f32 %v4063_v38, %v4062_v8 }
 0x2e4   :  { %v3865_v17 = vcombine.low %v2351_v41, %v2377_v30 }
 0x2e5   :  { %v3995_v24 = vpop.f32.mrb[8].mxu1 }
 0x2e6   :  { %v3996_v55 = vpop.f32.mrb[9].mxu1 }
 0x2e7   :  { %v3997_v25 = vadd.f32 %v3996_v55, %v3995_v24  ;;  %v3998_v9 = vpop.f32.mrb[10].mxu1  ;;  %v4065_v37 = vpop.f32.mrb[28].mxu0 }
 0x2e8   :  { %v3999_v15 = vpop.f32.mrb[11].mxu1  ;;  %v4066_v32 = vpop.f32.mrb[29].mxu0 }
 0x2e9   :  { %v6290_v62 = vadd.f32 %v4061_v54, %v3997_v25  ;;  %v4000_v1 = vadd.f32 %v3999_v15, %v3998_v9  ;;  %v4067_v53 = vadd.f32 %v4066_v32, %v4065_v37  ;;  %v4068_v26 = vpop.f32.mrb[30].mxu0  ;;  %4286 = vmatmul.mubr.bf16.gmra.mrb[68].mxu1 %v6138_v14 }
 0x2ea   :  { %v4069_v5 = vpop.f32.mrb[31].mxu0  ;;  %4289 = vmatprep.mubr.bf16.mxu1 %v6176_v12 }
 0x2eb   :  { %v6293_v49 = vadd.f32 %v4064_v22, %v4000_v1  ;;  %v4070_v52 = vadd.f32 %v4069_v5, %v4068_v26 }
 0x2ed   :  { %v4001_v63 = vpop.f32.mrb[12].mxu1 }
 0x2ee   :  { %v4002_v7 = vpop.f32.mrb[13].mxu1 }
 0x2ef   :  { %v4003_v33 = vadd.f32 %v4002_v7, %v4001_v63  ;;  %v4004_v44 = vpop.f32.mrb[14].mxu1 }
 0x2f0   :  { %v4005_v28 = vpop.f32.mrb[15].mxu1 }
 0x2f1   :  { %v6297_v36 = vadd.f32 %v4067_v53, %v4003_v33  ;;  %v4006_v40 = vadd.f32 %v4005_v28, %v4004_v44  ;;  %4290 = vmatmul.mubr.bf16.gmra.mrb[72].mxu1 %v3865_v17 }
 0x2f3   :  { %v6299_v23 = vadd.f32 %v4070_v52, %v4006_v40 }
 0x31f   :  { %v4071_v14 = vpop.f32.mrb[32].mxu0 }
 0x320   :  { %v4072_v56 = vpop.f32.mrb[33].mxu0 }
 0x321   :  { %v4073_v39 = vadd.f32 %v4072_v56, %v4071_v14  ;;  %v4074_v60 = vpop.f32.mrb[34].mxu0 }
 0x322   :  { %v4075_v31 = vpop.f32.mrb[35].mxu0 }
 0x323   :  { %v4076_v12 = vadd.f32 %v4075_v31, %v4074_v60 }
 0x324   :  { %v4007_v42 = vpop.f32.mrb[16].mxu1 }
 0x325   :  { %v4008_v10 = vpop.f32.mrb[17].mxu1 }
 0x326   :  { %v4009_v57 = vadd.f32 %v4008_v10, %v4007_v42  ;;  %v4010_v2 = vpop.f32.mrb[18].mxu1 }
 0x327   :  { %v4077_v50 = vpop.f32.mrb[36].mxu0  ;;  %v4011_v59 = vpop.f32.mrb[19].mxu1 }
 0x328   :  { %v4078_v3 = vpop.f32.mrb[37].mxu0  ;;  %v6301_v58 = vadd.f32 %v4073_v39, %v4009_v57  ;;  %v4012_v19 = vadd.f32 %v4011_v59, %v4010_v2 }
 0x329   :  { %v4079_v18 = vadd.f32 %v4078_v3, %v4077_v50  ;;  %v4080_v45 = vpop.f32.mrb[38].mxu0 }
 0x32a   :  { %v4081_v34 = vpop.f32.mrb[39].mxu0  ;;  %v6303_v4 = vadd.f32 %v4076_v12, %v4012_v19 }
 0x32b   :  { %v4082_v0 = vadd.f32 %v4081_v34, %v4080_v45 }
 0x32c   :  { %v4013_v6 = vpop.f32.mrb[20].mxu1 }
 0x32d   :  { %v4014_v41 = vpop.f32.mrb[21].mxu1 }
 0x32e   :  { %v4015_v16 = vadd.f32 %v4014_v41, %v4013_v6  ;;  %v4016_v29 = vpop.f32.mrb[22].mxu1 }
 0x32f   :  { %v4017_v13 = vpop.f32.mrb[23].mxu1 }
 0x330   :  { %v6305_v43 = vadd.f32 %v4079_v18, %v4015_v16  ;;  %v4018_v35 = vadd.f32 %v4017_v13, %v4016_v29 }
 0x332   :  { %v6307_v61 = vadd.f32 %v4082_v0, %v4018_v35 }
 0x35f   :  { %v4083_v51 = vpop.f32.mrb[40].mxu0 }
 0x360   :  { %v4084_v11 = vpop.f32.mrb[41].mxu0 }
 0x361   :  { %v4085_v27 = vadd.f32 %v4084_v11, %v4083_v51  ;;  %v4086_v46 = vpop.f32.mrb[42].mxu0 }
 0x362   :  { %v4087_v54 = vpop.f32.mrb[43].mxu0 }
 0x363   :  { %v4088_v8 = vadd.f32 %v4087_v54, %v4086_v46 }
 0x364   :  { %v4019_v38 = vpop.f32.mrb[24].mxu1 }
 0x365   :  { %v4020_v22 = vpop.f32.mrb[25].mxu1 }
 0x366   :  { %v4021_v24 = vadd.f32 %v4020_v22, %v4019_v38  ;;  %v4022_v55 = vpop.f32.mrb[26].mxu1 }
 0x367   :  { %v4089_v25 = vpop.f32.mrb[44].mxu0  ;;  %v4023_v9 = vpop.f32.mrb[27].mxu1 }
 0x368   :  { %v4090_v37 = vpop.f32.mrb[45].mxu0  ;;  %v6309_v15 = vadd.f32 %v4085_v27, %v4021_v24  ;;  %v4024_v32 = vadd.f32 %v4023_v9, %v4022_v55 }
 0x369   :  { %v4091_v1 = vadd.f32 %v4090_v37, %v4089_v25  ;;  %v4092_v53 = vpop.f32.mrb[46].mxu0 }
 0x36a   :  { %v4093_v26 = vpop.f32.mrb[47].mxu0  ;;  %v6311_v5 = vadd.f32 %v4088_v8, %v4024_v32 }
 0x36b   :  { %v4094_v52 = vadd.f32 %v4093_v26, %v4092_v53 }
 0x36c   :  { %v4025_v30 = vpop.f32.mrb[28].mxu1 }
 0x36d   :  { %v4026_v63 = vpop.f32.mrb[29].mxu1 }
 0x36e   :  { %v4027_v7 = vadd.f32 %v4026_v63, %v4025_v30  ;;  %v4028_v33 = vpop.f32.mrb[30].mxu1 }
 0x36f   :  { %v4175_v44 = vpop.f32.mrb[48].mxu0  ;;  %v4029_v28 = vpop.f32.mrb[31].mxu1 }
 0x370   :  { %v4176_v17 = vpop.f32.mrb[49].mxu0  ;;  %v6313_v40 = vadd.f32 %v4091_v1, %v4027_v7  ;;  %v4030_v14 = vadd.f32 %v4029_v28, %v4028_v33 }
 0x371   :  { %v4177_v56 = vadd.f32 %v4176_v17, %v4175_v44  ;;  %v4178_v39 = vpop.f32.mrb[50].mxu0 }
 0x372   :  { %v4179_v60 = vpop.f32.mrb[51].mxu0  ;;  %v6315_v31 = vadd.f32 %v4094_v52, %v4030_v14 }
 0x373   :  { %v4180_v12 = vadd.f32 %v4179_v60, %v4178_v39 }
 0x374   :  { %v4111_v42 = vpop.f32.mrb[32].mxu1 }
 0x375   :  { %v4112_v10 = vpop.f32.mrb[33].mxu1 }
 0x376   :  { %v4113_v57 = vadd.f32 %v4112_v10, %v4111_v42  ;;  %v4114_v2 = vpop.f32.mrb[34].mxu1 }
 0x377   :  { %v4181_v50 = vpop.f32.mrb[52].mxu0  ;;  %v4115_v59 = vpop.f32.mrb[35].mxu1 }
 0x378   :  { %v4182_v3 = vpop.f32.mrb[53].mxu0  ;;  %v3331_v19 = vadd.f32 %v4113_v57, %v6214_v48  ;;  %v4116_v18 = vadd.f32 %v4115_v59, %v4114_v2 }
 0x379   :  { %v4183_v45 = vadd.f32 %v4182_v3, %v4181_v50  ;;  %v4184_v34 = vpop.f32.mrb[54].mxu0 }
 0x37a   :  { %v4185_v0 = vpop.f32.mrb[55].mxu0  ;;  %v3334_v6 = vadd.f32 %v4116_v18, %v6222_v20  ;;  %v6319_v16 = vadd.f32 %v4177_v56, %v3331_v19 }
 0x37b   :  { %v4186_v41 = vadd.f32 %v4185_v0, %v4184_v34 }
 0x37c   :  { %v4117_v29 = vpop.f32.mrb[36].mxu1  ;;  %v6321_v13 = vadd.f32 %v4180_v12, %v3334_v6 }
 0x37d   :  { %v4118_v35 = vpop.f32.mrb[37].mxu1 }
 0x37e   :  { %v4119_v51 = vadd.f32 %v4118_v35, %v4117_v29  ;;  %v4120_v11 = vpop.f32.mrb[38].mxu1 }
 0x37f   :  { %v4187_v27 = vpop.f32.mrb[56].mxu0  ;;  %v4121_v46 = vpop.f32.mrb[39].mxu1 }
 0x380   :  { %v4188_v54 = vpop.f32.mrb[57].mxu0  ;;  %v3339_v48 = vadd.f32 %v4119_v51, %v6230_v47  ;;  %v4122_v8 = vadd.f32 %v4121_v46, %v4120_v11 }
 0x381   :  { %v4189_v38 = vadd.f32 %v4188_v54, %v4187_v27  ;;  %v4190_v22 = vpop.f32.mrb[58].mxu0 }
 0x382   :  { %v4191_v24 = vpop.f32.mrb[59].mxu0  ;;  %v3342_v20 = vadd.f32 %v4122_v8, %v6240_v21  ;;  %v6325_v25 = vadd.f32 %v4183_v45, %v3339_v48 }
 0x383   :  { %v4192_v55 = vadd.f32 %v4191_v24, %v4190_v22 }
 0x384   :  { %v4123_v9 = vpop.f32.mrb[40].mxu1  ;;  %v6327_v37 = vadd.f32 %v4186_v41, %v3342_v20 }
 0x385   :  { %v4124_v32 = vpop.f32.mrb[41].mxu1 }
 0x386   :  { %v4125_v1 = vadd.f32 %v4124_v32, %v4123_v9  ;;  %v4126_v53 = vpop.f32.mrb[42].mxu1 }
 0x387   :  { %v4193_v26 = vpop.f32.mrb[60].mxu0  ;;  %v4127_v52 = vpop.f32.mrb[43].mxu1 }
 0x388   :  { %v4194_v30 = vpop.f32.mrb[61].mxu0  ;;  %v3347_v47 = vadd.f32 %v4125_v1, %v6290_v62  ;;  %v4128_v63 = vadd.f32 %v4127_v52, %v4126_v53 }
 0x389   :  { %v4195_v7 = vadd.f32 %v4194_v30, %v4193_v26  ;;  %v4196_v33 = vpop.f32.mrb[62].mxu0 }
 0x38a   :  { %v4197_v44 = vpop.f32.mrb[63].mxu0  ;;  %v3350_v21 = vadd.f32 %v4128_v63, %v6293_v49  ;;  %v6331_v17 = vadd.f32 %v4189_v38, %v3347_v47 }
 0x38b   :  { %v4198_v28 = vadd.f32 %v4197_v44, %v4196_v33 }
 0x38c   :  { %v4129_v14 = vpop.f32.mrb[44].mxu1  ;;  %v6333_v56 = vadd.f32 %v4192_v55, %v3350_v21 }
 0x38d   :  { %v4130_v39 = vpop.f32.mrb[45].mxu1 }
 0x38e   :  { %v4131_v60 = vadd.f32 %v4130_v39, %v4129_v14  ;;  %v4132_v12 = vpop.f32.mrb[46].mxu1 }
 0x38f   :  { %v4199_v42 = vpop.f32.mrb[64].mxu0  ;;  %v4133_v10 = vpop.f32.mrb[47].mxu1 }
 0x390   :  { %v4200_v57 = vpop.f32.mrb[65].mxu0  ;;  %v3355_v62 = vadd.f32 %v4131_v60, %v6297_v36  ;;  %v4134_v2 = vadd.f32 %v4133_v10, %v4132_v12 }
 0x391   :  { %v4201_v50 = vadd.f32 %v4200_v57, %v4199_v42  ;;  %v4202_v59 = vpop.f32.mrb[66].mxu0 }
 0x392   :  { %v4203_v3 = vpop.f32.mrb[67].mxu0  ;;  %v3358_v49 = vadd.f32 %v4134_v2, %v6299_v23  ;;  %v6337_v18 = vadd.f32 %v4195_v7, %v3355_v62 }
 0x393   :  { %v4204_v19 = vadd.f32 %v4203_v3, %v4202_v59 }
 0x394   :  { %v4135_v45 = vpop.f32.mrb[48].mxu1  ;;  %v6339_v34 = vadd.f32 %v4198_v28, %v3358_v49 }
 0x395   :  { %v4136_v0 = vpop.f32.mrb[49].mxu1 }
 0x396   :  { %v4137_v6 = vadd.f32 %v4136_v0, %v4135_v45  ;;  %v4138_v41 = vpop.f32.mrb[50].mxu1 }
 0x397   :  { %v4205_v29 = vpop.f32.mrb[68].mxu0  ;;  %v4139_v35 = vpop.f32.mrb[51].mxu1 }
 0x398   :  { %v4206_v51 = vpop.f32.mrb[69].mxu0  ;;  %v3363_v36 = vadd.f32 %v4137_v6, %v6301_v58  ;;  %v4140_v11 = vadd.f32 %v4139_v35, %v4138_v41  ;;  %v6369_v35 = vld [vmem:[%s6474_s6] ss:$0 sm:$0xff] }
 0x399   :  { %v4207_v27 = vadd.f32 %v4206_v51, %v4205_v29  ;;  %v4208_v46 = vpop.f32.mrb[70].mxu0 }
 0x39a   :  { %v4209_v54 = vpop.f32.mrb[71].mxu0  ;;  %v3366_v23 = vadd.f32 %v4140_v11, %v6303_v4  ;;  %v6343_v8 = vadd.f32 %v4201_v50, %v3363_v36 }
 0x39b   :  { %v4210_v48 = vadd.f32 %v4209_v54, %v4208_v46 }
 0x39c   :  { %v4141_v38 = vpop.f32.mrb[52].mxu1  ;;  %v6345_v22 = vadd.f32 %v4204_v19, %v3366_v23 }
 0x39d   :  { %v4142_v24 = vpop.f32.mrb[53].mxu1 }
 0x39e   :  { %v4143_v20 = vadd.f32 %v4142_v24, %v4141_v38  ;;  %v4144_v55 = vpop.f32.mrb[54].mxu1 }
 0x39f   :  { %v4211_v9 = vpop.f32.mrb[72].mxu0  ;;  %v4145_v32 = vpop.f32.mrb[55].mxu1 }
 0x3a0   :  { %v4212_v1 = vpop.f32.mrb[73].mxu0  ;;  %v3371_v58 = vadd.f32 %v4143_v20, %v6305_v43  ;;  %v4146_v53 = vadd.f32 %v4145_v32, %v4144_v55 }
 0x3a1   :  { %v4213_v26 = vadd.f32 %v4212_v1, %v4211_v9  ;;  %v4214_v52 = vpop.f32.mrb[74].mxu0 }
 0x3a2   :  { %v4215_v30 = vpop.f32.mrb[75].mxu0  ;;  %v3374_v4 = vadd.f32 %v4146_v53, %v6307_v61  ;;  %v6349_v63 = vadd.f32 %v4207_v27, %v3371_v58 }
 0x3a3   :  { %v4216_v47 = vadd.f32 %v4215_v30, %v4214_v52 }
 0x3a4   :  { %v4147_v7 = vpop.f32.mrb[56].mxu1  ;;  %v6351_v33 = vadd.f32 %v4210_v48, %v3374_v4 }
 0x3a5   :  { %v4148_v44 = vpop.f32.mrb[57].mxu1 }
 0x3a6   :  { %v4149_v21 = vadd.f32 %v4148_v44, %v4147_v7  ;;  %v4150_v28 = vpop.f32.mrb[58].mxu1 }
 0x3a7   :  { %v4217_v14 = vpop.f32.mrb[76].mxu0  ;;  %v4151_v39 = vpop.f32.mrb[59].mxu1 }
 0x3a8   :  { %v4218_v60 = vpop.f32.mrb[77].mxu0  ;;  %v3379_v43 = vadd.f32 %v4149_v21, %v6309_v15  ;;  %v4152_v12 = vadd.f32 %v4151_v39, %v4150_v28  ;;  %v6362_v15 = vld [vmem:[%s6473_s5] ss:$0 sm:$0xff] }
 0x3a9   :  { %v4219_v42 = vadd.f32 %v4218_v60, %v4217_v14  ;;  %v4220_v10 = vpop.f32.mrb[78].mxu0 }
 0x3aa   :  { %v4221_v57 = vpop.f32.mrb[79].mxu0  ;;  %v3382_v61 = vadd.f32 %v4152_v12, %v6311_v5  ;;  %v6355_v2 = vadd.f32 %v4213_v26, %v3379_v43 }
 0x3ab   :  { %v4222_v62 = vadd.f32 %v4221_v57, %v4220_v10 }
 0x3ac   :  { %v4153_v50 = vpop.f32.mrb[60].mxu1  ;;  %v6357_v59 = vadd.f32 %v4216_v47, %v3382_v61 }
 0x3ad   :  { %v4154_v3 = vpop.f32.mrb[61].mxu1 }
 0x3ae   :  { %v4155_v49 = vadd.f32 %v4154_v3, %v4153_v50  ;;  %v4156_v19 = vpop.f32.mrb[62].mxu1 }
 0x3af   :  { %v4279_v45 = vpop.f32.mrb[80].mxu0  ;;  %v4157_v0 = vpop.f32.mrb[63].mxu1 }
 0x3b0   :  { %v3533_v6 = vadd.f32 %v4279_v45, %v6325_v25  ;;  %v3524_v41 = vpop.f32.mrb[81].mxu0  ;;  %v3387_v5 = vadd.f32 %v4155_v49, %v6313_v40  ;;  %v4158_v29 = vadd.f32 %v4157_v0, %v4156_v19 }
 0x3b1   :  { %v3525_v51 = vadd.f32 %v3524_v41, %v6319_v16  ;;  %v4280_v36 = vpop.f32.mrb[82].mxu0 }
 0x3b2   :  { %v3596_v11 = vmul.f32 %v6362_v15, %v3533_v6  ;;  %v3536_v27 = vadd.f32 %v4280_v36, %v6327_v37  ;;  %v3527_v46 = vpop.f32.mrb[83].mxu0  ;;  %v3390_v54 = vadd.f32 %v4158_v29, %v6315_v31  ;;  %v3484_v23 = vadd.f32 %v4219_v42, %v3387_v5 }
 0x3b3   :  { %v3594_v25 = vmul.f32 %v6362_v15, %v3525_v51  ;;  %v3528_v40 = vadd.f32 %v3527_v46, %v6321_v13 }
 0x3b4   :  { %v3619_v48 = vadd.f32 %v6369_v35, %v3596_v11  ;;  %v3597_v38 = vmul.f32 %v6362_v15, %v3536_v27  ;;  %v4283_v20 = vpop.f32.mrb[64].mxu1  ;;  %v6381_v55 = vadd.f32 %v4222_v62, %v3390_v54 }
 0x3b5   :  { %v3617_v24 = vadd.f32 %v6369_v35, %v3594_v25  ;;  %v3595_v16 = vmul.f32 %v6362_v15, %v3528_v40  ;;  %v3549_v31 = vadd.f32 %v4283_v20, %v6337_v18  ;;  %v3540_v32 = vpop.f32.mrb[65].mxu1 }
 0x3b6   :  { %v3635_v37 = vmax.f32 %v3619_v48, 0.0  ;;  %v3620_v9 = vadd.f32 %v6369_v35, %v3597_v38  ;;  %v3541_v58 = vadd.f32 %v3540_v32, %v6331_v17  ;;  %v4284_v53 = vpop.f32.mrb[66].mxu1 }
 0x3b7   :  { %v3633_v1 = vmax.f32 %v3617_v24, 0.0  ;;  %v3618_v13 = vadd.f32 %v6369_v35, %v3595_v16  ;;  %v3600_v52 = vmul.f32 %v6362_v15, %v3549_v31  ;;  %v3552_v30 = vadd.f32 %v4284_v53, %v6339_v34  ;;  %v3543_v4 = vpop.f32.mrb[67].mxu1 }
 0x3b8   :  { %3651 = vst [vmem:[%s6475_s7 + $0x10] sm:$0xff] %v3635_v37  ;;  %v3636_v26 = vmax.f32 %v3620_v9, 0.0  ;;  %v3598_v47 = vmul.f32 %v6362_v15, %v3541_v58  ;;  %v3544_v17 = vadd.f32 %v3543_v4, %v6333_v56 }
 0x3b9   :  { %3649 = vst [vmem:[%s6475_s7] sm:$0xff] %v3633_v1  ;;  %v3634_v18 = vmax.f32 %v3618_v13, 0.0  ;;  %v3623_v7 = vadd.f32 %v6369_v35, %v3600_v52  ;;  %v3601_v44 = vmul.f32 %v6362_v15, %v3552_v30 }
 0x3ba   :  { %3652 = vst [vmem:[%s6475_s7 + $0x18] sm:$0xff] %v3636_v26  ;;  %v3621_v34 = vadd.f32 %v6369_v35, %v3598_v47  ;;  %v3599_v21 = vmul.f32 %v6362_v15, %v3544_v17 }
 0x3bb   :  { %3650 = vst [vmem:[%s6475_s7 + $0x8] sm:$0xff] %v3634_v18  ;;  %v3639_v28 = vmax.f32 %v3623_v7, 0.0  ;;  %v3624_v14 = vadd.f32 %v6369_v35, %v3601_v44 }
 0x3bc   :  { %v3637_v56 = vmax.f32 %v3621_v34, 0.0  ;;  %v3622_v39 = vadd.f32 %v6369_v35, %v3599_v21  ;;  %v4287_v60 = vpop.f32.mrb[68].mxu1 }
 0x3bd   :  { %3655 = vst [vmem:[%s6475_s7 + $0x30] sm:$0xff] %v3639_v28  ;;  %v3640_v43 = vmax.f32 %v3624_v14, 0.0  ;;  %v3565_v12 = vadd.f32 %v4287_v60, %v6349_v63  ;;  %v3556_v42 = vpop.f32.mrb[69].mxu1 }
 0x3be   :  { %3653 = vst [vmem:[%s6475_s7 + $0x20] sm:$0xff] %v3637_v56  ;;  %v3638_v10 = vmax.f32 %v3622_v39, 0.0  ;;  %v3557_v57 = vadd.f32 %v3556_v42, %v6343_v8  ;;  %v4288_v61 = vpop.f32.mrb[70].mxu1 }
 0x3bf   :  { %3656 = vst [vmem:[%s6475_s7 + $0x38] sm:$0xff] %v3640_v43  ;;  %v3604_v62 = vmul.f32 %v6362_v15, %v3565_v12  ;;  %v3568_v50 = vadd.f32 %v4288_v61, %v6351_v33  ;;  %v3559_v3 = vpop.f32.mrb[71].mxu1 }
 0x3c0   :  { %3654 = vst [vmem:[%s6475_s7 + $0x28] sm:$0xff] %v3638_v10  ;;  %v3602_v63 = vmul.f32 %v6362_v15, %v3557_v57  ;;  %v3560_v49 = vadd.f32 %v3559_v3, %v6345_v22 }
 0x3c1   :  { %v3627_v8 = vadd.f32 %v6369_v35, %v3604_v62  ;;  %v3605_v19 = vmul.f32 %v6362_v15, %v3568_v50 }
 0x3c2   :  { %v3625_v45 = vadd.f32 %v6369_v35, %v3602_v63  ;;  %v3603_v0 = vmul.f32 %v6362_v15, %v3560_v49 }
 0x3c3   :  { %v3643_v6 = vmax.f32 %v3627_v8, 0.0  ;;  %v3628_v33 = vadd.f32 %v6369_v35, %v3605_v19 }
 0x3c4   :  { %v3641_v41 = vmax.f32 %v3625_v45, 0.0  ;;  %v3626_v5 = vadd.f32 %v6369_v35, %v3603_v0  ;;  %v4291_v29 = vpop.f32.mrb[72].mxu1 }
 0x3c5   :  { %3659 = vst [vmem:[%s6475_s7 + $0x50] sm:$0xff] %v3643_v6  ;;  %v3644_v22 = vmax.f32 %v3628_v33, 0.0  ;;  %v3581_v51 = vadd.f32 %v4291_v29, %v3484_v23  ;;  %v3572_v36 = vpop.f32.mrb[73].mxu1 }
 0x3c6   :  { %3657 = vst [vmem:[%s6475_s7 + $0x40] sm:$0xff] %v3641_v41  ;;  %v3642_v11 = vmax.f32 %v3626_v5, 0.0  ;;  %v3573_v27 = vadd.f32 %v3572_v36, %v6355_v2  ;;  %v4292_v46 = vpop.f32.mrb[74].mxu1 }
 0x3c7   :  { %3660 = vst [vmem:[%s6475_s7 + $0x58] sm:$0xff] %v3644_v22  ;;  %v3608_v54 = vmul.f32 %v6362_v15, %v3581_v51  ;;  %v3584_v25 = vadd.f32 %v4292_v46, %v6381_v55  ;;  %v3575_v40 = vpop.f32.mrb[75].mxu1 }
 0x3c8   :  { %3658 = vst [vmem:[%s6475_s7 + $0x48] sm:$0xff] %v3642_v11  ;;  %v3606_v23 = vmul.f32 %v6362_v15, %v3573_v27  ;;  %v3576_v48 = vadd.f32 %v3575_v40, %v6357_v59 }
 0x3c9   :  { %v3631_v2 = vadd.f32 %v6369_v35, %v3608_v54  ;;  %v3609_v38 = vmul.f32 %v6362_v15, %v3584_v25 }
 0x3ca   :  { %v3629_v24 = vadd.f32 %v6369_v35, %v3606_v23  ;;  %v3607_v16 = vmul.f32 %v6362_v15, %v3576_v48 }
 0x3cb   :  { %v3647_v20 = vmax.f32 %v3631_v2, 0.0  ;;  %v3632_v55 = vadd.f32 %v6369_v35, %v3609_v38 }
 0x3cc   :  { %v3645_v37 = vmax.f32 %v3629_v24, 0.0  ;;  %v3630_v9 = vadd.f32 %v6369_v35, %v3607_v16 }
 0x3cd   :  { %3663 = vst [vmem:[%s6475_s7 + $0x70] sm:$0xff] %v3647_v20  ;;  %v3648_v31 = vmax.f32 %v3632_v55, 0.0 }
 0x3ce   :  { %3661 = vst [vmem:[%s6475_s7 + $0x60] sm:$0xff] %v3645_v37  ;;  %v3646_v59 = vmax.f32 %v3630_v9, 0.0 }
 0x3cf   :  { %3664 = vst [vmem:[%s6475_s7 + $0x78] sm:$0xff] %v3648_v31 }
 0x3d0   :  { %3662 = vst [vmem:[%s6475_s7 + $0x68] sm:$0xff] %v3646_v59 }

</bundles_post_ra>
